<compile_context>
chip_gen: v6e
topology: v6e:2x2x1
jax: 0.10.0
libtpu: 0.0.40
codegen_flags: <defaults>
</compile_context>

<pallas_src>
import numpy as np
import jax
import jax.numpy as jnp
from jax.experimental import pallas as pl
from jax.experimental.pallas import tpu as pltpu

LANE = 128  # TPU lane width; channel dims are padded to a multiple of this


def _round_up(v, m):
    return (v + m - 1) // m * m


def _ggc_block_kernel(blk_dst_ref, blk_src_ref, first_ref, last_ref,
                      a_ref, x_ref, h_ref, wi_ref, wh_ref, b_ref,
                      out_f32_ref, out_bf16_ref, acc_ref):
    """One non-zero adjacency block of one GatedGraphConv layer.

    The 1-D grid runs over the compacted list of non-zero [T, T] adjacency blocks,
    sorted by destination block, so every dst tile is a contiguous run of steps.

    a_ref   : [1, T, T]   bf16  adjacency block, A[dst, src] = edge multiplicity
    x_ref   : [T, Cp]     bf16  source-node features for this block's src tile
    h_ref   : [T, Cp]     f32   hidden state for this block's dst tile
    wi_ref  : [Cp, 3Cp]   bf16  (W[l] @ W_ih^T), gate columns (r | z | n)
    wh_ref  : [Cp, 3Cp]   bf16  W_hh^T,          gate columns (r | z | n)
    b_ref   : [2, 3Cp]    f32   row 0 = b_ih, row 1 = b_hh (same gate layout)
    out_*   : [T, Cp]           updated hidden state for the dst tile (f32 + bf16)
    acc_ref : [T, Cp]     f32   running A @ x accumulator for the dst tile
    """
    n = pl.program_id(0)
    Cp = h_ref.shape[1]

    # first block of this dst run -> reset the aggregation accumulator
    @pl.when(first_ref[n] == 1)
    def _():
        acc_ref[...] = jnp.zeros_like(acc_ref)

    # aggregate messages for this (dst, src) block: acc += A_blk @ x_src
    # (the per-layer W[l] has been folded into wi_ref, so this is the only
    #  per-block work; f32 accumulation on the MXU)
    acc_ref[...] += jnp.dot(a_ref[0], x_ref[...],
                            preferred_element_type=jnp.float32)

    # last block of this dst run -> apply the GRU cell and store the new state
    @pl.when(last_ref[n] == 1)
    def _():
        h = h_ref[...]
        ax = acc_ref[...]
        gi = jnp.dot(ax.astype(wi_ref.dtype), wi_ref[...],
                     preferred_element_type=jnp.float32) + b_ref[0:1, :]
        gh = jnp.dot(h.astype(wh_ref.dtype), wh_ref[...],
                     preferred_element_type=jnp.float32) + b_ref[1:2, :]
        r = jax.nn.sigmoid(gi[:, 0 * Cp:1 * Cp] + gh[:, 0 * Cp:1 * Cp])
        z = jax.nn.sigmoid(gi[:, 1 * Cp:2 * Cp] + gh[:, 1 * Cp:2 * Cp])
        c = jnp.tanh(gi[:, 2 * Cp:3 * Cp] + r * gh[:, 2 * Cp:3 * Cp])
        new_h = (1.0 - z) * c + z * h
        out_f32_ref[...] = new_h
        out_bf16_ref[...] = new_h.astype(jnp.bfloat16)


def gated_graph_conv(x, edge_index, edge_attr, params, *, out_channels,
                     num_layers, tile_n=256):
    """JAX wrapper: padding / block-structure / weight fusion is glue, compute is Pallas.

    x          : [N, Fin] float32, Fin <= out_channels
    edge_index : [2, E]   int32, row 0 = source nodes, row 1 = target nodes
    edge_attr  : ignored (the reference module drops it)
    """
    del edge_attr
    N, fin = x.shape
    C = out_channels
    L = num_layers
    assert fin <= C, "input feature dim must be <= out_channels"

    Cp = _round_up(max(C, LANE), LANE)       # lane-padded channel dim
    T = tile_n                               # dst/src node tile (256: better DMA/MXU amortization)
    Np = _round_up(max(N, T), T)             # padded node count (multiple of T)
    nB = Np // T

    # ---- host-side block-sparsity structure (preprocessing, not compute) -------
    # TODO(synk): if edge_index must stay traced/jittable, fall back to a dense
    # block mask; here the structure is built host-side like standard GNN preproc.
    src = np.asarray(edge_index[0]).astype(np.int64)
    dst = np.asarray(edge_index[1]).astype(np.int64)
    bid = (dst // T) * nB + (src // T)
    # guarantee every dst block appears at least once so its GRU update always runs
    bid_all = np.concatenate([bid, np.arange(nB, dtype=np.int64) * nB])
    uniq = np.unique(bid_all)                            # sorted -> grouped by dst block
    nb = int(uniq.shape[0])
    blk_dst = (uniq // nB).astype(np.int32)
    blk_src = (uniq % nB).astype(np.int32)
    first = np.ones((nb,), np.int32)
    first[1:] = (blk_dst[1:] != blk_dst[:-1]).astype(np.int32)
    last = np.ones((nb,), np.int32)
    last[:-1] = (blk_dst[1:] != blk_dst[:-1]).astype(np.int32)

    # compacted adjacency blocks: A[n, r, c] = #edges with dst = blk_dst[n]*T + r,
    #                                                         src = blk_src[n]*T + c
    edge_pos = np.searchsorted(uniq, bid).astype(np.int32)
    a_blocks = (jnp.zeros((nb, T, T), jnp.float32)
                .at[jnp.asarray(edge_pos),
                    jnp.asarray((dst % T).astype(np.int32)),
                    jnp.asarray((src % T).astype(np.int32))].add(1.0)
                ).astype(jnp.bfloat16)   # exact for edge multiplicities <= 256

    # ---- padded node state ------------------------------------------------------
    h0 = jnp.zeros((Np, Cp), jnp.float32).at[:N, :fin].set(x.astype(jnp.float32))

    # ---- fold W[l] into the GRU input path; gate columns laid out (r | z | n) ---
    W = params["weight"].astype(jnp.float32)       # [L, C, C]
    w_ih = params["w_ih"].astype(jnp.float32)      # [3C, C]
    w_hh = params["w_hh"].astype(jnp.float32)      # [3C, C]
    b_ih = params["b_ih"].astype(jnp.float32)      # [3C]
    b_hh = params["b_hh"].astype(jnp.float32)      # [3C]

    wih_fused = jnp.einsum("lij,kj->lik", W, w_ih)  # [L, C, 3C] = W[l] @ W_ih^T
    whh_t = w_hh.T                                  # [C, 3C]

    wi = jnp.zeros((L, Cp, 3 * Cp), jnp.float32)
    wh = jnp.zeros((L, Cp, 3 * Cp), jnp.float32)
    bias = jnp.zeros((2, 3 * Cp), jnp.float32)
    for g in range(3):                              # r, z, n
        wi = wi.at[:, :C, g * Cp:g * Cp + C].set(wih_fused[:, :, g * C:(g + 1) * C])
        wh = wh.at[:, :C, g * Cp:g * Cp + C].set(whh_t[None, :, g * C:(g + 1) * C])
        bias = bias.at[0, g * Cp:g * Cp + C].set(b_ih[g * C:(g + 1) * C])
        bias = bias.at[1, g * Cp:g * Cp + C].set(b_hh[g * C:(g + 1) * C])
    wi = wi.astype(jnp.bfloat16)
    wh = wh.astype(jnp.bfloat16)
    # TODO(synk): for C < 128 pack the gate columns to 3*C lanes to cut gate-matmul
    # work (~4x at C=32) at the price of sub-128-lane slices; skipped here.

    # ---- VMEM budget, clamped per generation (v7x has 64 MiB per TensorCore) ----
    vmem_est = (
        2 * T * T * 2                  # adjacency blocks (bf16, double-buffered)
        + 2 * T * Cp * 2               # x tiles (bf16, double-buffered)
        + 2 * T * Cp * 4               # h tiles (f32, double-buffered)
        + 2 * T * Cp * (4 + 2)         # output tiles (f32 + bf16, double-buffered)
        + 2 * 2 * Cp * 3 * Cp * 2      # gate weights (bf16)
        + 2 * 2 * 3 * Cp * 4           # bias
        + T * Cp * 4                   # accumulator scratch
        + 6 * T * 3 * Cp * 4           # gate intermediates
    )
    try:
        cap = int(getattr(pltpu.get_tpu_info(), "vmem_capacity_bytes", 0)) or (64 << 20)
    except Exception:
        cap = 64 << 20                 # conservative fallback: v7x per-core VMEM
    vmem_bytes = int(min(max(2 * vmem_est, 32 << 20), (cap * 3) // 4))

    grid_spec = pltpu.PrefetchScalarGridSpec(
        num_scalar_prefetch=4,         # blk_dst, blk_src, first, last (SMEM)
        grid=(nb,),
        in_specs=[
            pl.BlockSpec((1, T, T), lambda n, d, s, f, l_: (n, 0, 0)),     # A block
            pl.BlockSpec((T, Cp), lambda n, d, s, f, l_: (s[n], 0)),       # x (src tile, bf16)
            pl.BlockSpec((T, Cp), lambda n, d, s, f, l_: (d[n], 0)),       # h (dst tile, f32)
            pl.BlockSpec((Cp, 3 * Cp), lambda n, d, s, f, l_: (0, 0)),     # Wi (fetched once)
            pl.BlockSpec((Cp, 3 * Cp), lambda n, d, s, f, l_: (0, 0)),     # Wh (fetched once)
            pl.BlockSpec((2, 3 * Cp), lambda n, d, s, f, l_: (0, 0)),      # bias (fetched once)
        ],
        out_specs=(
            pl.BlockSpec((T, Cp), lambda n, d, s, f, l_: (d[n], 0)),       # h' f32
            pl.BlockSpec((T, Cp), lambda n, d, s, f, l_: (d[n], 0)),       # h' bf16 (next layer's x)
        ),
        scratch_shapes=[pltpu.VMEM((T, Cp), jnp.float32)],
    )

    layer_call = pl.pallas_call(
        _ggc_block_kernel,
        out_shape=(jax.ShapeDtypeStruct((Np, Cp), jnp.float32),
                   jax.ShapeDtypeStruct((Np, Cp), jnp.bfloat16)),
        grid_spec=grid_spec,
        compiler_params=pltpu.CompilerParams(
            dimension_semantics=("arbitrary",),   # accumulator carried across the run
            vmem_limit_bytes=vmem_bytes),
    )

    blk_dst_j = jnp.asarray(blk_dst)
    blk_src_j = jnp.asarray(blk_src)
    first_j = jnp.asarray(first)
    last_j = jnp.asarray(last)

    h_f32 = h0
    h_bf16 = h0.astype(jnp.bfloat16)
    # TODO(synk): for graphs whose compacted A + x + weights fit VMEM, fuse the L
    # layers into a single pallas_call to avoid re-streaming A from HBM per layer.
    for l in range(L):
        h_f32, h_bf16 = layer_call(blk_dst_j, blk_src_j, first_j, last_j,
                                   a_blocks, h_bf16, h_f32, wi[l], wh[l], bias)

    return h_f32[:N, :C]


def init_params(key, out_channels, num_layers, bias=True):
    """Deterministic init mirroring PyG GatedGraphConv + torch.nn.GRUCell shapes."""
    C = out_channels
    k0, k1, k2, k3, k4 = jax.random.split(key, 5)
    glorot_scale = (6.0 / (C + C)) ** 0.5
    gru_scale = 1.0 / (C ** 0.5)
    params = {
        "weight": jax.random.uniform(k0, (num_layers, C, C), jnp.float32,
                                     -glorot_scale, glorot_scale),
        "w_ih": jax.random.uniform(k1, (3 * C, C), jnp.float32, -gru_scale, gru_scale),
        "w_hh": jax.random.uniform(k2, (3 * C, C), jnp.float32, -gru_scale, gru_scale),
    }
    if bias:
        params["b_ih"] = jax.random.uniform(k3, (3 * C,), jnp.float32, -gru_scale, gru_scale)
        params["b_hh"] = jax.random.uniform(k4, (3 * C,), jnp.float32, -gru_scale, gru_scale)
    else:
        params["b_ih"] = jnp.zeros((3 * C,), jnp.float32)
        params["b_hh"] = jnp.zeros((3 * C,), jnp.float32)
    return params


if __name__ == "__main__":
    # small deterministic example: 16 nodes, 16 input features, out_channels=32,
    # num_layers=3, 48 directed edges
    N, FIN, C, L, E = 16, 16, 32, 3, 48

    key = jax.random.PRNGKey(0)
    kx, ke, kp = jax.random.split(key, 3)

    x = jax.random.normal(kx, (N, FIN), jnp.float32)
    edge_index = jax.random.randint(ke, (2, E), 0, N, jnp.int32)
    edge_attr = jax.random.normal(key, (E, 4), jnp.float32)  # ignored, as in the module
    params = init_params(kp, out_channels=C, num_layers=L, bias=True)

    out = gated_graph_conv(x, edge_index, edge_attr, params,
                           out_channels=C, num_layers=L)
    out = jax.block_until_ready(out)
    assert out.shape == (N, C) and out.dtype == jnp.float32
    assert bool(jnp.all(jnp.isfinite(out)))

    print("KERNEL_OK")
</pallas_src>

<mosaic_0001>
module attributes {stable_mosaic.version = 11 : i64} {
  func.func @_ggc_block_kernel(%arg0: i32, %arg1: memref<1xi32, #tpu.memory_space<smem>>, %arg2: memref<1xi32, #tpu.memory_space<smem>>, %arg3: memref<1xi32, #tpu.memory_space<smem>>, %arg4: memref<1xi32, #tpu.memory_space<smem>>, %arg5: memref<1x256x256xbf16, #tpu.memory_space<vmem>>, %arg6: memref<256x128xbf16, #tpu.memory_space<vmem>>, %arg7: memref<256x128xf32, #tpu.memory_space<vmem>>, %arg8: memref<128x384xbf16, #tpu.memory_space<vmem>>, %arg9: memref<128x384xbf16, #tpu.memory_space<vmem>>, %arg10: memref<2x384xf32, #tpu.memory_space<vmem>>, %arg11: memref<256x128xf32, #tpu.memory_space<vmem>>, %arg12: memref<256x128xbf16, #tpu.memory_space<vmem>>, %arg13: memref<256x128xf32, #tpu.memory_space<vmem>>) attributes {dimension_semantics = [#tpu.dimension_semantics<arbitrary>], iteration_bounds = array<i64: 1>, scalar_prefetch = 4 : i64, scratch_operands = 1 : i64, tpu.core_type = #tpu.core_type<tc>, window_params = [{transform_indices = @transform_0, window_bounds = array<i64: 1, 256, 256>}, {transform_indices = @transform_1, window_bounds = array<i64: 256, 128>}, {transform_indices = @transform_2, window_bounds = array<i64: 256, 128>}, {pipeline_mode = #tpu.pipeline_mode<synchronous>, transform_indices = @transform_3, window_bounds = array<i64: 128, 384>}, {pipeline_mode = #tpu.pipeline_mode<synchronous>, transform_indices = @transform_4, window_bounds = array<i64: 128, 384>}, {pipeline_mode = #tpu.pipeline_mode<synchronous>, transform_indices = @transform_5, window_bounds = array<i64: 2, 384>}, {transform_indices = @transform_6, window_bounds = array<i64: 256, 128>}, {transform_indices = @transform_7, window_bounds = array<i64: 256, 128>}]} {
    %0 = arith.index_cast %arg0 : i32 to index
    %1 = memref.load %arg3[%0] : memref<1xi32, #tpu.memory_space<smem>>
    %c1_i32 = arith.constant 1 : i32
    %2 = arith.cmpi eq, %1, %c1_i32 : i32
    %3 = arith.extui %2 : i1 to i32
    %c0_i32 = arith.constant 0 : i32
    %4 = arith.cmpi ne, %3, %c0_i32 : i32
    scf.if %4 {
      %cst_10 = arith.constant 0.000000e+00 : f32
      %17 = vector.broadcast %cst_10 : f32 to vector<256x128xf32>
      %c0_11 = arith.constant 0 : index
      %c0_12 = arith.constant 0 : index
      %18 = vector.load %arg13[%c0_11, %c0_12] : memref<256x128xf32, #tpu.memory_space<vmem>>, vector<256x128xf32>
      tpu.vector_store %arg13[%c0_11, %c0_12], %17 {strides = array<i32>} : memref<256x128xf32, #tpu.memory_space<vmem>>, vector<256x128xf32>,
    } else {
    }
    %c0 = arith.constant 0 : index
    %c0_0 = arith.constant 0 : index
    %5 = vector.load %arg13[%c0, %c0_0] : memref<256x128xf32, #tpu.memory_space<vmem>>, vector<256x128xf32>
    %c0_1 = arith.constant 0 : index
    %c0_2 = arith.constant 0 : index
    %c0_3 = arith.constant 0 : index
    %6 = vector.load %arg5[%c0_1, %c0_2, %c0_3] : memref<1x256x256xbf16, #tpu.memory_space<vmem>>, vector<1x256x256xbf16>
    %7 = vector.shape_cast %6 : vector<1x256x256xbf16> to vector<256x256xbf16>
    %c0_4 = arith.constant 0 : index
    %c0_5 = arith.constant 0 : index
    %8 = vector.load %arg6[%c0_4, %c0_5] : memref<256x128xbf16, #tpu.memory_space<vmem>>, vector<256x128xbf16>
    %cst = arith.constant dense<0.000000e+00> : vector<256x128xf32>
    %9 = tpu.matmul %7, %8, %cst {dimension_numbers = #tpu.dot_dimension_numbers<[1], [0], [0], [1], [0, 0, 1, 1], [], []>} : vector<256x256xbf16>, vector<256x128xbf16>, vector<256x128xf32> -> vector<256x128xf32>
    %10 = arith.addf %5, %9 : vector<256x128xf32>
    %c0_6 = arith.constant 0 : index
    %c0_7 = arith.constant 0 : index
    %11 = vector.load %arg13[%c0_6, %c0_7] : memref<256x128xf32, #tpu.memory_space<vmem>>, vector<256x128xf32>
    tpu.vector_store %arg13[%c0_6, %c0_7], %10 {strides = array<i32>} : memref<256x128xf32, #tpu.memory_space<vmem>>, vector<256x128xf32>,
    %12 = arith.index_cast %arg0 : i32 to index
    %13 = memref.load %arg4[%12] : memref<1xi32, #tpu.memory_space<smem>>
    %c1_i32_8 = arith.constant 1 : i32
    %14 = arith.cmpi eq, %13, %c1_i32_8 : i32
    %15 = arith.extui %14 : i1 to i32
    %c0_i32_9 = arith.constant 0 : i32
    %16 = arith.cmpi ne, %15, %c0_i32_9 : i32
    scf.if %16 {
      %c0_10 = arith.constant 0 : index
      %c0_11 = arith.constant 0 : index
      %17 = vector.load %arg7[%c0_10, %c0_11] : memref<256x128xf32, #tpu.memory_space<vmem>>, vector<256x128xf32>
      %c0_12 = arith.constant 0 : index
      %c0_13 = arith.constant 0 : index
      %18 = vector.load %arg13[%c0_12, %c0_13] : memref<256x128xf32, #tpu.memory_space<vmem>>, vector<256x128xf32>
      %19 = arith.truncf %18 : vector<256x128xf32> to vector<256x128xbf16>
      %c0_14 = arith.constant 0 : index
      %c0_15 = arith.constant 0 : index
      %20 = vector.load %arg8[%c0_14, %c0_15] : memref<128x384xbf16, #tpu.memory_space<vmem>>, vector<128x384xbf16>
      %cst_16 = arith.constant dense<0.000000e+00> : vector<256x384xf32>
      %21 = tpu.matmul %19, %20, %cst_16 {dimension_numbers = #tpu.dot_dimension_numbers<[1], [0], [0], [1], [0, 0, 1, 1], [], []>} : vector<256x128xbf16>, vector<128x384xbf16>, vector<256x384xf32> -> vector<256x384xf32>
      %c0_17 = arith.constant 0 : index
      %c0_18 = arith.constant 0 : index
      %22 = vector.load %arg10[%c0_17, %c0_18] : memref<2x384xf32, #tpu.memory_space<vmem>>, vector<1x384xf32>
      %23 = vector.broadcast %22 : vector<1x384xf32> to vector<256x384xf32>
      %24 = arith.addf %21, %23 : vector<256x384xf32>
      %25 = arith.truncf %17 : vector<256x128xf32> to vector<256x128xbf16>
      %c0_19 = arith.constant 0 : index
      %c0_20 = arith.constant 0 : index
      %26 = vector.load %arg9[%c0_19, %c0_20] : memref<128x384xbf16, #tpu.memory_space<vmem>>, vector<128x384xbf16>
      %cst_21 = arith.constant dense<0.000000e+00> : vector<256x384xf32>
      %27 = tpu.matmul %25, %26, %cst_21 {dimension_numbers = #tpu.dot_dimension_numbers<[1], [0], [0], [1], [0, 0, 1, 1], [], []>} : vector<256x128xbf16>, vector<128x384xbf16>, vector<256x384xf32> -> vector<256x384xf32>
      %c1 = arith.constant 1 : index
      %c0_22 = arith.constant 0 : index
      %28 = vector.load %arg10[%c1, %c0_22] : memref<2x384xf32, #tpu.memory_space<vmem>>, vector<1x384xf32>
      %29 = vector.broadcast %28 : vector<1x384xf32> to vector<256x384xf32>
      %30 = arith.addf %27, %29 : vector<256x384xf32>
      %31 = vector.extract_strided_slice %24 {offsets = [0, 0], sizes = [256, 128], strides = [1, 1]} : vector<256x384xf32> to vector<256x128xf32>
      %32 = vector.extract_strided_slice %30 {offsets = [0, 0], sizes = [256, 128], strides = [1, 1]} : vector<256x384xf32> to vector<256x128xf32>
      %33 = arith.addf %31, %32 : vector<256x128xf32>
      %34 = arith.negf %33 : vector<256x128xf32>
      %35 = math.exp %34 : vector<256x128xf32>
      %cst_23 = arith.constant 1.000000e+00 : f32
      %36 = vector.broadcast %cst_23 : f32 to vector<256x128xf32>
      %37 = arith.addf %36, %35 : vector<256x128xf32>
      %38 = arith.divf %36, %37 : vector<256x128xf32>
      %39 = vector.extract_strided_slice %24 {offsets = [0, 128], sizes = [256, 128], strides = [1, 1]} : vector<256x384xf32> to vector<256x128xf32>
      %40 = vector.extract_strided_slice %30 {offsets = [0, 128], sizes = [256, 128], strides = [1, 1]} : vector<256x384xf32> to vector<256x128xf32>
      %41 = arith.addf %39, %40 : vector<256x128xf32>
      %42 = arith.negf %41 : vector<256x128xf32>
      %43 = math.exp %42 : vector<256x128xf32>
      %cst_24 = arith.constant 1.000000e+00 : f32
      %44 = vector.broadcast %cst_24 : f32 to vector<256x128xf32>
      %45 = arith.addf %44, %43 : vector<256x128xf32>
      %46 = arith.divf %44, %45 : vector<256x128xf32>
      %47 = vector.extract_strided_slice %24 {offsets = [0, 256], sizes = [256, 128], strides = [1, 1]} : vector<256x384xf32> to vector<256x128xf32>
      %48 = vector.extract_strided_slice %30 {offsets = [0, 256], sizes = [256, 128], strides = [1, 1]} : vector<256x384xf32> to vector<256x128xf32>
      %49 = arith.mulf %38, %48 : vector<256x128xf32>
      %50 = arith.addf %47, %49 : vector<256x128xf32>
      %51 = math.tanh %50 : vector<256x128xf32>
      %cst_25 = arith.constant 1.000000e+00 : f32
      %52 = vector.broadcast %cst_25 : f32 to vector<256x128xf32>
      %53 = arith.subf %52, %46 : vector<256x128xf32>
      %54 = arith.mulf %53, %51 : vector<256x128xf32>
      %55 = arith.mulf %46, %17 : vector<256x128xf32>
      %56 = arith.addf %54, %55 : vector<256x128xf32>
      %c0_26 = arith.constant 0 : index
      %c0_27 = arith.constant 0 : index
      %57 = vector.load %arg11[%c0_26, %c0_27] : memref<256x128xf32, #tpu.memory_space<vmem>>, vector<256x128xf32>
      tpu.vector_store %arg11[%c0_26, %c0_27], %56 {strides = array<i32>} : memref<256x128xf32, #tpu.memory_space<vmem>>, vector<256x128xf32>,
      %58 = arith.truncf %56 : vector<256x128xf32> to vector<256x128xbf16>
      %c0_28 = arith.constant 0 : index
      %c0_29 = arith.constant 0 : index
      %59 = vector.load %arg12[%c0_28, %c0_29] : memref<256x128xbf16, #tpu.memory_space<vmem>>, vector<256x128xbf16>
      tpu.vector_store %arg12[%c0_28, %c0_29], %58 {strides = array<i32>} : memref<256x128xbf16, #tpu.memory_space<vmem>>, vector<256x128xbf16>,
    } else {
    }
    return
  }
  func.func @transform_0(%arg0: i32, %arg1: memref<1xi32, #tpu.memory_space<smem>>, %arg2: memref<1xi32, #tpu.memory_space<smem>>, %arg3: memref<1xi32, #tpu.memory_space<smem>>, %arg4: memref<1xi32, #tpu.memory_space<smem>>) -> (i32, i32, i32) {
    %c0_i32 = arith.constant 0 : i32
    %c0_i32_0 = arith.constant 0 : i32
    %c0_i32_1 = arith.constant 0 : i32
    return %arg0, %c0_i32, %c0_i32_0 : i32, i32, i32
  }
  func.func @transform_1(%arg0: i32, %arg1: memref<1xi32, #tpu.memory_space<smem>>, %arg2: memref<1xi32, #tpu.memory_space<smem>>, %arg3: memref<1xi32, #tpu.memory_space<smem>>, %arg4: memref<1xi32, #tpu.memory_space<smem>>) -> (i32, i32) {
    %0 = arith.index_cast %arg0 : i32 to index
    %1 = memref.load %arg2[%0] : memref<1xi32, #tpu.memory_space<smem>>
    %c0_i32 = arith.constant 0 : i32
    %c0_i32_0 = arith.constant 0 : i32
    return %1, %c0_i32 : i32, i32
  }
  func.func @transform_2(%arg0: i32, %arg1: memref<1xi32, #tpu.memory_space<smem>>, %arg2: memref<1xi32, #tpu.memory_space<smem>>, %arg3: memref<1xi32, #tpu.memory_space<smem>>, %arg4: memref<1xi32, #tpu.memory_space<smem>>) -> (i32, i32) {
    %0 = arith.index_cast %arg0 : i32 to index
    %1 = memref.load %arg1[%0] : memref<1xi32, #tpu.memory_space<smem>>
    %c0_i32 = arith.constant 0 : i32
    %c0_i32_0 = arith.constant 0 : i32
    return %1, %c0_i32 : i32, i32
  }
  func.func @transform_3(%arg0: i32, %arg1: memref<1xi32, #tpu.memory_space<smem>>, %arg2: memref<1xi32, #tpu.memory_space<smem>>, %arg3: memref<1xi32, #tpu.memory_space<smem>>, %arg4: memref<1xi32, #tpu.memory_space<smem>>) -> (i32, i32) {
    %c0_i32 = arith.constant 0 : i32
    %c0_i32_0 = arith.constant 0 : i32
    %c0_i32_1 = arith.constant 0 : i32
    return %c0_i32, %c0_i32_0 : i32, i32
  }
  func.func @transform_4(%arg0: i32, %arg1: memref<1xi32, #tpu.memory_space<smem>>, %arg2: memref<1xi32, #tpu.memory_space<smem>>, %arg3: memref<1xi32, #tpu.memory_space<smem>>, %arg4: memref<1xi32, #tpu.memory_space<smem>>) -> (i32, i32) {
    %c0_i32 = arith.constant 0 : i32
    %c0_i32_0 = arith.constant 0 : i32
    %c0_i32_1 = arith.constant 0 : i32
    return %c0_i32, %c0_i32_0 : i32, i32
  }
  func.func @transform_5(%arg0: i32, %arg1: memref<1xi32, #tpu.memory_space<smem>>, %arg2: memref<1xi32, #tpu.memory_space<smem>>, %arg3: memref<1xi32, #tpu.memory_space<smem>>, %arg4: memref<1xi32, #tpu.memory_space<smem>>) -> (i32, i32) {
    %c0_i32 = arith.constant 0 : i32
    %c0_i32_0 = arith.constant 0 : i32
    %c0_i32_1 = arith.constant 0 : i32
    return %c0_i32, %c0_i32_0 : i32, i32
  }
  func.func @transform_6(%arg0: i32, %arg1: memref<1xi32, #tpu.memory_space<smem>>, %arg2: memref<1xi32, #tpu.memory_space<smem>>, %arg3: memref<1xi32, #tpu.memory_space<smem>>, %arg4: memref<1xi32, #tpu.memory_space<smem>>) -> (i32, i32) {
    %0 = arith.index_cast %arg0 : i32 to index
    %1 = memref.load %arg1[%0] : memref<1xi32, #tpu.memory_space<smem>>
    %c0_i32 = arith.constant 0 : i32
    %c0_i32_0 = arith.constant 0 : i32
    return %1, %c0_i32 : i32, i32
  }
  func.func @transform_7(%arg0: i32, %arg1: memref<1xi32, #tpu.memory_space<smem>>, %arg2: memref<1xi32, #tpu.memory_space<smem>>, %arg3: memref<1xi32, #tpu.memory_space<smem>>, %arg4: memref<1xi32, #tpu.memory_space<smem>>) -> (i32, i32) {
    %0 = arith.index_cast %arg0 : i32 to index
    %1 = memref.load %arg1[%0] : memref<1xi32, #tpu.memory_space<smem>>
    %c0_i32 = arith.constant 0 : i32
    %c0_i32_0 = arith.constant 0 : i32
    return %1, %c0_i32 : i32, i32
  }
}

</mosaic_0001>

<bundles_post_ra>
// kernel: tpu_custom_call.1
= control target key start
LH: loop header
LB: loop body
LE: loop exit
PB: predicated region body
PF: predicated region fallthrough
CT: control target
= control target key end

     0   :  { %s5269_s0 = inlined_call_operand.<no memory space> [shape: s32[1], index: 0, kind: input, shape index: {}]   ;;  %s5270_s1 = inlined_call_operand.<no memory space> [shape: s32[1], index: 1, kind: input, shape index: {}]   ;;  %s5271_s2 = inlined_call_operand.<no memory space> [shape: s32[1], index: 2, kind: input, shape index: {}]   ;;  %s5272_s3 = inlined_call_operand.<no memory space> [shape: s32[1], index: 3, kind: input, shape index: {}]   ;;  %s5273_s4 = inlined_call_operand.hbm [shape: bf16[1,256,256], index: 4, kind: input, shape index: {}]   ;;  %s5274_s5 = inlined_call_operand.hbm [shape: bf16[256,128], index: 5, kind: input, shape index: {}]   ;;  %s5275_s6 = inlined_call_operand.hbm [shape: f32[256,128], index: 6, kind: input, shape index: {}]   ;;  %s5276_s7 = inlined_call_operand.hbm [shape: bf16[128,384], index: 7, kind: input, shape index: {}]   ;;  %s5277_s8 = inlined_call_operand.hbm [shape: bf16[128,384], index: 8, kind: input, shape index: {}]   ;;  %s5278_s9 = inlined_call_operand.vmem [shape: f32[2,384], index: 9, kind: input, shape index: {}]   ;;  %s5279_s10 = inlined_call_operand.hbm [shape: f32[256,128], index: 10, kind: output, shape index: {0}]   ;;  %s5280_s11 = inlined_call_operand.hbm [shape: bf16[256,128], index: 11, kind: output, shape index: {1}]  }
   0x1   :  { %17 = sst [smem:[#allocation4]] %s5269_s0 }
   0x2   :  { %20 = sst [smem:[#allocation7]] %s5272_s3 }
   0x3   :  { %21 = vsyncpa [#allocation9], 0 }
   0x4   :  { %22 = vsyncpa [#allocation12], 0 }
   0x5   :  { %23 = vsyncpa [#allocation15], 0 }
   0x6   :  { %24 = vsyncpa [#allocation10], 0  ;;  %s3016_s23 = sshll.u32 %s5270_s1, 11 }
   0x7   :  { %25 = vsyncpa [#allocation19], 0  ;;  %s46_s26 = scalar_lea.hbm %s5274_s5, %s3016_s23  ;;  %s4071_s27 = smov [#allocation11]  }
   0x8   :  { %s47_s28 = sshll.u32 %s4071_s27, 4  ;;  %s3913_s0 = scalar_lea.hbm %s46_s26, 2048  ;;  %s48_s28 = int_to_ptr.vmem [resolvable:$true] %s47_s28 }
   0x9   :  { %p3914_p0 = scmp.ne.s32.totalorder %s46_s26, %s3913_s0  ;;  %s3915_s30 = scalar_lea.hbm %s5274_s5, 2048 }
   0xa   :  { %p3916_p1 = scmp.lt.s32.totalorder %s46_s26, %s5274_s5  ;;  %p3917_p2 = scmp.lt.s32.totalorder %s3915_s30, %s3913_s0 }
   0xc   :  { %p3918_p3 = por %p3917_p2, %p3916_p1 }
   0xe   :  { %p3919_p4 = pnand %p3918_p3, %p3914_p0 }
  0x10   :  { %3922 = shalt.err (!%p3919_p4)
}
  0x11   :  { %s3923_s1 = scalar_lea.vmem %s48_s28, 2048  ;;  %p3928_p6 = scmp.lt.s32.totalorder %s48_s28, %s48_s28 }
  0x12   :  { %p3924_p5 = scmp.ne.s32.totalorder %s48_s28, %s3923_s1  ;;  %p3929_p7 = scmp.lt.s32.totalorder %s3923_s1, %s3923_s1 }
  0x14   :  { %p3930_p8 = por %p3929_p7, %p3928_p6 }
  0x16   :  { %p3931_p9 = pnand %p3930_p8, %p3924_p5 }
  0x18   :  { %3934 = shalt.err (!%p3931_p9)
}
  0x19   :  { %s4072_s14 = smov 64   ;;  %s4073_s15 = smov 4  }
  0x1a   :  { %53 = dma.hbm_to_vmem [thread:$0]  %s46_s26, 2048, %s48_s28, [#allocation12], %s4072_s14, %s4072_s14, %s4073_s15  }
  0x1b   :  { %s4074_s16 = smov [#allocation14]  }
  0x1c   :  { %s75_s17 = sshll.u32 %s4074_s16, 4  ;;  %s76_s17 = int_to_ptr.vmem [resolvable:$true] %s75_s17 }
  0x1d   :  { %s3943_s5 = scalar_lea.vmem %s76_s17, 3072  ;;  %p3948_p11 = scmp.lt.s32.totalorder %s76_s17, %s76_s17 }
  0x1e   :  { %p3944_p10 = scmp.ne.s32.totalorder %s76_s17, %s3943_s5  ;;  %p3949_p12 = scmp.lt.s32.totalorder %s3943_s5, %s3943_s5 }
  0x20   :  { %p3950_p13 = por %p3949_p12, %p3948_p11 }
  0x22   :  { %p3951_p0 = pnand %p3950_p13, %p3944_p10 }
  0x24   :  { %3954 = shalt.err (!%p3951_p0)
}
  0x25   :  { %s4075_s18 = smov 192   ;;  %s4076_s19 = smov 12  }
  0x26   :  { %81 = dma.hbm_to_vmem [thread:$0]  %s5276_s7, 3072, %s76_s17, [#allocation15], %s4075_s18, %s4075_s18, %s4076_s19  }
  0x27   :  { %s4077_s22 = smov [#allocation8]   ;;  %s56_s24 = sld [smem:[#allocation4]] }
  0x28   :  { %s31_s23 = sshll.u32 %s4077_s22, 4  ;;  %s32_s23 = int_to_ptr.vmem [resolvable:$true] %s31_s23 }
  0x29   :  { %s3963_s25 = scalar_lea.vmem %s32_s23, 4096  ;;  %p3968_p2 = scmp.lt.s32.totalorder %s32_s23, %s32_s23 }
  0x2a   :  { %p3964_p1 = scmp.ne.s32.totalorder %s32_s23, %s3963_s25  ;;  %p3969_p3 = scmp.lt.s32.totalorder %s3963_s25, %s3963_s25 }
  0x2c   :  { %p3970_p4 = por %p3969_p3, %p3968_p2 }
  0x2e   :  { %p3971_p5 = pnand %p3970_p4, %p3964_p1 }
  0x30   :  { %3974 = shalt.err (!%p3971_p5)
}
  0x31   :  { %s4078_s26 = smov 128   ;;  %s4079_s27 = smov 8  }
  0x32   :  { %37 = dma.hbm_to_vmem [thread:$0]  %s5273_s4, 4096, %s32_s23, [#allocation9], %s4078_s26, %s4078_s26, %s4079_s27  }
  0x33   :  { %s4080_s7 = smov [#allocation13]   ;;  %s4081_s3 = smov [#allocation16]  }
  0x34   :  { %s63_s29 = sshll.u32 %s4080_s7, 4  ;;  %s87_s30 = sshll.u32 %s4081_s3, 4  ;;  %s4179_s29 = int_to_ptr.vmem [resolvable:$true] %s63_s29  ;;  %s88_s30 = int_to_ptr.vmem [resolvable:$true] %s87_s30 }
  0x35   :  { %s3983_s12 = scalar_lea.vmem %s88_s30, 3072  ;;  %p3988_p7 = scmp.lt.s32.totalorder %s88_s30, %s88_s30 }
  0x36   :  { %p3984_p6 = scmp.ne.s32.totalorder %s88_s30, %s3983_s12  ;;  %p3989_p8 = scmp.lt.s32.totalorder %s3983_s12, %s3983_s12 }
  0x38   :  { %p3990_p9 = por %p3989_p8, %p3988_p7 }
  0x3a   :  { %p3991_p10 = pnand %p3990_p9, %p3984_p6 }
  0x3c   :  { %3994 = shalt.err (!%p3991_p10)
}
  0x3d   :  { %93 = dma.hbm_to_vmem [thread:$0]  %s5277_s8, 3072, %s88_s30, [#allocation15], %s4075_s18, %s4075_s18, %s4076_s19  }
  0x3e   :  { %s3017_s4 = sshll.u32 %s56_s24, 12  ;;  %s3997_s23 = scalar_lea.hbm %s5275_s6, 4096 }
  0x3f   :  { %s62_s5 = scalar_lea.hbm %s5275_s6, %s3017_s4 }
  0x40   :  { %s3995_s20 = scalar_lea.hbm %s62_s5, 4096  ;;  %p3998_p12 = scmp.lt.s32.totalorder %s62_s5, %s5275_s6 }
  0x41   :  { %p3996_p11 = scmp.ne.s32.totalorder %s62_s5, %s3995_s20  ;;  %p3999_p13 = scmp.lt.s32.totalorder %s3997_s23, %s3995_s20 }
  0x43   :  { %p4000_p0 = por %p3999_p13, %p3998_p12 }
  0x45   :  { %p4001_p1 = pnand %p4000_p0, %p3996_p11 }
  0x47   :  { %4004 = shalt.err (!%p4001_p1)
}
  0x48   :  { %s4005_s8 = scalar_lea.vmem %s4179_s29, 4096  ;;  %p4010_p3 = scmp.lt.s32.totalorder %s4179_s29, %s4179_s29 }
  0x49   :  { %p4006_p2 = scmp.ne.s32.totalorder %s4179_s29, %s4005_s8  ;;  %p4011_p4 = scmp.lt.s32.totalorder %s4005_s8, %s4005_s8 }
  0x4b   :  { %p4012_p5 = por %p4011_p4, %p4010_p3 }
  0x4d   :  { %p4013_p6 = pnand %p4012_p5, %p4006_p2 }
  0x4f   :  { %4016 = shalt.err (!%p4013_p6)
}
  0x50   :  { %69 = dma.hbm_to_vmem [thread:$0]  %s62_s5, 4096, %s4179_s29, [#allocation12], %s4078_s26, %s4078_s26, %s4079_s27  }
  0x51   :  { %4061 = dma.done.wait [#allocation9], 4096  }
  0x52   :  { %4062 = vsyncadd [#allocation9], 4294963200 }
  0x53   :  { %4063 = dma.done.wait [#allocation12], 6144  }
  0x54   :  { %4064 = vsyncadd [#allocation12], 4294961152 }
  0x55   :  { %4065 = dma.done.wait [#allocation15], 6144  }
  0x56   :  { %4066 = vsyncadd [#allocation15], 4294961152  ;;  %p2817_p7 = scmp.ne.s32.totalorder %s5271_s2, 1 }
  0x58   :  { %124 = sbr.rel (%p2817_p7) target bundleno = 110 (0x6e), region = 49 }
  0x5d   :  { %v4082_v0 = vmov 0.0  }
  0x5e   :  { %125 = vst [vmem:[#allocation2 + $0xb0] sm:$0xff] %v4082_v0  ;;  %126 = vst [vmem:[#allocation2] sm:$0xff] %v4082_v0 }
  0x5f   :  { %127 = vst [vmem:[#allocation2 + $0xd8] sm:$0xff] %v4082_v0  ;;  %128 = vst [vmem:[#allocation2 + $0x18] sm:$0xff] %v4082_v0 }
  0x60   :  { %129 = vst [vmem:[#allocation2 + $0x50] sm:$0xff] %v4082_v0  ;;  %130 = vst [vmem:[#allocation2 + $0x68] sm:$0xff] %v4082_v0 }
  0x61   :  { %131 = vst [vmem:[#allocation2 + $0x30] sm:$0xff] %v4082_v0  ;;  %132 = vst [vmem:[#allocation2 + $0x48] sm:$0xff] %v4082_v0 }
  0x62   :  { %133 = vst [vmem:[#allocation2 + $0x80] sm:$0xff] %v4082_v0  ;;  %134 = vst [vmem:[#allocation2 + $0x88] sm:$0xff] %v4082_v0 }
  0x63   :  { %135 = vst [vmem:[#allocation2 + $0xe8] sm:$0xff] %v4082_v0  ;;  %136 = vst [vmem:[#allocation2 + $0xb8] sm:$0xff] %v4082_v0 }
  0x64   :  { %137 = vst [vmem:[#allocation2 + $0x60] sm:$0xff] %v4082_v0  ;;  %138 = vst [vmem:[#allocation2 + $0xf0] sm:$0xff] %v4082_v0 }
  0x65   :  { %139 = vst [vmem:[#allocation2 + $0x8] sm:$0xff] %v4082_v0  ;;  %140 = vst [vmem:[#allocation2 + $0x78] sm:$0xff] %v4082_v0 }
  0x66   :  { %141 = vst [vmem:[#allocation2 + $0x38] sm:$0xff] %v4082_v0  ;;  %142 = vst [vmem:[#allocation2 + $0x58] sm:$0xff] %v4082_v0 }
  0x67   :  { %143 = vst [vmem:[#allocation2 + $0x40] sm:$0xff] %v4082_v0  ;;  %144 = vst [vmem:[#allocation2 + $0xc8] sm:$0xff] %v4082_v0 }
  0x68   :  { %145 = vst [vmem:[#allocation2 + $0xe0] sm:$0xff] %v4082_v0  ;;  %146 = vst [vmem:[#allocation2 + $0x90] sm:$0xff] %v4082_v0 }
  0x69   :  { %147 = vst [vmem:[#allocation2 + $0x70] sm:$0xff] %v4082_v0  ;;  %148 = vst [vmem:[#allocation2 + $0xc0] sm:$0xff] %v4082_v0 }
  0x6a   :  { %149 = vst [vmem:[#allocation2 + $0xa8] sm:$0xff] %v4082_v0  ;;  %150 = vst [vmem:[#allocation2 + $0xd0] sm:$0xff] %v4082_v0 }
  0x6b   :  { %151 = vst [vmem:[#allocation2 + $0x10] sm:$0xff] %v4082_v0  ;;  %152 = vst [vmem:[#allocation2 + $0x28] sm:$0xff] %v4082_v0 }
  0x6c   :  { %153 = vst [vmem:[#allocation2 + $0xa0] sm:$0xff] %v4082_v0  ;;  %154 = vst [vmem:[#allocation2 + $0xf8] sm:$0xff] %v4082_v0 }
  0x6d   :  { %155 = vst [vmem:[#allocation2 + $0x20] sm:$0xff] %v4082_v0  ;;  %156 = vst [vmem:[#allocation2 + $0x98] sm:$0xff] %v4082_v0 }
  0x6e PF:  { %v3434_v1 = vld [vmem:[#allocation11 + $0x78] sm:$0xff]   ;;  %v3436_v3 = vld [vmem:[#allocation11 + $0x70] sm:$0xff]   ;;  %v3438_v5 = vld [vmem:[#allocation11 + $0x68] sm:$0xff]   ;;  %s4207_s2 = sld [smem:[#allocation7]] }
  0x6f   :  { %v3435_v2 = vld [vmem:[#allocation11 + $0x38] sm:$0xff]   ;;  %3147 = vmatprep.subr.bf16.mxu0 %v3434_v1  ;;  %3403 = vmatprep.subr.bf16.mxu1 %v3434_v1  ;;  %v3437_v4 = vld [vmem:[#allocation11 + $0x30] sm:$0xff]   ;;  %v3439_v6 = vld [vmem:[#allocation11 + $0x28] sm:$0xff]  }
  0x70   :  { %3148 = vmatpush3.bf16.msra.mxu0 %v3435_v2  ;;  %3411 = vmatpush3.bf16.msra.mxu1 %v3435_v2  ;;  %v3440_v7 = vld [vmem:[#allocation11 + $0x60] sm:$0xff]   ;;  %v3442_v9 = vld [vmem:[#allocation11 + $0x58] sm:$0xff]   ;;  %v3444_v11 = vld [vmem:[#allocation11 + $0x50] sm:$0xff]  }
  0x71   :  { %3149 = vmatprep.subr.bf16.mxu0 %v3436_v3  ;;  %3404 = vmatprep.subr.bf16.mxu1 %v3436_v3  ;;  %v3441_v8 = vld [vmem:[#allocation11 + $0x20] sm:$0xff]   ;;  %v3443_v10 = vld [vmem:[#allocation11 + $0x18] sm:$0xff]   ;;  %v3445_v14 = vld [vmem:[#allocation11 + $0x10] sm:$0xff]  }
  0x72   :  { %v3452_v12 = vld [vmem:[#allocation8 + $0x4] ss:$8 sps:$4 sm:$0xff]   ;;  %v3450_v19 = vld [vmem:[#allocation8] ss:$8 sps:$4 sm:$0xff]   ;;  %v3456_v21 = vld [vmem:[#allocation8 + $0x14] ss:$8 sps:$4 sm:$0xff]  }
  0x73   :  { %v3455_v13 = vld [vmem:[#allocation8 + $0x84] ss:$8 sps:$4 sm:$0xff]   ;;  %541 = vmatprep.mubr.bf16.mxu0 %v3452_v12  ;;  %v3453_v20 = vld [vmem:[#allocation8 + $0x80] ss:$8 sps:$4 sm:$0xff]   ;;  %v3458_v22 = vld [vmem:[#allocation8 + $0x94] ss:$8 sps:$4 sm:$0xff]  }
  0x74   :  { %3150 = vmatpush3.bf16.msra.mxu0 %v3437_v4  ;;  %3412 = vmatpush3.bf16.msra.mxu1 %v3437_v4  ;;  %v3446_v15 = vld [vmem:[#allocation11 + $0x48] sm:$0xff]   ;;  %v3448_v17 = vld [vmem:[#allocation11 + $0x40] sm:$0xff]   ;;  %v3460_v23 = vld [vmem:[#allocation8 + $0x10] ss:$8 sps:$4 sm:$0xff]   ;;  %p2866_p8 = scmp.ne.s32.totalorder %s4207_s2, 1 }
  0x75   :  { %3151 = vmatprep.subr.bf16.mxu0 %v3438_v5  ;;  %3405 = vmatprep.subr.bf16.mxu1 %v3438_v5  ;;  %v3447_v16 = vld [vmem:[#allocation11 + $0x8] sm:$0xff]   ;;  %v3449_v18 = vld [vmem:[#allocation11] sm:$0xff]   ;;  %v3461_v24 = vld [vmem:[#allocation8 + $0x90] ss:$8 sps:$4 sm:$0xff]  }
  0x76   :  { %605 = vmatprep.mubr.bf16.mxu1 %v3455_v13  ;;  %v3462_v25 = vld [vmem:[#allocation8 + $0x24] ss:$8 sps:$4 sm:$0xff]   ;;  %v3466_v27 = vld [vmem:[#allocation8 + $0x20] ss:$8 sps:$4 sm:$0xff]   ;;  %v3468_v29 = vld [vmem:[#allocation8 + $0x34] ss:$8 sps:$4 sm:$0xff]  }
  0x77   :  { %v3464_v26 = vld [vmem:[#allocation8 + $0xa4] ss:$8 sps:$4 sm:$0xff]   ;;  %v3467_v28 = vld [vmem:[#allocation8 + $0xa0] ss:$8 sps:$4 sm:$0xff]   ;;  %v3470_v30 = vld [vmem:[#allocation8 + $0xb4] ss:$8 sps:$4 sm:$0xff]  }
  0x78   :  { %3152 = vmatpush3.bf16.msra.mxu0 %v3439_v6  ;;  %3413 = vmatpush3.bf16.msra.mxu1 %v3439_v6  ;;  %v3472_v31 = vld [vmem:[#allocation8 + $0x30] ss:$8 sps:$4 sm:$0xff]   ;;  %v3474_v33 = vld [vmem:[#allocation8 + $0x44] ss:$8 sps:$4 sm:$0xff]   ;;  %v3478_v35 = vld [vmem:[#allocation8 + $0x40] ss:$8 sps:$4 sm:$0xff]  }
  0x79   :  { %3153 = vmatprep.subr.bf16.mxu0 %v3440_v7  ;;  %3406 = vmatprep.subr.bf16.mxu1 %v3440_v7  ;;  %v3473_v32 = vld [vmem:[#allocation8 + $0xb0] ss:$8 sps:$4 sm:$0xff]   ;;  %v3476_v34 = vld [vmem:[#allocation8 + $0xc4] ss:$8 sps:$4 sm:$0xff]   ;;  %v3479_v36 = vld [vmem:[#allocation8 + $0xc0] ss:$8 sps:$4 sm:$0xff]  }
  0x7a   :  { %v3480_v37 = vld [vmem:[#allocation8 + $0x54] ss:$8 sps:$4 sm:$0xff]   ;;  %v3484_v39 = vld [vmem:[#allocation8 + $0x50] ss:$8 sps:$4 sm:$0xff]   ;;  %v3486_v41 = vld [vmem:[#allocation8 + $0x64] ss:$8 sps:$4 sm:$0xff]  }
  0x7b   :  { %v3482_v38 = vld [vmem:[#allocation8 + $0xd4] ss:$8 sps:$4 sm:$0xff]   ;;  %v3485_v40 = vld [vmem:[#allocation8 + $0xd0] ss:$8 sps:$4 sm:$0xff]   ;;  %v3488_v42 = vld [vmem:[#allocation8 + $0xe4] ss:$8 sps:$4 sm:$0xff]  }
  0x7c   :  { %3154 = vmatpush3.bf16.msra.mxu0 %v3441_v8  ;;  %3414 = vmatpush3.bf16.msra.mxu1 %v3441_v8  ;;  %v3490_v43 = vld [vmem:[#allocation8 + $0x60] ss:$8 sps:$4 sm:$0xff]   ;;  %v3492_v45 = vld [vmem:[#allocation8 + $0x74] ss:$8 sps:$4 sm:$0xff]   ;;  %v3496_v47 = vld [vmem:[#allocation8 + $0x70] ss:$8 sps:$4 sm:$0xff]  }
  0x7d   :  { %3155 = vmatprep.subr.bf16.mxu0 %v3442_v9  ;;  %3407 = vmatprep.subr.bf16.mxu1 %v3442_v9  ;;  %v3491_v44 = vld [vmem:[#allocation8 + $0xe0] ss:$8 sps:$4 sm:$0xff]   ;;  %v3494_v46 = vld [vmem:[#allocation8 + $0xf4] ss:$8 sps:$4 sm:$0xff]   ;;  %v3497_v48 = vld [vmem:[#allocation8 + $0xf0] ss:$8 sps:$4 sm:$0xff]  }
  0x7e   :  { %v157_v51 = vld [vmem:[#allocation2 + $0xb0] sm:$0xff]  ;;  %v173_v53 = vld [vmem:[#allocation2 + $0x38] sm:$0xff]  ;;  %v158_v61 = vld [vmem:[#allocation2] sm:$0xff] }
  0x7f   :  { %v174_v63 = vld [vmem:[#allocation2 + $0x58] sm:$0xff]  ;;  %v175_v9 = vld [vmem:[#allocation2 + $0x40] sm:$0xff] }
  0x80   :  { %3156 = vmatpush3.bf16.msra.mxu0 %v3443_v10  ;;  %3415 = vmatpush3.bf16.msra.mxu1 %v3443_v10  ;;  %v159_v7 = vld [vmem:[#allocation2 + $0xd8] sm:$0xff] }
  0x81   :  { %3157 = vmatprep.subr.bf16.mxu0 %v3444_v11  ;;  %3408 = vmatprep.subr.bf16.mxu1 %v3444_v11 }
  0x84   :  { %3158 = vmatpush3.bf16.msra.mxu0 %v3445_v14  ;;  %3416 = vmatpush3.bf16.msra.mxu1 %v3445_v14 }
  0x85   :  { %3159 = vmatprep.subr.bf16.mxu0 %v3446_v15  ;;  %3409 = vmatprep.subr.bf16.mxu1 %v3446_v15 }
  0x88   :  { %3160 = vmatpush3.bf16.msra.mxu0 %v3447_v16  ;;  %3417 = vmatpush3.bf16.msra.mxu1 %v3447_v16 }
  0x89   :  { %3161 = vmatprep.subr.bf16.mxu0 %v3448_v17  ;;  %3410 = vmatprep.subr.bf16.mxu1 %v3448_v17  ;;  %v160_v17 = vld [vmem:[#allocation2 + $0x18] sm:$0xff] }
  0x8c   :  { %3162 = vmatpush3.bf16.msra.mxu0 %v3449_v18  ;;  %3418 = vmatpush3.bf16.msra.mxu1 %v3449_v18 }
  0x8f   :  { %542 = vmatmul.mubr.bf16.vlgmr.msra.gmra.mxu0 %v3450_v19  ;;  %606 = vmatmul.mubr.bf16.vlgmr.msra.gmra.mxu1 %v3453_v20  ;;  %v176_v19 = vld [vmem:[#allocation2 + $0xc8] sm:$0xff] }
  0x90   :  { %549 = vmatprep.mubr.bf16.mxu0 %v3456_v21  ;;  %613 = vmatprep.mubr.bf16.mxu1 %v3458_v22 }
  0x97   :  { %550 = vmatmul.mubr.bf16.gmra.mxu0 %v3460_v23  ;;  %614 = vmatmul.mubr.bf16.gmra.mxu1 %v3461_v24 }
  0x98   :  { %557 = vmatprep.mubr.bf16.mxu0 %v3462_v25  ;;  %621 = vmatprep.mubr.bf16.mxu1 %v3464_v26 }
  0x9f   :  { %558 = vmatmul.mubr.bf16.gmra.mxu0 %v3466_v27  ;;  %622 = vmatmul.mubr.bf16.gmra.mxu1 %v3467_v28  ;;  %v161_v27 = vld [vmem:[#allocation2 + $0x50] sm:$0xff] }
  0xa0   :  { %565 = vmatprep.mubr.bf16.mxu0 %v3468_v29  ;;  %629 = vmatprep.mubr.bf16.mxu1 %v3470_v30  ;;  %v177_v29 = vld [vmem:[#allocation2 + $0xe0] sm:$0xff] }
  0xa7   :  { %566 = vmatmul.mubr.bf16.gmra.mxu0 %v3472_v31  ;;  %630 = vmatmul.mubr.bf16.gmra.mxu1 %v3473_v32 }
  0xa8   :  { %573 = vmatprep.mubr.bf16.mxu0 %v3474_v33  ;;  %637 = vmatprep.mubr.bf16.mxu1 %v3476_v34 }
  0xaf   :  { %574 = vmatmul.mubr.bf16.gmra.mxu0 %v3478_v35  ;;  %638 = vmatmul.mubr.bf16.gmra.mxu1 %v3479_v36 }
  0xb0   :  { %581 = vmatprep.mubr.bf16.mxu0 %v3480_v37  ;;  %645 = vmatprep.mubr.bf16.mxu1 %v3482_v38  ;;  %v162_v37 = vld [vmem:[#allocation2 + $0x68] sm:$0xff] }
  0xb7   :  { %582 = vmatmul.mubr.bf16.gmra.mxu0 %v3484_v39  ;;  %646 = vmatmul.mubr.bf16.gmra.mxu1 %v3485_v40  ;;  %v178_v39 = vld [vmem:[#allocation2 + $0x90] sm:$0xff] }
  0xb8   :  { %589 = vmatprep.mubr.bf16.mxu0 %v3486_v41  ;;  %653 = vmatprep.mubr.bf16.mxu1 %v3488_v42 }
  0xbf   :  { %590 = vmatmul.mubr.bf16.gmra.mxu0 %v3490_v43  ;;  %654 = vmatmul.mubr.bf16.gmra.mxu1 %v3491_v44 }
  0xc0   :  { %597 = vmatprep.mubr.bf16.mxu0 %v3492_v45  ;;  %661 = vmatprep.mubr.bf16.mxu1 %v3494_v46 }
  0xc7   :  { %598 = vmatmul.mubr.bf16.gmra.mxu0 %v3496_v47  ;;  %662 = vmatmul.mubr.bf16.gmra.mxu1 %v3497_v48  ;;  %v163_v47 = vld [vmem:[#allocation2 + $0x30] sm:$0xff] }
 0x14f   :  { %v3163_v49 = vpop.f32.mrf.mxu0  ;;  %v3211_v50 = vpop.f32.mrf.mxu1 }
 0x151   :  { %v3164_v52 = vpop.f32.mrf.mxu0  ;;  %v3212_v54 = vpop.f32.mrf.mxu1 }
 0x152   :  { %v3165_v55 = vadd.f32 %v3164_v52, %v3163_v49  ;;  %v3213_v56 = vadd.f32 %v3212_v54, %v3211_v50  ;;  %v179_v49 = vld [vmem:[#allocation2 + $0x70] sm:$0xff] }
 0x153   :  { %v3166_v57 = vpop.f32.mrf.mxu0  ;;  %v3214_v58 = vpop.f32.mrf.mxu1 }
 0x154   :  { %v670_v59 = vadd.f32 %v3165_v55, %v157_v51  ;;  %v686_v60 = vadd.f32 %v3213_v56, %v173_v53 }
 0x155   :  { %v3167_v62 = vpop.f32.mrf.mxu0  ;;  %v3215_v0 = vpop.f32.mrf.mxu1 }
 0x156   :  { %702 = vst [vmem:[#allocation2 + $0xb0] sm:$0xff] %v670_v59  ;;  %718 = vst [vmem:[#allocation2 + $0x38] sm:$0xff] %v686_v60  ;;  %v3168_v1 = vadd.f32 %v3167_v62, %v3166_v57  ;;  %v3216_v2 = vadd.f32 %v3215_v0, %v3214_v58  ;;  %v164_v57 = vld [vmem:[#allocation2 + $0x48] sm:$0xff]  ;;  %v180_v59 = vld [vmem:[#allocation2 + $0xc0] sm:$0xff] }
 0x157   :  { %v3169_v3 = vpop.f32.mrf.mxu0  ;;  %v3217_v4 = vpop.f32.mrf.mxu1 }
 0x158   :  { %v671_v5 = vadd.f32 %v3168_v1, %v158_v61  ;;  %v687_v6 = vadd.f32 %v3216_v2, %v174_v63 }
 0x159   :  { %v3170_v8 = vpop.f32.mrf.mxu0  ;;  %v3218_v10 = vpop.f32.mrf.mxu1 }
 0x15a   :  { %703 = vst [vmem:[#allocation2] sm:$0xff] %v671_v5  ;;  %719 = vst [vmem:[#allocation2 + $0x58] sm:$0xff] %v687_v6  ;;  %v3171_v11 = vadd.f32 %v3170_v8, %v3169_v3  ;;  %v3219_v12 = vadd.f32 %v3218_v10, %v3217_v4  ;;  %v165_v3 = vld [vmem:[#allocation2 + $0x80] sm:$0xff]  ;;  %v181_v5 = vld [vmem:[#allocation2 + $0xa8] sm:$0xff] }
 0x15b   :  { %v3172_v13 = vpop.f32.mrf.mxu0  ;;  %v3220_v14 = vpop.f32.mrf.mxu1 }
 0x15c   :  { %v672_v15 = vadd.f32 %v3171_v11, %v159_v7  ;;  %v688_v16 = vadd.f32 %v3219_v12, %v175_v9 }
 0x15d   :  { %v3173_v18 = vpop.f32.mrf.mxu0  ;;  %v3221_v20 = vpop.f32.mrf.mxu1 }
 0x15e   :  { %704 = vst [vmem:[#allocation2 + $0xd8] sm:$0xff] %v672_v15  ;;  %720 = vst [vmem:[#allocation2 + $0x40] sm:$0xff] %v688_v16  ;;  %v3174_v21 = vadd.f32 %v3173_v18, %v3172_v13  ;;  %v3222_v22 = vadd.f32 %v3221_v20, %v3220_v14  ;;  %v166_v13 = vld [vmem:[#allocation2 + $0x88] sm:$0xff]  ;;  %v182_v15 = vld [vmem:[#allocation2 + $0xd0] sm:$0xff] }
 0x15f   :  { %v3175_v23 = vpop.f32.mrf.mxu0  ;;  %v3223_v24 = vpop.f32.mrf.mxu1 }
 0x160   :  { %v673_v25 = vadd.f32 %v3174_v21, %v160_v17  ;;  %v689_v26 = vadd.f32 %v3222_v22, %v176_v19 }
 0x161   :  { %v3176_v28 = vpop.f32.mrf.mxu0  ;;  %v3224_v30 = vpop.f32.mrf.mxu1 }
 0x162   :  { %705 = vst [vmem:[#allocation2 + $0x18] sm:$0xff] %v673_v25  ;;  %721 = vst [vmem:[#allocation2 + $0xc8] sm:$0xff] %v689_v26  ;;  %v3177_v31 = vadd.f32 %v3176_v28, %v3175_v23  ;;  %v3225_v32 = vadd.f32 %v3224_v30, %v3223_v24  ;;  %v167_v23 = vld [vmem:[#allocation2 + $0xe8] sm:$0xff]  ;;  %v183_v25 = vld [vmem:[#allocation2 + $0x10] sm:$0xff] }
 0x163   :  { %v3178_v33 = vpop.f32.mrf.mxu0  ;;  %v3226_v34 = vpop.f32.mrf.mxu1 }
 0x164   :  { %v674_v35 = vadd.f32 %v3177_v31, %v161_v27  ;;  %v690_v36 = vadd.f32 %v3225_v32, %v177_v29 }
 0x165   :  { %v3179_v38 = vpop.f32.mrf.mxu0  ;;  %v3227_v40 = vpop.f32.mrf.mxu1 }
 0x166   :  { %706 = vst [vmem:[#allocation2 + $0x50] sm:$0xff] %v674_v35  ;;  %722 = vst [vmem:[#allocation2 + $0xe0] sm:$0xff] %v690_v36  ;;  %v3180_v41 = vadd.f32 %v3179_v38, %v3178_v33  ;;  %v3228_v42 = vadd.f32 %v3227_v40, %v3226_v34  ;;  %v168_v33 = vld [vmem:[#allocation2 + $0xb8] sm:$0xff]  ;;  %v184_v35 = vld [vmem:[#allocation2 + $0x28] sm:$0xff] }
 0x167   :  { %v3181_v43 = vpop.f32.mrf.mxu0  ;;  %v3229_v44 = vpop.f32.mrf.mxu1 }
 0x168   :  { %v675_v45 = vadd.f32 %v3180_v41, %v162_v37  ;;  %v691_v46 = vadd.f32 %v3228_v42, %v178_v39 }
 0x169   :  { %v3182_v48 = vpop.f32.mrf.mxu0  ;;  %v3230_v50 = vpop.f32.mrf.mxu1 }
 0x16a   :  { %707 = vst [vmem:[#allocation2 + $0x68] sm:$0xff] %v675_v45  ;;  %723 = vst [vmem:[#allocation2 + $0x90] sm:$0xff] %v691_v46  ;;  %v3183_v51 = vadd.f32 %v3182_v48, %v3181_v43  ;;  %v3231_v52 = vadd.f32 %v3230_v50, %v3229_v44  ;;  %v169_v43 = vld [vmem:[#allocation2 + $0x60] sm:$0xff] }
 0x16b   :  { %v3184_v53 = vpop.f32.mrf.mxu0  ;;  %v3232_v54 = vpop.f32.mrf.mxu1  ;;  %v185_v45 = vld [vmem:[#allocation2 + $0xa0] sm:$0xff] }
 0x16c   :  { %v676_v55 = vadd.f32 %v3183_v51, %v163_v47  ;;  %v692_v56 = vadd.f32 %v3231_v52, %v179_v49 }
 0x16d   :  { %v3185_v58 = vpop.f32.mrf.mxu0  ;;  %v3233_v60 = vpop.f32.mrf.mxu1 }
 0x16e   :  { %708 = vst [vmem:[#allocation2 + $0x30] sm:$0xff] %v676_v55  ;;  %724 = vst [vmem:[#allocation2 + $0x70] sm:$0xff] %v692_v56  ;;  %v3186_v61 = vadd.f32 %v3185_v58, %v3184_v53  ;;  %v3234_v62 = vadd.f32 %v3233_v60, %v3232_v54  ;;  %v170_v53 = vld [vmem:[#allocation2 + $0xf0] sm:$0xff]  ;;  %v186_v55 = vld [vmem:[#allocation2 + $0xf8] sm:$0xff] }
 0x16f   :  { %v3187_v63 = vpop.f32.mrf.mxu0  ;;  %v3235_v0 = vpop.f32.mrf.mxu1 }
 0x170   :  { %v677_v1 = vadd.f32 %v3186_v61, %v164_v57  ;;  %v693_v2 = vadd.f32 %v3234_v62, %v180_v59 }
 0x171   :  { %v3188_v4 = vpop.f32.mrf.mxu0  ;;  %v3236_v6 = vpop.f32.mrf.mxu1 }
 0x172   :  { %709 = vst [vmem:[#allocation2 + $0x48] sm:$0xff] %v677_v1  ;;  %725 = vst [vmem:[#allocation2 + $0xc0] sm:$0xff] %v693_v2  ;;  %v3189_v7 = vadd.f32 %v3188_v4, %v3187_v63  ;;  %v3237_v8 = vadd.f32 %v3236_v6, %v3235_v0  ;;  %v171_v63 = vld [vmem:[#allocation2 + $0x8] sm:$0xff]  ;;  %v187_v1 = vld [vmem:[#allocation2 + $0x20] sm:$0xff] }
 0x173   :  { %v3190_v9 = vpop.f32.mrf.mxu0  ;;  %v3238_v10 = vpop.f32.mrf.mxu1 }
 0x174   :  { %v678_v11 = vadd.f32 %v3189_v7, %v165_v3  ;;  %v694_v12 = vadd.f32 %v3237_v8, %v181_v5 }
 0x175   :  { %v3191_v14 = vpop.f32.mrf.mxu0  ;;  %v3239_v16 = vpop.f32.mrf.mxu1 }
 0x176   :  { %710 = vst [vmem:[#allocation2 + $0x80] sm:$0xff] %v678_v11  ;;  %726 = vst [vmem:[#allocation2 + $0xa8] sm:$0xff] %v694_v12  ;;  %v3192_v17 = vadd.f32 %v3191_v14, %v3190_v9  ;;  %v3240_v18 = vadd.f32 %v3239_v16, %v3238_v10  ;;  %v172_v9 = vld [vmem:[#allocation2 + $0x78] sm:$0xff] }
 0x177   :  { %v3193_v19 = vpop.f32.mrf.mxu0  ;;  %v3241_v20 = vpop.f32.mrf.mxu1  ;;  %v188_v11 = vld [vmem:[#allocation2 + $0x98] sm:$0xff] }
 0x178   :  { %v679_v21 = vadd.f32 %v3192_v17, %v166_v13  ;;  %v695_v22 = vadd.f32 %v3240_v18, %v182_v15 }
 0x179   :  { %v3194_v24 = vpop.f32.mrf.mxu0  ;;  %v3242_v26 = vpop.f32.mrf.mxu1 }
 0x17a   :  { %711 = vst [vmem:[#allocation2 + $0x88] sm:$0xff] %v679_v21  ;;  %727 = vst [vmem:[#allocation2 + $0xd0] sm:$0xff] %v695_v22  ;;  %v3195_v27 = vadd.f32 %v3194_v24, %v3193_v19  ;;  %v3243_v28 = vadd.f32 %v3242_v26, %v3241_v20 }
 0x17b   :  { %v3196_v29 = vpop.f32.mrf.mxu0  ;;  %v3244_v30 = vpop.f32.mrf.mxu1 }
 0x17c   :  { %v680_v31 = vadd.f32 %v3195_v27, %v167_v23  ;;  %v696_v32 = vadd.f32 %v3243_v28, %v183_v25 }
 0x17d   :  { %v3197_v34 = vpop.f32.mrf.mxu0  ;;  %v3245_v36 = vpop.f32.mrf.mxu1 }
 0x17e   :  { %712 = vst [vmem:[#allocation2 + $0xe8] sm:$0xff] %v680_v31  ;;  %728 = vst [vmem:[#allocation2 + $0x10] sm:$0xff] %v696_v32  ;;  %v3198_v37 = vadd.f32 %v3197_v34, %v3196_v29  ;;  %v3246_v38 = vadd.f32 %v3245_v36, %v3244_v30 }
 0x17f   :  { %v3199_v39 = vpop.f32.mrf.mxu0  ;;  %v3247_v40 = vpop.f32.mrf.mxu1 }
 0x180   :  { %v681_v41 = vadd.f32 %v3198_v37, %v168_v33  ;;  %v697_v42 = vadd.f32 %v3246_v38, %v184_v35 }
 0x181   :  { %v3200_v44 = vpop.f32.mrf.mxu0  ;;  %v3248_v46 = vpop.f32.mrf.mxu1 }
 0x182   :  { %713 = vst [vmem:[#allocation2 + $0xb8] sm:$0xff] %v681_v41  ;;  %729 = vst [vmem:[#allocation2 + $0x28] sm:$0xff] %v697_v42  ;;  %v3201_v47 = vadd.f32 %v3200_v44, %v3199_v39  ;;  %v3249_v48 = vadd.f32 %v3248_v46, %v3247_v40 }
 0x183   :  { %v3202_v49 = vpop.f32.mrf.mxu0  ;;  %v3250_v50 = vpop.f32.mrf.mxu1 }
 0x184   :  { %v682_v51 = vadd.f32 %v3201_v47, %v169_v43  ;;  %v698_v52 = vadd.f32 %v3249_v48, %v185_v45 }
 0x185   :  { %v3203_v54 = vpop.f32.mrf.mxu0  ;;  %v3251_v56 = vpop.f32.mrf.mxu1 }
 0x186   :  { %714 = vst [vmem:[#allocation2 + $0x60] sm:$0xff] %v682_v51  ;;  %730 = vst [vmem:[#allocation2 + $0xa0] sm:$0xff] %v698_v52  ;;  %v3204_v57 = vadd.f32 %v3203_v54, %v3202_v49  ;;  %v3252_v58 = vadd.f32 %v3251_v56, %v3250_v50 }
 0x187   :  { %v3205_v59 = vpop.f32.mrf.mxu0  ;;  %v3253_v60 = vpop.f32.mrf.mxu1 }
 0x188   :  { %v683_v61 = vadd.f32 %v3204_v57, %v170_v53  ;;  %v699_v62 = vadd.f32 %v3252_v58, %v186_v55 }
 0x189   :  { %v3206_v0 = vpop.f32.mrf.mxu0  ;;  %v3254_v2 = vpop.f32.mrf.mxu1 }
 0x18a   :  { %715 = vst [vmem:[#allocation2 + $0xf0] sm:$0xff] %v683_v61  ;;  %731 = vst [vmem:[#allocation2 + $0xf8] sm:$0xff] %v699_v62  ;;  %v3207_v3 = vadd.f32 %v3206_v0, %v3205_v59  ;;  %v3255_v4 = vadd.f32 %v3254_v2, %v3253_v60 }
 0x18b   :  { %v3208_v5 = vpop.f32.mrf.mxu0  ;;  %v3256_v6 = vpop.f32.mrf.mxu1 }
 0x18c   :  { %v684_v7 = vadd.f32 %v3207_v3, %v171_v63  ;;  %v700_v8 = vadd.f32 %v3255_v4, %v187_v1 }
 0x18d   :  { %v3209_v10 = vpop.f32.mrf.mxu0  ;;  %v3257_v12 = vpop.f32.mrf.mxu1 }
 0x18e   :  { %716 = vst [vmem:[#allocation2 + $0x8] sm:$0xff] %v684_v7  ;;  %732 = vst [vmem:[#allocation2 + $0x20] sm:$0xff] %v700_v8  ;;  %v3210_v13 = vadd.f32 %v3209_v10, %v3208_v5  ;;  %v3258_v14 = vadd.f32 %v3257_v12, %v3256_v6  ;;  %738 = sbr.rel (%p2866_p8) target bundleno = 914 (0x392), region = 53 }
 0x190   :  { %v685_v15 = vadd.f32 %v3210_v13, %v172_v9  ;;  %v701_v16 = vadd.f32 %v3258_v14, %v188_v11 }
 0x192   :  { %717 = vst [vmem:[#allocation2 + $0x78] sm:$0xff] %v685_v15  ;;  %733 = vst [vmem:[#allocation2 + $0x98] sm:$0xff] %v701_v16 }
 0x193   :  { %v3498_v17 = vld [vmem:[#allocation14 + $0xac] ss:$12 sps:$4 sm:$0xff]   ;;  %v3500_v18 = vld [vmem:[#allocation14 + $0xb0] ss:$12 sps:$4 sm:$0xff]   ;;  %v4083_v19 = vmov 0   ;;  %v772_v36 = vld [vmem:[#allocation2] sm:$0xff] }
 0x194   :  { %1028 = vmatprep.mubr.bf16.mxu0 %v4083_v19  ;;  %996 = vmatprep.subr.bf16.mxu0 %v3498_v17  ;;  %v3501_v20 = vld [vmem:[#allocation14 + $0xa8] ss:$12 sps:$4 sm:$0xff]   ;;  %v3504_v22 = vld [vmem:[#allocation14 + $0x98] ss:$12 sps:$4 sm:$0xff]   ;;  %v3505_v23 = vld [vmem:[#allocation14 + $0x90] ss:$12 sps:$4 sm:$0xff]  }
 0x195   :  { %3307 = vmatprep.subr.bf16.mxu1 %v3500_v18  ;;  %v3502_v21 = vld [vmem:[#allocation14 + $0x94] ss:$12 sps:$4 sm:$0xff]   ;;  %997 = vmatpush1.bf16.msra.mxu0 %v3501_v20  ;;  %v3506_v24 = vld [vmem:[#allocation14 + $0x7c] ss:$12 sps:$4 sm:$0xff]   ;;  %v3509_v26 = vld [vmem:[#allocation14 + $0x78] ss:$12 sps:$4 sm:$0xff]  }
 0x196   :  { %3308 = vmatpush3.bf16.msra.mxu1 %v3500_v18  ;;  %998 = vmatprep.subr.bf16.mxu0 %v3502_v21  ;;  %v3508_v25 = vld [vmem:[#allocation14 + $0x80] ss:$12 sps:$4 sm:$0xff]   ;;  %v3510_v27 = vld [vmem:[#allocation14 + $0x64] ss:$12 sps:$4 sm:$0xff]   ;;  %v3512_v28 = vld [vmem:[#allocation14 + $0x68] ss:$12 sps:$4 sm:$0xff]  }
 0x197   :  { %3309 = vmatprep.subr.bf16.mxu1 %v3504_v22  ;;  %v3513_v29 = vld [vmem:[#allocation14 + $0x60] ss:$12 sps:$4 sm:$0xff]   ;;  %v3516_v31 = vld [vmem:[#allocation14 + $0x50] ss:$12 sps:$4 sm:$0xff]   ;;  %v3517_v32 = vld [vmem:[#allocation14 + $0x48] ss:$12 sps:$4 sm:$0xff]  }
 0x198   :  { %v3514_v30 = vld [vmem:[#allocation14 + $0x4c] ss:$12 sps:$4 sm:$0xff]   ;;  %v3518_v33 = vld [vmem:[#allocation14 + $0x34] ss:$12 sps:$4 sm:$0xff]   ;;  %v3521_v37 = vld [vmem:[#allocation14 + $0x30] ss:$12 sps:$4 sm:$0xff]  }
 0x199   :  { %999 = vmatpush1.bf16.msra.mxu0 %v3505_v23  ;;  %v3520_v34 = vld [vmem:[#allocation14 + $0x38] ss:$12 sps:$4 sm:$0xff]   ;;  %v771_v35 = vld [vmem:[#allocation2 + $0xb0] sm:$0xff]  ;;  %v3522_v39 = vld [vmem:[#allocation14 + $0x1c] ss:$12 sps:$4 sm:$0xff]  }
 0x19a   :  { %3310 = vmatpush3.bf16.msra.mxu1 %v3504_v22  ;;  %1000 = vmatprep.subr.bf16.mxu0 %v3506_v24  ;;  %v803_v38 = vpack.c.bf16 %v772_v36, %v771_v35  ;;  %v3524_v40 = vld [vmem:[#allocation14 + $0x20] ss:$12 sps:$4 sm:$0xff]   ;;  %v3525_v41 = vld [vmem:[#allocation14 + $0x18] ss:$12 sps:$4 sm:$0xff]   ;;  %v3528_v43 = vld [vmem:[#allocation14 + $0x8] ss:$12 sps:$4 sm:$0xff]  }
 0x19b   :  { %3311 = vmatprep.subr.bf16.mxu1 %v3508_v25  ;;  %v3526_v42 = vld [vmem:[#allocation14 + $0x4] ss:$12 sps:$4 sm:$0xff]   ;;  %v3529_v44 = vld [vmem:[#allocation14] ss:$12 sps:$4 sm:$0xff]   ;;  %v773_v45 = vld [vmem:[#allocation2 + $0xd8] sm:$0xff] }
 0x19c   :  { %3323 = vmatprep.mubr.bf16.mxu1 %v803_v38  ;;  %v774_v46 = vld [vmem:[#allocation2 + $0x18] sm:$0xff]  ;;  %v775_v48 = vld [vmem:[#allocation2 + $0x50] sm:$0xff]  ;;  %v776_v49 = vld [vmem:[#allocation2 + $0x68] sm:$0xff] }
 0x19d   :  { %1001 = vmatpush1.bf16.msra.mxu0 %v3509_v26  ;;  %v3532_v47 = vld [vmem:[#allocation16 + $0xac] ss:$12 sps:$4 sm:$0xff]   ;;  %v804_v50 = vpack.c.bf16 %v774_v46, %v773_v45  ;;  %v3530_v51 = vld [vmem:[#allocation16 + $0xa8] ss:$12 sps:$4 sm:$0xff]   ;;  %v3545_v52 = vld [vmem:[#allocation16 + $0xb0] ss:$12 sps:$4 sm:$0xff]   ;;  %v805_v53 = vpack.c.bf16 %v776_v49, %v775_v48 }
 0x19e   :  { %3312 = vmatpush3.bf16.msra.mxu1 %v3508_v25  ;;  %1002 = vmatprep.subr.bf16.mxu0 %v3510_v27  ;;  %v3535_v54 = vld [vmem:[#allocation16 + $0x94] ss:$12 sps:$4 sm:$0xff]   ;;  %v778_v56 = vld [vmem:[#allocation2 + $0x48] sm:$0xff]  ;;  %v3533_v57 = vld [vmem:[#allocation16 + $0x90] ss:$12 sps:$4 sm:$0xff]  }
 0x19f   :  { %3313 = vmatprep.subr.bf16.mxu1 %v3512_v28  ;;  %v777_v55 = vld [vmem:[#allocation2 + $0x30] sm:$0xff]  ;;  %v779_v58 = vld [vmem:[#allocation2 + $0x80] sm:$0xff]  ;;  %v780_v59 = vld [vmem:[#allocation2 + $0x88] sm:$0xff] }
 0x1a0   :  { %v3538_v60 = vld [vmem:[#allocation16 + $0x7c] ss:$12 sps:$4 sm:$0xff]   ;;  %v806_v61 = vpack.c.bf16 %v778_v56, %v777_v55  ;;  %v3552_v62 = vld [vmem:[#allocation16 + $0x98] ss:$12 sps:$4 sm:$0xff]   ;;  %v4212_v63 = vpack.c.bf16 %v780_v59, %v779_v58  ;;  %v3556_v4 = vld [vmem:[#allocation16 + $0x80] ss:$12 sps:$4 sm:$0xff]  }
 0x1a1   :  { %1003 = vmatpush1.bf16.msra.mxu0 %v3513_v29  ;;  %v3536_v0 = vld [vmem:[#allocation16 + $0x78] ss:$12 sps:$4 sm:$0xff]   ;;  %v781_v1 = vld [vmem:[#allocation2 + $0xe8] sm:$0xff]  ;;  %v784_v6 = vld [vmem:[#allocation2 + $0xf0] sm:$0xff] }
 0x1a2   :  { %3314 = vmatpush3.bf16.msra.mxu1 %v3512_v28  ;;  %1004 = vmatprep.subr.bf16.mxu0 %v3514_v30  ;;  %v3541_v2 = vld [vmem:[#allocation16 + $0x64] ss:$12 sps:$4 sm:$0xff]   ;;  %v782_v3 = vld [vmem:[#allocation2 + $0xb8] sm:$0xff]  ;;  %v3539_v7 = vld [vmem:[#allocation16 + $0x60] ss:$12 sps:$4 sm:$0xff]  }
 0x1a3   :  { %3315 = vmatprep.subr.bf16.mxu1 %v3516_v31  ;;  %v783_v5 = vld [vmem:[#allocation2 + $0x60] sm:$0xff]  ;;  %v3557_v8 = vld [vmem:[#allocation16 + $0x68] ss:$12 sps:$4 sm:$0xff]   ;;  %v3544_v9 = vld [vmem:[#allocation16 + $0x4c] ss:$12 sps:$4 sm:$0xff]   ;;  %v808_v10 = vpack.c.bf16 %v782_v3, %v781_v1 }
 0x1a4   :  { %v4216_v11 = vpack.c.bf16 %v784_v6, %v783_v5  ;;  %v3542_v12 = vld [vmem:[#allocation16 + $0x48] ss:$12 sps:$4 sm:$0xff]   ;;  %v3558_v13 = vld [vmem:[#allocation16 + $0x50] ss:$12 sps:$4 sm:$0xff]   ;;  %v3559_v16 = vld [vmem:[#allocation16 + $0x38] ss:$12 sps:$4 sm:$0xff]  }
 0x1a5   :  { %1005 = vmatpush1.bf16.msra.mxu0 %v3517_v32  ;;  %v785_v14 = vld [vmem:[#allocation2 + $0x8] sm:$0xff]  ;;  %v3548_v15 = vld [vmem:[#allocation16 + $0x34] ss:$12 sps:$4 sm:$0xff]   ;;  %v786_v17 = vld [vmem:[#allocation2 + $0x78] sm:$0xff] }
 0x1a6   :  { %3316 = vmatpush3.bf16.msra.mxu1 %v3516_v31  ;;  %1006 = vmatprep.subr.bf16.mxu0 %v3518_v33  ;;  %v787_v18 = vld [vmem:[#allocation2 + $0x38] sm:$0xff]  ;;  %v810_v23 = vpack.c.bf16 %v786_v17, %v785_v14  ;;  %v3560_v26 = vld [vmem:[#allocation16 + $0x20] ss:$12 sps:$4 sm:$0xff]   ;;  %v3555_v27 = vld [vmem:[#allocation16 + $0x4] ss:$12 sps:$4 sm:$0xff]  }
 0x1a7   :  { %3317 = vmatprep.subr.bf16.mxu1 %v3520_v34  ;;  %v788_v20 = vld [vmem:[#allocation2 + $0x58] sm:$0xff]  ;;  %v3561_v28 = vld [vmem:[#allocation16 + $0x8] ss:$12 sps:$4 sm:$0xff]   ;;  %v789_v29 = vld [vmem:[#allocation2 + $0x40] sm:$0xff] }
 0x1a8   :  { %v3546_v21 = vld [vmem:[#allocation16 + $0x30] ss:$12 sps:$4 sm:$0xff]   ;;  %v811_v24 = vpack.c.bf16 %v788_v20, %v787_v18  ;;  %v3549_v25 = vld [vmem:[#allocation16 + $0x18] ss:$12 sps:$4 sm:$0xff]   ;;  %v790_v30 = vld [vmem:[#allocation2 + $0xc8] sm:$0xff] }
 0x1a9   :  { %1007 = vmatpush1.bf16.msra.mxu0 %v3521_v37  ;;  %v3551_v22 = vld [vmem:[#allocation16 + $0x1c] ss:$12 sps:$4 sm:$0xff]   ;;  %v791_v31 = vld [vmem:[#allocation2 + $0xe0] sm:$0xff]  ;;  %v792_v32 = vld [vmem:[#allocation2 + $0x90] sm:$0xff] }
 0x1aa   :  { %3318 = vmatpush3.bf16.msra.mxu1 %v3520_v34  ;;  %1008 = vmatprep.subr.bf16.mxu0 %v3522_v39  ;;  %v3553_v33 = vld [vmem:[#allocation16] ss:$12 sps:$4 sm:$0xff]   ;;  %v812_v34 = vpack.c.bf16 %v790_v30, %v789_v29  ;;  %v813_v35 = vpack.c.bf16 %v792_v32, %v791_v31  ;;  %v793_v36 = vld [vmem:[#allocation2 + $0x70] sm:$0xff]  ;;  %v800_v45 = vld [vmem:[#allocation2 + $0xf8] sm:$0xff] }
 0x1ab   :  { %3319 = vmatprep.subr.bf16.mxu1 %v3524_v40  ;;  %v794_v37 = vld [vmem:[#allocation2 + $0xc0] sm:$0xff]  ;;  %v796_v39 = vld [vmem:[#allocation2 + $0xd0] sm:$0xff]  ;;  %v802_v49 = vld [vmem:[#allocation2 + $0x98] sm:$0xff] }
 0x1ac   :  { %v801_v48 = vld [vmem:[#allocation2 + $0x20] sm:$0xff]  ;;  %v742_v55 = vld [vmem:[#allocation13 + $0x18] sm:$0xff]  ;;  %v744_v58 = vld [vmem:[#allocation13 + $0x28] sm:$0xff] }
 0x1ad   :  { %1009 = vmatpush1.bf16.msra.mxu0 %v3525_v41  ;;  %v750_v3 = vld [vmem:[#allocation13 + $0x58] sm:$0xff]  ;;  %v751_v5 = vld [vmem:[#allocation13 + $0x60] sm:$0xff]  ;;  %v752_v6 = vld [vmem:[#allocation13 + $0x68] sm:$0xff] }
 0x1ae   :  { %3320 = vmatpush3.bf16.msra.mxu1 %v3524_v40  ;;  %1010 = vmatprep.subr.bf16.mxu0 %v3526_v42  ;;  %v814_v40 = vpack.c.bf16 %v794_v37, %v793_v36  ;;  %v797_v42 = vld [vmem:[#allocation2 + $0x10] sm:$0xff]  ;;  %v759_v17 = vld [vmem:[#allocation13 + $0xa0] sm:$0xff]  ;;  %v760_v18 = vld [vmem:[#allocation13 + $0xa8] sm:$0xff] }
 0x1af   :  { %3321 = vmatprep.subr.bf16.mxu1 %v3528_v43  ;;  %v757_v14 = vld [vmem:[#allocation13 + $0x90] sm:$0xff]  ;;  %v1360_v20 = vpack.c.bf16 %v760_v18, %v759_v17  ;;  %v767_v30 = vld [vmem:[#allocation13 + $0xe0] sm:$0xff]  ;;  %v768_v31 = vld [vmem:[#allocation13 + $0xe8] sm:$0xff] }
 0x1b0   :  { %v1364_v32 = vpack.c.bf16 %v768_v31, %v767_v30 }
 0x1b1   :  { %1011 = vmatpush1.bf16.msra.mxu0 %v3529_v44  ;;  %v799_v44 = vld [vmem:[#allocation2 + $0xa0] sm:$0xff] }
 0x1b2   :  { %3322 = vmatpush3.bf16.msra.mxu1 %v3528_v43  ;;  %3355 = vmatprep.subr.bf16.mxu0 %v3545_v52  ;;  %v798_v43 = vld [vmem:[#allocation2 + $0x28] sm:$0xff] }
 0x1b3   :  { %1544 = vmatprep.subr.bf16.mxu1 %v3532_v47  ;;  %v816_v46 = vpack.c.bf16 %v798_v43, %v797_v42  ;;  %v817_v47 = vpack.c.bf16 %v800_v45, %v799_v44 }
 0x1b4   :  { %1029 = vmatmul.mubr.bf16.vlgmr.msra.gmra.mxu0 %v803_v38  ;;  %v795_v38 = vld [vmem:[#allocation2 + $0xa8] sm:$0xff] }
 0x1b5   :  { %3324 = vmatmul.mubr.bf16.vlgmr.msra.gmra.mxu1 %v804_v50  ;;  %1038 = vmatprep.mubr.bf16.mxu0 %v4083_v19  ;;  %v815_v41 = vpack.c.bf16 %v796_v39, %v795_v38 }
 0x1b6   :  { %1545 = vmatpush1.bf16.msra.mxu1 %v3530_v51  ;;  %3327 = vmatprep.mubr.bf16.mxu1 %v805_v53  ;;  %v4228_v51 = vld [vmem:[#allocation13] sm:$0xff] }
 0x1b7   :  { %1546 = vmatprep.subr.bf16.mxu1 %v3535_v54  ;;  %3356 = vmatpush3.bf16.msra.mxu0 %v3545_v52  ;;  %5287 = vst [vmem:[#allocation25_spill] sm:$0xff] %v4228_v51  ;;  %v740_v52 = vld [vmem:[#allocation13 + $0x8] sm:$0xff]  ;;  %v741_v54 = vld [vmem:[#allocation13 + $0x10] sm:$0xff] }
 0x1b8   :  { %3357 = vmatprep.subr.bf16.mxu0 %v3552_v62  ;;  %v1351_v56 = vpack.c.bf16 %v742_v55, %v741_v54 }
 0x1ba   :  { %1547 = vmatpush1.bf16.msra.mxu1 %v3533_v57  ;;  %v743_v57 = vld [vmem:[#allocation13 + $0x20] sm:$0xff] }
 0x1bb   :  { %1548 = vmatprep.subr.bf16.mxu1 %v3538_v60  ;;  %3358 = vmatpush3.bf16.msra.mxu0 %v3552_v62  ;;  %v1352_v59 = vpack.c.bf16 %v744_v58, %v743_v57  ;;  %v745_v60 = vld [vmem:[#allocation13 + $0x30] sm:$0xff] }
 0x1bc   :  { %1039 = vmatmul.mubr.bf16.gmra.mxu0 %v804_v50  ;;  %3359 = vmatprep.subr.bf16.mxu0 %v3556_v4  ;;  %v818_v50 = vpack.c.bf16 %v802_v49, %v801_v48 }
 0x1bd   :  { %3328 = vmatmul.mubr.bf16.gmra.mxu1 %v806_v61  ;;  %1048 = vmatprep.mubr.bf16.mxu0 %v4083_v19 }
 0x1be   :  { %3331 = vmatprep.mubr.bf16.mxu1 %v4212_v63  ;;  %1549 = vmatpush1.bf16.msra.mxu1 %v3536_v0  ;;  %v748_v0 = vld [vmem:[#allocation13 + $0x48] sm:$0xff] }
 0x1bf   :  { %1550 = vmatprep.subr.bf16.mxu1 %v3541_v2  ;;  %3360 = vmatpush3.bf16.msra.mxu0 %v3556_v4  ;;  %v749_v2 = vld [vmem:[#allocation13 + $0x50] sm:$0xff] }
 0x1c0   :  { %3361 = vmatprep.subr.bf16.mxu0 %v3557_v8  ;;  %v1355_v4 = vpack.c.bf16 %v750_v3, %v749_v2 }
 0x1c2   :  { %1551 = vmatpush1.bf16.msra.mxu1 %v3539_v7  ;;  %v1356_v7 = vpack.c.bf16 %v752_v6, %v751_v5 }
 0x1c3   :  { %1552 = vmatprep.subr.bf16.mxu1 %v3544_v9  ;;  %3362 = vmatpush3.bf16.msra.mxu0 %v3557_v8  ;;  %v753_v8 = vld [vmem:[#allocation13 + $0x70] sm:$0xff]  ;;  %v754_v9 = vld [vmem:[#allocation13 + $0x78] sm:$0xff] }
 0x1c4   :  { %1049 = vmatmul.mubr.bf16.gmra.mxu0 %v805_v53  ;;  %3363 = vmatprep.subr.bf16.mxu0 %v3558_v13  ;;  %v1350_v53 = vpack.c.bf16 %v740_v52, %v4228_v51 }
 0x1c5   :  { %3332 = vmatmul.mubr.bf16.gmra.mxu1 %v808_v10  ;;  %1058 = vmatprep.mubr.bf16.mxu0 %v4083_v19 }
 0x1c6   :  { %3335 = vmatprep.mubr.bf16.mxu1 %v4216_v11  ;;  %1553 = vmatpush1.bf16.msra.mxu1 %v3542_v12  ;;  %v756_v12 = vld [vmem:[#allocation13 + $0x88] sm:$0xff] }
 0x1c7   :  { %1554 = vmatprep.subr.bf16.mxu1 %v3548_v15  ;;  %3364 = vmatpush3.bf16.msra.mxu0 %v3558_v13  ;;  %v758_v15 = vld [vmem:[#allocation13 + $0x98] sm:$0xff] }
 0x1c8   :  { %3365 = vmatprep.subr.bf16.mxu0 %v3559_v16 }
 0x1ca   :  { %1555 = vmatpush1.bf16.msra.mxu1 %v3546_v21  ;;  %v761_v21 = vld [vmem:[#allocation13 + $0xb0] sm:$0xff] }
 0x1cb   :  { %1556 = vmatprep.subr.bf16.mxu1 %v3551_v22  ;;  %3366 = vmatpush3.bf16.msra.mxu0 %v3559_v16  ;;  %v1359_v16 = vpack.c.bf16 %v758_v15, %v757_v14  ;;  %v762_v22 = vld [vmem:[#allocation13 + $0xb8] sm:$0xff] }
 0x1cc   :  { %1059 = vmatmul.mubr.bf16.gmra.mxu0 %v806_v61  ;;  %3367 = vmatprep.subr.bf16.mxu0 %v3560_v26  ;;  %v746_v61 = vld [vmem:[#allocation13 + $0x38] sm:$0xff] }
 0x1cd   :  { %3336 = vmatmul.mubr.bf16.gmra.mxu1 %v810_v23  ;;  %1068 = vmatprep.mubr.bf16.mxu0 %v4083_v19  ;;  %v1353_v62 = vpack.c.bf16 %v746_v61, %v745_v60 }
 0x1ce   :  { %3339 = vmatprep.mubr.bf16.mxu1 %v811_v24  ;;  %1557 = vmatpush1.bf16.msra.mxu1 %v3549_v25  ;;  %v764_v25 = vld [vmem:[#allocation13 + $0xc8] sm:$0xff] }
 0x1cf   :  { %1558 = vmatprep.subr.bf16.mxu1 %v3555_v27  ;;  %3368 = vmatpush3.bf16.msra.mxu0 %v3560_v26  ;;  %v765_v27 = vld [vmem:[#allocation13 + $0xd0] sm:$0xff] }
 0x1d0   :  { %3369 = vmatprep.subr.bf16.mxu0 %v3561_v28 }
 0x1d2   :  { %1559 = vmatpush1.bf16.msra.mxu1 %v3553_v33  ;;  %v769_v33 = vld [vmem:[#allocation13 + $0xf0] sm:$0xff] }
 0x1d3   :  { %3370 = vmatpush3.bf16.msra.mxu0 %v3561_v28  ;;  %v766_v28 = vld [vmem:[#allocation13 + $0xd8] sm:$0xff] }
 0x1d4   :  { %1069 = vmatmul.mubr.bf16.gmra.mxu0 %v4212_v63  ;;  %v747_v63 = vld [vmem:[#allocation13 + $0x40] sm:$0xff]  ;;  %v1363_v29 = vpack.c.bf16 %v766_v28, %v765_v27 }
 0x1d5   :  { %3340 = vmatmul.mubr.bf16.gmra.mxu1 %v812_v34  ;;  %1078 = vmatprep.mubr.bf16.mxu0 %v4083_v19  ;;  %v1354_v1 = vpack.c.bf16 %v748_v0, %v747_v63  ;;  %v853_v0 = vlaneseq }
 0x1d6   :  { %3343 = vmatprep.mubr.bf16.mxu1 %v813_v35 }
 0x1d7   :  { %v4317_v5 = vshrl.u32 %v853_v0, 7 }
 0x1dc   :  { %1079 = vmatmul.mubr.bf16.gmra.mxu0 %v808_v10  ;;  %v1357_v10 = vpack.c.bf16 %v754_v9, %v753_v8 }
 0x1dd   :  { %3344 = vmatmul.mubr.bf16.gmra.mxu1 %v814_v40  ;;  %1088 = vmatprep.mubr.bf16.mxu0 %v4083_v19 }
 0x1de   :  { %3347 = vmatprep.mubr.bf16.mxu1 %v815_v41 }
 0x1e4   :  { %1089 = vmatmul.mubr.bf16.gmra.mxu0 %v4216_v11  ;;  %v755_v11 = vld [vmem:[#allocation13 + $0x80] sm:$0xff] }
 0x1e5   :  { %3348 = vmatmul.mubr.bf16.gmra.mxu1 %v816_v46  ;;  %1098 = vmatprep.mubr.bf16.mxu0 %v4083_v19  ;;  %v1358_v13 = vpack.c.bf16 %v756_v12, %v755_v11  ;;  %v851_v11 = vld [vmem:[%s5278_s9] ss:$2 sm:$0x7] }
 0x1e6   :  { %3351 = vmatprep.mubr.bf16.mxu1 %v817_v47 }
 0x1ec   :  { %1099 = vmatmul.mubr.bf16.gmra.mxu0 %v810_v23  ;;  %v1361_v23 = vpack.c.bf16 %v762_v22, %v761_v21 }
 0x1ed   :  { %3352 = vmatmul.mubr.bf16.gmra.mxu1 %v818_v50  ;;  %1108 = vmatprep.mubr.bf16.mxu0 %v4083_v19 }
 0x1ee   :  { %1576 = vmatprep.mubr.bf16.mxu1 %v4083_v19 }
 0x1f4   :  { %1109 = vmatmul.mubr.bf16.gmra.mxu0 %v811_v24  ;;  %v763_v24 = vld [vmem:[#allocation13 + $0xc0] sm:$0xff] }
 0x1f5   :  { %1577 = vmatmul.mubr.bf16.vlgmr.msra.gmra.mxu1 %v1350_v53  ;;  %1118 = vmatprep.mubr.bf16.mxu0 %v4083_v19  ;;  %v1362_v26 = vpack.c.bf16 %v764_v25, %v763_v24 }
 0x1f6   :  { %1586 = vmatprep.mubr.bf16.mxu1 %v4083_v19 }
 0x1fc   :  { %1119 = vmatmul.mubr.bf16.gmra.mxu0 %v812_v34  ;;  %v770_v34 = vld [vmem:[#allocation13 + $0xf8] sm:$0xff] }
 0x1fd   :  { %1587 = vmatmul.mubr.bf16.gmra.mxu1 %v1351_v56  ;;  %1128 = vmatprep.mubr.bf16.mxu0 %v4083_v19 }
 0x1fe   :  { %1596 = vmatprep.mubr.bf16.mxu1 %v4083_v19 }
 0x204   :  { %1129 = vmatmul.mubr.bf16.gmra.mxu0 %v813_v35  ;;  %v1365_v35 = vpack.c.bf16 %v770_v34, %v769_v33 }
 0x205   :  { %1597 = vmatmul.mubr.bf16.gmra.mxu1 %v1352_v59  ;;  %1138 = vmatprep.mubr.bf16.mxu0 %v4083_v19 }
 0x206   :  { %1606 = vmatprep.mubr.bf16.mxu1 %v4083_v19 }
 0x20c   :  { %1139 = vmatmul.mubr.bf16.gmra.mxu0 %v814_v40 }
 0x20d   :  { %1607 = vmatmul.mubr.bf16.gmra.mxu1 %v1353_v62  ;;  %1148 = vmatprep.mubr.bf16.mxu0 %v4083_v19 }
 0x20e   :  { %1616 = vmatprep.mubr.bf16.mxu1 %v4083_v19 }
 0x214   :  { %1149 = vmatmul.mubr.bf16.gmra.mxu0 %v815_v41 }
 0x215   :  { %1617 = vmatmul.mubr.bf16.gmra.mxu1 %v1354_v1  ;;  %1158 = vmatprep.mubr.bf16.mxu0 %v4083_v19 }
 0x216   :  { %1626 = vmatprep.mubr.bf16.mxu1 %v4083_v19 }
 0x21c   :  { %1159 = vmatmul.mubr.bf16.gmra.mxu0 %v816_v46 }
 0x21d   :  { %1627 = vmatmul.mubr.bf16.gmra.mxu1 %v1355_v4  ;;  %1168 = vmatprep.mubr.bf16.mxu0 %v4083_v19 }
 0x21e   :  { %1636 = vmatprep.mubr.bf16.mxu1 %v4083_v19 }
 0x224   :  { %1169 = vmatmul.mubr.bf16.gmra.mxu0 %v817_v47 }
 0x225   :  { %1637 = vmatmul.mubr.bf16.gmra.mxu1 %v1356_v7  ;;  %1178 = vmatprep.mubr.bf16.mxu0 %v4083_v19 }
 0x226   :  { %1646 = vmatprep.mubr.bf16.mxu1 %v4083_v19 }
 0x22c   :  { %1179 = vmatmul.mubr.bf16.gmra.mxu0 %v818_v50 }
 0x22d   :  { %1647 = vmatmul.mubr.bf16.gmra.mxu1 %v1357_v10  ;;  %3371 = vmatprep.mubr.bf16.mxu0 %v1350_v53 }
 0x22e   :  { %1656 = vmatprep.mubr.bf16.mxu1 %v4083_v19 }
 0x234   :  { %3372 = vmatmul.mubr.bf16.vlgmr.msra.gmra.mxu0 %v1351_v56 }
 0x235   :  { %1657 = vmatmul.mubr.bf16.gmra.mxu1 %v1358_v13  ;;  %3375 = vmatprep.mubr.bf16.mxu0 %v1352_v59 }
 0x236   :  { %1666 = vmatprep.mubr.bf16.mxu1 %v4083_v19 }
 0x23c   :  { %3376 = vmatmul.mubr.bf16.gmra.mxu0 %v1353_v62 }
 0x23d   :  { %1667 = vmatmul.mubr.bf16.gmra.mxu1 %v1359_v16  ;;  %3379 = vmatprep.mubr.bf16.mxu0 %v1354_v1 }
 0x23e   :  { %1676 = vmatprep.mubr.bf16.mxu1 %v4083_v19 }
 0x244   :  { %3380 = vmatmul.mubr.bf16.gmra.mxu0 %v1355_v4 }
 0x245   :  { %1677 = vmatmul.mubr.bf16.gmra.mxu1 %v1360_v20  ;;  %3383 = vmatprep.mubr.bf16.mxu0 %v1356_v7 }
 0x246   :  { %1686 = vmatprep.mubr.bf16.mxu1 %v4083_v19 }
 0x24c   :  { %3384 = vmatmul.mubr.bf16.gmra.mxu0 %v1357_v10  ;;  %v5281_v10 = vsub.s32 2, %v4317_v5 }
 0x24d   :  { %1687 = vmatmul.mubr.bf16.gmra.mxu1 %v1361_v23  ;;  %3387 = vmatprep.mubr.bf16.mxu0 %v1358_v13 }
 0x24e   :  { %1696 = vmatprep.mubr.bf16.mxu1 %v4083_v19 }
 0x254   :  { %3388 = vmatmul.mubr.bf16.gmra.mxu0 %v1359_v16  ;;  %v4341_v16 = vrot.slane %v851_v11, %v5281_v10 }
 0x255   :  { %1697 = vmatmul.mubr.bf16.gmra.mxu1 %v1362_v26  ;;  %3391 = vmatprep.mubr.bf16.mxu0 %v1360_v20 }
 0x256   :  { %1706 = vmatprep.mubr.bf16.mxu1 %v4083_v19 }
 0x25c   :  { %3392 = vmatmul.mubr.bf16.gmra.mxu0 %v1361_v23 }
 0x25d   :  { %1707 = vmatmul.mubr.bf16.gmra.mxu1 %v1363_v29  ;;  %3395 = vmatprep.mubr.bf16.mxu0 %v1362_v26 }
 0x25e   :  { %1716 = vmatprep.mubr.bf16.mxu1 %v4083_v19 }
 0x264   :  { %3396 = vmatmul.mubr.bf16.gmra.mxu0 %v1363_v29 }
 0x265   :  { %1717 = vmatmul.mubr.bf16.gmra.mxu1 %v1364_v32  ;;  %3399 = vmatprep.mubr.bf16.mxu0 %v1364_v32 }
 0x266   :  { %1726 = vmatprep.mubr.bf16.mxu1 %v4083_v19 }
 0x26c   :  { %3400 = vmatmul.mubr.bf16.gmra.mxu0 %v1365_v35 }
 0x26d   :  { %1727 = vmatmul.mubr.bf16.gmra.mxu1 %v1365_v35 }
 0x274   :  { %v4253_v36 = vpop.f32.mrf.mxu0 }
 0x275   :  { %v4255_v37 = vpop.f32.mrf.mxu1 }
 0x276   :  { %v4257_v38 = vpop.f32.mrf.mxu0 }
 0x277   :  { %v4259_v39 = vpop.f32.mrf.mxu1 }
 0x278   :  { %v4261_v40 = vpop.f32.mrf.mxu0 }
 0x279   :  { %v4263_v41 = vpop.f32.mrf.mxu1 }
 0x27a   :  { %v4265_v42 = vpop.f32.mrf.mxu0 }
 0x27b   :  { %v4267_v19 = vpop.f32.mrf.mxu1 }
 0x27c   :  { %v4269_v43 = vpop.f32.mrf.mxu0 }
 0x27d   :  { %v4271_v44 = vpop.f32.mrf.mxu1 }
 0x27e   :  { %v4273_v45 = vpop.f32.mrf.mxu0 }
 0x27f   :  { %v4275_v46 = vpop.f32.mrf.mxu1 }
 0x280   :  { %v4277_v47 = vpop.f32.mrf.mxu0 }
 0x281   :  { %v4279_v48 = vpop.f32.mrf.mxu1 }
 0x282   :  { %v4281_v49 = vpop.f32.mrf.mxu0 }
 0x283   :  { %v4283_v50 = vpop.f32.mrf.mxu1 }
 0x284   :  { %v4285_v52 = vpop.f32.mrf.mxu0 }
 0x285   :  { %v4287_v53 = vpop.f32.mrf.mxu1 }
 0x286   :  { %v4289_v54 = vpop.f32.mrf.mxu0 }
 0x287   :  { %v4291_v55 = vpop.f32.mrf.mxu1 }
 0x288   :  { %v4293_v56 = vpop.f32.mrf.mxu0 }
 0x289   :  { %v4295_v57 = vpop.f32.mrf.mxu1 }
 0x28a   :  { %v4297_v58 = vpop.f32.mrf.mxu0 }
 0x28b   :  { %v4299_v59 = vpop.f32.mrf.mxu1 }
 0x28c   :  { %v4301_v60 = vpop.f32.mrf.mxu0 }
 0x28d   :  { %v4303_v61 = vpop.f32.mrf.mxu1 }
 0x28e   :  { %v4305_v62 = vpop.f32.mrf.mxu0 }
 0x28f   :  { %v4307_v63 = vpop.f32.mrf.mxu1 }
 0x290   :  { %v4309_v1 = vpop.f32.mrf.mxu0 }
 0x291   :  { %v4311_v2 = vpop.f32.mrf.mxu1 }
 0x292   :  { %v4313_v3 = vpop.f32.mrf.mxu0 }
 0x293   :  { %v4315_v4 = vpop.f32.mrf.mxu1 }
 0x294   :  { %v4319_v6 = vpop.f32.mrf.mxu0 }
 0x295   :  { %v4321_v7 = vpop.f32.mrf.mxu1 }
 0x296   :  { %v4323_v8 = vpop.f32.mrf.mxu0 }
 0x297   :  { %v4325_v9 = vpop.f32.mrf.mxu1 }
 0x298   :  { %v4331_v12 = vpop.f32.mrf.mxu0 }
 0x299   :  { %v4333_v13 = vpop.f32.mrf.mxu1 }
 0x29a   :  { %v4335_v14 = vpop.f32.mrf.mxu0 }
 0x29b   :  { %v4337_v15 = vpop.f32.mrf.mxu1 }
 0x29c   :  { %v4343_v17 = vpop.f32.mrf.mxu0 }
 0x29d   :  { %v3345_v18 = vpop.f32.mrf.mxu1 }
 0x29e   :  { %v4346_v20 = vadd.f32 %v3345_v18, %v4341_v16  ;;  %v4348_v21 = vpop.f32.mrf.mxu0 }
 0x29f   :  { %v1303_v22 = vpop.f32.mrf.mxu1 }
 0x2a0   :  { %5288 = vst [vmem:[#allocation26_spill] sm:$0xff] %v4346_v20  ;;  %v4351_v23 = vadd.f32 %v1303_v22, %v4341_v16  ;;  %v4353_v24 = vpop.f32.mrf.mxu0 }
 0x2a1   :  { %v3346_v25 = vpop.f32.mrf.mxu1 }
 0x2a2   :  { %5289 = vst [vmem:[#allocation27_spill] sm:$0xff] %v4351_v23  ;;  %v4356_v26 = vadd.f32 %v3346_v25, %v4341_v16  ;;  %v4358_v27 = vpop.f32.mrf.mxu0 }
 0x2a3   :  { %v1306_v28 = vpop.f32.mrf.mxu1 }
 0x2a4   :  { %5290 = vst [vmem:[#allocation28_spill] sm:$0xff] %v4356_v26  ;;  %v4361_v29 = vadd.f32 %v1306_v28, %v4341_v16  ;;  %v4363_v30 = vpop.f32.mrf.mxu0 }
 0x2a5   :  { %5292 = vst [vmem:[#allocation30_spill] sm:$0xff] %v4363_v30  ;;  %v3349_v31 = vpop.f32.mrf.mxu1 }
 0x2a6   :  { %5291 = vst [vmem:[#allocation29_spill] sm:$0xff] %v4361_v29  ;;  %v4366_v32 = vadd.f32 %v3349_v31, %v4341_v16  ;;  %v4368_v33 = vpop.f32.mrf.mxu0  ;;  %v855_v29 = vsub.s32 0, %v4317_v5 }
 0x2a7   :  { %5294 = vst [vmem:[#allocation32_spill] sm:$0xff] %v4368_v33  ;;  %v1319_v34 = vpop.f32.mrf.mxu1 }
 0x2a8   :  { %5293 = vst [vmem:[#allocation31_spill] sm:$0xff] %v4366_v32  ;;  %v4371_v35 = vadd.f32 %v1319_v34, %v4341_v16  ;;  %v4373_v0 = vpop.f32.mrf.mxu0  ;;  %v4400_v20 = vrot.slane %v851_v11, %v855_v29 }
 0x2a9   :  { %5296 = vst [vmem:[#allocation34_spill] sm:$0xff] %v4373_v0  ;;  %v3350_v18 = vpop.f32.mrf.mxu1 }
 0x2aa   :  { %5295 = vst [vmem:[#allocation33_spill] sm:$0xff] %v4371_v35  ;;  %v4376_v22 = vadd.f32 %v3350_v18, %v4341_v16  ;;  %v4378_v25 = vpop.f32.mrf.mxu0  ;;  %v2891_v18 = vld [vmem:[%s5278_s9 + $0x1] ss:$2 sm:$0x7]  ;;  %5305 = vst [vmem:[#allocation43_spill] sm:$0xff] %v4400_v20  ;;  %v1031_v0 = vadd.f32 %v4253_v36, %v4400_v20 }
 0x2ab   :  { %5298 = vst [vmem:[#allocation36_spill] sm:$0xff] %v4378_v25  ;;  %v1322_v28 = vpop.f32.mrf.mxu1 }
 0x2ac   :  { %5297 = vst [vmem:[#allocation35_spill] sm:$0xff] %v4376_v22  ;;  %v4381_v10 = vadd.f32 %v1322_v28, %v4341_v16  ;;  %v4383_v31 = vpop.f32.mrf.mxu0  ;;  %v859_v22 = vsub.s32 1, %v4317_v5 }
 0x2ad   :  { %5300 = vst [vmem:[#allocation38_spill] sm:$0xff] %v4383_v31  ;;  %v3353_v32 = vpop.f32.mrf.mxu1 }
 0x2ae   :  { %5299 = vst [vmem:[#allocation37_spill] sm:$0xff] %v4381_v10  ;;  %v4387_v34 = vadd.f32 %v3353_v32, %v4341_v16  ;;  %v4389_v35 = vpop.f32.mrf.mxu0  ;;  %v4409_v31 = vrot.slane %v851_v11, %v859_v22 }
 0x2af   :  { %5302 = vst [vmem:[#allocation40_spill] sm:$0xff] %v4389_v35  ;;  %v1335_v26 = vpop.f32.mrf.mxu1 }
 0x2b0   :  { %5301 = vst [vmem:[#allocation39_spill] sm:$0xff] %v4387_v34  ;;  %v4396_v28 = vadd.f32 %v1335_v26, %v4341_v16  ;;  %v4398_v10 = vpop.f32.mrf.mxu0  ;;  %v4405_v34 = vrot.slane %v2891_v18, %v855_v29  ;;  %5308 = vst [vmem:[#allocation46_spill] sm:$0xff] %v4409_v31  ;;  %v4414_v26 = vrot.slane %v2891_v18, %v859_v22 }
 0x2b1   :  { %5304 = vst [vmem:[#allocation42_spill] sm:$0xff] %v4398_v10  ;;  %v3354_v23 = vpop.f32.mrf.mxu1  ;;  %v1033_v11 = vadd.f32 %v4257_v38, %v4409_v31 }
 0x2b2   :  { %5303 = vst [vmem:[#allocation41_spill] sm:$0xff] %v4396_v28  ;;  %v4403_v32 = vadd.f32 %v3354_v23, %v4341_v16  ;;  %v4407_v51 = vpop.f32.mrf.mxu0 }
 0x2b3   :  { %5307 = vst [vmem:[#allocation45_spill] sm:$0xff] %v4407_v51  ;;  %v1338_v35 = vpop.f32.mrf.mxu1 }
 0x2b4   :  { %5306 = vst [vmem:[#allocation44_spill] sm:$0xff] %v4403_v32  ;;  %v4412_v25 = vadd.f32 %v1338_v35, %v4341_v16  ;;  %v4416_v28 = vpop.f32.mrf.mxu0 }
 0x2b5   :  { %5310 = vst [vmem:[#allocation48_spill] sm:$0xff] %v4416_v28  ;;  %v1578_v10 = vpop.f32.mrf.mxu1  ;;  %v1035_v28 = vadd.f32 %v4261_v40, %v4400_v20  ;;  %v1037_v40 = vadd.f32 %v4265_v42, %v4409_v31  ;;  %v4463_v42 = vadd.f32 %v4271_v44, %v4341_v16  ;;  %v4478_v44 = vadd.f32 %v4279_v48, %v4341_v16 }
 0x2b6   :  { %5309 = vst [vmem:[#allocation47_spill] sm:$0xff] %v4412_v25  ;;  %v1579_v23 = vadd.f32 %v1578_v10, %v4405_v34  ;;  %v4421_v29 = vpop.f32.mrf.mxu0  ;;  %v4433_v10 = vadd.f32 %v4255_v37, %v4341_v16  ;;  %v4493_v48 = vadd.f32 %v4287_v53, %v4341_v16  ;;  %v4507_v53 = vadd.f32 %v4295_v57, %v4341_v16 }
 0x2b7   :  { %5311 = vst [vmem:[#allocation49_spill] sm:$0xff] %v4421_v29  ;;  %v1580_v32 = vpop.f32.mrf.mxu1  ;;  %5314 = vst [vmem:[#allocation51_spill] sm:$0xff] %v4478_v44  ;;  %v1061_v57 = vadd.f32 %v4301_v60, %v4400_v20 }
 0x2b8   :  { %v1898_v51 = vadd.f32 %v1579_v23, %v1031_v0  ;;  %v1581_v35 = vadd.f32 %v1580_v32, %v4414_v26  ;;  %v4426_v25 = vpop.f32.mrf.mxu0  ;;  %5312 = vst [vmem:[#allocation50_spill] sm:$0xff] %v4433_v10  ;;  %v4439_v0 = vadd.f32 %v4259_v39, %v4341_v16  ;;  %v1041_v39 = vadd.f32 %v4269_v43, %v4400_v20 }
 0x2b9   :  { %v1582_v22 = vpop.f32.mrf.mxu1  ;;  %v4471_v43 = vadd.f32 %v4275_v46, %v4341_v16  ;;  %v4486_v46 = vadd.f32 %v4283_v50, %v4341_v16  ;;  %5316 = vst [vmem:[#allocation53_spill] sm:$0xff] %v4493_v48  ;;  %v4501_v50 = vadd.f32 %v4291_v55, %v4341_v16  ;;  %5318 = vst [vmem:[#allocation55_spill] sm:$0xff] %v4507_v53 }
 0x2ba   :  { %v2916_v33 = vmul.f32 -1.442695, %v1898_v51  ;;  %v2122_v30 = vadd.f32 %v1581_v35, %v1033_v11  ;;  %v1583_v36 = vadd.f32 %v1582_v22, %v4405_v34  ;;  %v4435_v29 = vpop.f32.mrf.mxu0  ;;  %v4443_v51 = vadd.f32 %v4263_v41, %v4341_v16 }
 0x2bb   :  { %v1584_v38 = vpop.f32.mrf.mxu1  ;;  %v5313_v22 = vsub.s32 2, %v4317_v5  ;;  %v1043_v5 = vadd.f32 %v4273_v45, %v4409_v31  ;;  %v1047_v45 = vadd.f32 %v4281_v49, %v4409_v31  ;;  %5315 = vst [vmem:[#allocation52_spill] sm:$0xff] %v4486_v46  ;;  %v1053_v49 = vadd.f32 %v4289_v54, %v4409_v31  ;;  %5317 = vst [vmem:[#allocation54_spill] sm:$0xff] %v4501_v50 }
 0x2bc   :  { %3562 = vpow2.f32 %v2916_v33  ;;  %v2948_v32 = vmul.f32 -1.442695, %v2122_v30  ;;  %v1899_v23 = vadd.f32 %v1583_v36, %v1035_v28  ;;  %v1585_v37 = vadd.f32 %v1584_v38, %v4414_v26  ;;  %v4448_v11 = vpop.f32.mrf.mxu0  ;;  %v5336_v53 = vld [vmem:[#allocation48_spill] sm:$0xff] }
 0x2bd   :  { %v1588_v35 = vpop.f32.mrf.mxu1  ;;  %v4452_v10 = vrot.slane %v2891_v18, %v5313_v22  ;;  %v4459_v33 = vadd.f32 %v4267_v19, %v4341_v16  ;;  %v1057_v54 = vadd.f32 %v4297_v58, %v4409_v31  ;;  %v4516_v55 = vadd.f32 %v4299_v59, %v4341_v16 }
 0x2be   :  { %3564 = vpow2.f32 %v2948_v32  ;;  %v2917_v30 = vmul.f32 -1.442695, %v1899_v23  ;;  %v1589_v41 = vadd.f32 %v1588_v35, %v4405_v34  ;;  %v2123_v18 = vadd.f32 %v1585_v37, %v1037_v40  ;;  %v4467_v28 = vpop.f32.mrf.mxu0 }
 0x2bf   :  { %v1590_v36 = vpop.f32.mrf.mxu1  ;;  %v1045_v32 = vadd.f32 %v4277_v47, %v4400_v20  ;;  %v1051_v47 = vadd.f32 %v4285_v52, %v4400_v20  ;;  %v1055_v52 = vadd.f32 %v4293_v56, %v4400_v20  ;;  %5319 = vst [vmem:[#allocation56_spill] sm:$0xff] %v4516_v55  ;;  %v1063_v58 = vadd.f32 %v4305_v62, %v4409_v31 }
 0x2c0   :  { %3566 = vpow2.f32 %v2917_v30  ;;  %v1900_v38 = vadd.f32 %v1589_v41, %v1041_v39  ;;  %v1591_v19 = vadd.f32 %v1590_v36, %v4414_v26  ;;  %v2949_v23 = vmul.f32 -1.442695, %v2123_v18  ;;  %v4482_v40 = vpop.f32.mrf.mxu0 }
 0x2c1   :  { %v1592_v37 = vpop.f32.mrf.mxu1  ;;  %v4531_v59 = vadd.f32 %v4307_v63, %v4341_v16  ;;  %v4540_v62 = vadd.f32 %v4311_v2, %v4341_v16 }
 0x2c2   :  { %v2918_v35 = vmul.f32 -1.442695, %v1900_v38  ;;  %v2124_v22 = vadd.f32 %v1591_v19, %v1043_v5  ;;  %v1593_v39 = vadd.f32 %v1592_v37, %v4405_v34  ;;  %3568 = vpow2.f32 %v2949_v23  ;;  %v4497_v30 = vpop.f32.mrf.mxu0 }
 0x2c3   :  { %v1594_v41 = vpop.f32.mrf.mxu1  ;;  %v4523_v23 = vadd.f32 %v4303_v61, %v4341_v16  ;;  %5321 = vst [vmem:[#allocation58_spill] sm:$0xff] %v4531_v59  ;;  %v4536_v61 = vadd.f32 %v4309_v1, %v4400_v20  ;;  %5322 = vst [vmem:[#allocation59_spill] sm:$0xff] %v4540_v62  ;;  %v4554_v1 = vadd.f32 %v4319_v6, %v4400_v20  ;;  %v5332_v62 = vld [vmem:[#allocation38_spill] sm:$0xff] }
 0x2c4   :  { %3570 = vpow2.f32 %v2918_v35  ;;  %v2950_v5 = vmul.f32 -1.442695, %v2124_v22  ;;  %v1901_v18 = vadd.f32 %v1593_v39, %v1045_v32  ;;  %v1595_v36 = vadd.f32 %v1594_v41, %v4414_v26  ;;  %v4512_v38 = vpop.f32.mrf.mxu0 }
 0x2c5   :  { %v1598_v19 = vpop.f32.mrf.mxu1  ;;  %5320 = vst [vmem:[#allocation57_spill] sm:$0xff] %v4523_v23  ;;  %v4569_v6 = vadd.f32 %v4325_v9, %v4341_v16  ;;  %v4584_v9 = vadd.f32 %v4335_v14, %v4409_v31  ;;  %v5334_v23 = vld [vmem:[#allocation42_spill] sm:$0xff] }
 0x2c6   :  { %3572 = vpow2.f32 %v2950_v5  ;;  %v2919_v32 = vmul.f32 -1.442695, %v1901_v18  ;;  %v1599_v56 = vadd.f32 %v1598_v19, %v4405_v34  ;;  %v2125_v37 = vadd.f32 %v1595_v36, %v1047_v45  ;;  %v4527_v35 = vpop.f32.mrf.mxu0 }
 0x2c7   :  { %v1600_v22 = vpop.f32.mrf.mxu1  ;;  %v4544_v45 = vadd.f32 %v4313_v3, %v4409_v31  ;;  %v4562_v3 = vadd.f32 %v4323_v8, %v4409_v31  ;;  %5325 = vst [vmem:[#allocation62_spill] sm:$0xff] %v4569_v6  ;;  %v4577_v8 = vadd.f32 %v4333_v13, %v4341_v16  ;;  %v4595_v6 = vadd.f32 %v4343_v17, %v4400_v20 }
 0x2c8   :  { %3574 = vpow2.f32 %v2919_v32  ;;  %v1902_v39 = vadd.f32 %v1599_v56, %v1051_v47  ;;  %v1601_v41 = vadd.f32 %v1600_v22, %v4414_v26  ;;  %v2951_v5 = vmul.f32 -1.442695, %v2125_v37  ;;  %v4546_v63 = vpop.f32.mrf.mxu0 }
 0x2c9   :  { %v3563_v60 = vpop.eup %3562  ;;  %v1602_v18 = vpop.f32.mrf.mxu1  ;;  %v4550_v47 = vadd.f32 %v4315_v4, %v4341_v16  ;;  %v4558_v32 = vadd.f32 %v4321_v7, %v4341_v16  ;;  %5326 = vst [vmem:[#allocation63_spill] sm:$0xff] %v4577_v8 }
 0x2ca   :  { %v2920_v36 = vmul.f32 -1.442695, %v1902_v39  ;;  %v2126_v19 = vadd.f32 %v1601_v41, %v1053_v49  ;;  %3576 = vpow2.f32 %v2951_v5  ;;  %v1603_v56 = vadd.f32 %v1602_v18, %v4405_v34  ;;  %v4565_v4 = vpop.f32.mrf.mxu0 }
 0x2cb   :  { %5323 = vst [vmem:[#allocation60_spill] sm:$0xff] %v4550_v47  ;;  %v3565_v2 = vpop.eup %3564  ;;  %5324 = vst [vmem:[#allocation61_spill] sm:$0xff] %v4558_v32  ;;  %v1604_v37 = vpop.f32.mrf.mxu1  ;;  %v4573_v49 = vadd.f32 %v4331_v12, %v4400_v20  ;;  %v2026_v7 = vadd.f32 1.0, %v3563_v60  ;;  %v4588_v12 = vadd.f32 %v4337_v15, %v4341_v16  ;;  %v5331_v47 = vld [vmem:[#allocation36_spill] sm:$0xff] }
 0x2cc   :  { %v2952_v22 = vmul.f32 -1.442695, %v2126_v19  ;;  %3578 = vpow2.f32 %v2920_v36  ;;  %v1903_v41 = vadd.f32 %v1603_v56, %v1055_v52  ;;  %v1605_v5 = vadd.f32 %v1604_v37, %v4414_v26  ;;  %v4580_v18 = vpop.f32.mrf.mxu0 }
 0x2cd   :  { %v3567_v39 = vpop.eup %3566  ;;  %v1608_v32 = vpop.f32.mrf.mxu1  ;;  %5327 = vst [vmem:[#allocation64_spill] sm:$0xff] %v4588_v12  ;;  %v2250_v60 = vadd.f32 1.0, %v3565_v2  ;;  %v4600_v2 = vadd.f32 %v4348_v21, %v4409_v31  ;;  %v5330_v12 = vld [vmem:[#allocation34_spill] sm:$0xff] }
 0x2ce   :  { %v1609_v19 = vadd.f32 %v1608_v32, %v4405_v34  ;;  %v2027_v13 = vadd.f32 1.0, %v3567_v39  ;;  %3580 = vpow2.f32 %v2952_v22  ;;  %v2921_v36 = vmul.f32 -1.442695, %v1903_v41  ;;  %v4591_v56 = vpop.f32.mrf.mxu0 }
 0x2cf   :  { %v2127_v52 = vadd.f32 %v1605_v5, %v1057_v54  ;;  %v1610_v37 = vpop.f32.mrf.mxu1  ;;  %v3569_v8 = vpop.eup %3568  ;;  %3582 = vrcp.f32 %v2026_v7  ;;  %v4606_v41 = vadd.f32 %v4353_v24, %v4400_v20  ;;  %v4610_v5 = vadd.f32 %v4358_v27, %v4409_v31  ;;  %v5329_v24 = vld [vmem:[#allocation32_spill] sm:$0xff] }
 0x2d0   :  { %v1904_v14 = vadd.f32 %v1609_v19, %v1061_v57  ;;  %v1611_v15 = vadd.f32 %v1610_v37, %v4414_v26  ;;  %v2251_v32 = vadd.f32 1.0, %v3569_v8  ;;  %3584 = vpow2.f32 %v2921_v36  ;;  %v4602_v22 = vpop.f32.mrf.mxu0 }
 0x2d1   :  { %v3571_v16 = vpop.eup %3570  ;;  %v2953_v54 = vmul.f32 -1.442695, %v2127_v52  ;;  %v1612_v39 = vpop.f32.mrf.mxu1  ;;  %3586 = vrcp.f32 %v2250_v60  ;;  %v5328_v52 = vld [vmem:[#allocation30_spill] sm:$0xff]  ;;  %v4621_v60 = vadd.f32 %v5329_v24, %v4409_v31  ;;  %v4633_v24 = vadd.f32 %v5331_v47, %v4409_v31 }
 0x2d2   :  { %v2028_v17 = vadd.f32 1.0, %v3571_v16  ;;  %v2128_v57 = vadd.f32 %v1611_v15, %v1063_v58  ;;  %3588 = vrcp.f32 %v2027_v13  ;;  %v2922_v21 = vmul.f32 -1.442695, %v1904_v14  ;;  %v4613_v19 = vpop.f32.mrf.mxu0 }
 0x2d3   :  { %v3573_v7 = vpop.eup %3572  ;;  %v1613_v8 = vadd.f32 %v1612_v39, %v4405_v34  ;;  %v1614_v36 = vpop.f32.mrf.mxu1  ;;  %v4617_v37 = vadd.f32 %v5328_v52, %v4400_v20  ;;  %3590 = vrcp.f32 %v2251_v32  ;;  %v4629_v52 = vadd.f32 %v5330_v12, %v4400_v20 }
 0x2d4   :  { %v2252_v58 = vadd.f32 1.0, %v3573_v7  ;;  %3592 = vpow2.f32 %v2953_v54  ;;  %v2954_v27 = vmul.f32 -1.442695, %v2128_v57  ;;  %v1615_v14 = vadd.f32 %v1614_v36, %v4414_v26  ;;  %v4625_v16 = vpop.f32.mrf.mxu0 }
 0x2d5   :  { %v3575_v15 = vpop.eup %3574  ;;  %v1905_v13 = vadd.f32 %v1613_v8, %v4536_v61  ;;  %v1618_v39 = vpop.f32.mrf.mxu1  ;;  %3594 = vrcp.f32 %v2028_v17  ;;  %v4641_v12 = vadd.f32 %v5332_v62, %v4400_v20  ;;  %v4653_v62 = vadd.f32 %v5334_v23, %v4400_v20 }
 0x2d6   :  { %v1619_v32 = vadd.f32 %v1618_v39, %v4405_v34  ;;  %v2029_v54 = vadd.f32 1.0, %v3575_v15  ;;  %3596 = vpow2.f32 %v2922_v21  ;;  %v2129_v61 = vadd.f32 %v1615_v14, %v4544_v45  ;;  %v4637_v7 = vpop.f32.mrf.mxu0  ;;  %v5333_v39 = vld [vmem:[#allocation40_spill] sm:$0xff] }
 0x2d7   :  { %v2923_v57 = vmul.f32 -1.442695, %v1905_v13  ;;  %v1620_v8 = vpop.f32.mrf.mxu1  ;;  %v3577_v36 = vpop.eup %3576  ;;  %3598 = vrcp.f32 %v2252_v58  ;;  %v4647_v15 = vadd.f32 %v5333_v39, %v4409_v31  ;;  %v4665_v23 = vadd.f32 %v5336_v53, %v4400_v20 }
 0x2d8   :  { %v1906_v47 = vadd.f32 %v1619_v32, %v4554_v1  ;;  %v1621_v17 = vadd.f32 %v1620_v8, %v4414_v26  ;;  %v2253_v21 = vadd.f32 1.0, %v3577_v36  ;;  %3600 = vpow2.f32 %v2954_v27  ;;  %v4649_v13 = vpop.f32.mrf.mxu0  ;;  %v5335_v32 = vld [vmem:[#allocation45_spill] sm:$0xff] }
 0x2d9   :  { %v2955_v45 = vmul.f32 -1.442695, %v2129_v61  ;;  %v1622_v14 = vpop.f32.mrf.mxu1  ;;  %v3579_v59 = vpop.eup %3578  ;;  %3602 = vpow2.f32 %v2923_v57  ;;  %v4658_v8 = vadd.f32 %v5335_v32, %v4409_v31  ;;  %v5337_v57 = vld [vmem:[#allocation49_spill] sm:$0xff]  ;;  %v4679_v53 = vadd.f32 %v4426_v25, %v4400_v20 }
 0x2da   :  { %v2924_v58 = vmul.f32 -1.442695, %v1906_v47  ;;  %v2130_v1 = vadd.f32 %v1621_v17, %v4562_v3  ;;  %3604 = vrcp.f32 %v2029_v54  ;;  %v2030_v36 = vadd.f32 1.0, %v3579_v59  ;;  %v4661_v61 = vpop.f32.mrf.mxu0 }
 0x2db   :  { %v1623_v27 = vadd.f32 %v1622_v14, %v4405_v34  ;;  %v1624_v39 = vpop.f32.mrf.mxu1  ;;  %v3581_v55 = vpop.eup %3580  ;;  %v4669_v47 = vadd.f32 %v5337_v57, %v4409_v31  ;;  %3606 = vpow2.f32 %v2955_v45  ;;  %v4683_v45 = vadd.f32 %v4435_v29, %v4409_v31 }
 0x2dc   :  { %v2956_v3 = vmul.f32 -1.442695, %v2130_v1  ;;  %v4671_v17 = vpop.eup %3582  ;;  %3608 = vrcp.f32 %v2253_v21  ;;  %v2254_v59 = vadd.f32 1.0, %v3581_v55  ;;  %v1625_v14 = vadd.f32 %v1624_v39, %v4414_v26  ;;  %v4675_v32 = vpop.f32.mrf.mxu0 }
 0x2dd   :  { %v1907_v54 = vadd.f32 %v1623_v27, %v4573_v49  ;;  %v1628_v50 = vpop.f32.mrf.mxu1  ;;  %v3585_v48 = vpop.eup %3584  ;;  %3610 = vpow2.f32 %v2924_v58  ;;  %v4690_v49 = vadd.f32 %v4448_v11, %v4400_v20  ;;  %v4699_v29 = vadd.f32 %v4467_v28, %v4409_v31 }
 0x2de   :  { %v1629_v21 = vadd.f32 %v1628_v50, %v4405_v34  ;;  %v4686_v55 = vpop.eup %3586  ;;  %3612 = vrcp.f32 %v2030_v36  ;;  %v2131_v27 = vadd.f32 %v1625_v14, %v4584_v9  ;;  %v4693_v39 = vpop.f32.mrf.mxu0  ;;  %v4707_v36 = vadd.f32 %v4482_v40, %v4400_v20 }
 0x2df   :  { %v2925_v1 = vmul.f32 -1.442695, %v1907_v54  ;;  %v1630_v25 = vpop.f32.mrf.mxu1  ;;  %v4695_v57 = vpop.eup %3588  ;;  %3614 = vpow2.f32 %v2956_v3  ;;  %v2031_v9 = vadd.f32 1.0, %v3585_v48  ;;  %v4713_v28 = vadd.f32 %v4497_v30, %v4409_v31 }
 0x2e0   :  { %v1908_v50 = vadd.f32 %v1629_v21, %v4595_v6  ;;  %v1631_v58 = vadd.f32 %v1630_v25, %v4414_v26  ;;  %v4703_v11 = vpop.eup %3590  ;;  %5338 = vst [vmem:[#allocation30_spill] sm:$0xff] %v4707_v36  ;;  %3616 = vrcp.f32 %v2254_v59  ;;  %v2957_v54 = vmul.f32 -1.442695, %v2131_v27  ;;  %v4709_v14 = vpop.f32.mrf.mxu0 }
 0x2e1   :  { %v1632_v46 = vpop.f32.mrf.mxu1  ;;  %v3593_v44 = vpop.eup %3592  ;;  %3618 = vpow2.f32 %v2925_v1  ;;  %v4720_v40 = vadd.f32 %v4512_v38, %v4400_v20  ;;  %v4727_v30 = vadd.f32 %v4527_v35, %v4409_v31  ;;  %v4741_v35 = vadd.f32 %v4565_v4, %v4409_v31 }
 0x2e2   :  { %v2926_v6 = vmul.f32 -1.442695, %v1908_v50  ;;  %v2132_v3 = vadd.f32 %v1631_v58, %v4600_v2  ;;  %v4716_v21 = vpop.eup %3594  ;;  %v2255_v48 = vadd.f32 1.0, %v3593_v44  ;;  %3620 = vpow2.f32 %v2957_v54  ;;  %v4723_v27 = vpop.f32.mrf.mxu0 }
 0x2e3   :  { %5339 = vst [vmem:[#allocation32_spill] sm:$0xff] %v4720_v40  ;;  %v1633_v59 = vadd.f32 %v1632_v46, %v4405_v34  ;;  %v1634_v25 = vpop.f32.mrf.mxu1  ;;  %v3597_v36 = vpop.eup %3596  ;;  %v4731_v2 = vadd.f32 %v4546_v63, %v4400_v20  ;;  %5341 = vst [vmem:[#allocation36_spill] sm:$0xff] %v4741_v35  ;;  %v4745_v63 = vadd.f32 %v4580_v18, %v4400_v20 }
 0x2e4   :  { %3622 = vpow2.f32 %v2926_v6  ;;  %v2958_v1 = vmul.f32 -1.442695, %v2132_v3  ;;  %v4733_v38 = vpop.eup %3598  ;;  %v2032_v44 = vadd.f32 1.0, %v3597_v36  ;;  %v1635_v50 = vadd.f32 %v1634_v25, %v4414_v26  ;;  %v4737_v58 = vpop.f32.mrf.mxu0 }
 0x2e5   :  { %5340 = vst [vmem:[#allocation34_spill] sm:$0xff] %v4731_v2  ;;  %3624 = vrcp.f32 %v2031_v9  ;;  %v1909_v46 = vadd.f32 %v1633_v59, %v4606_v41  ;;  %v1638_v54 = vpop.f32.mrf.mxu1  ;;  %v3601_v40 = vpop.eup %3600 }
 0x2e6   :  { %3626 = vpow2.f32 %v2958_v1  ;;  %v1639_v9 = vadd.f32 %v1638_v54, %v4405_v34  ;;  %v3603_v36 = vpop.eup %3602  ;;  %v2256_v41 = vadd.f32 1.0, %v3601_v40  ;;  %v2133_v3 = vadd.f32 %v1635_v50, %v4610_v5  ;;  %v4749_v59 = vpop.f32.mrf.mxu0 }
 0x2e7   :  { %3628 = vrcp.f32 %v2255_v48  ;;  %v2927_v6 = vmul.f32 -1.442695, %v1909_v46  ;;  %v1640_v25 = vpop.f32.mrf.mxu1  ;;  %v4751_v2 = vpop.eup %3604  ;;  %v2033_v4 = vadd.f32 1.0, %v3603_v36  ;;  %v4757_v54 = vadd.f32 %v4591_v56, %v4409_v31 }
 0x2e8   :  { %3630 = vrcp.f32 %v2032_v44  ;;  %v1910_v35 = vadd.f32 %v1639_v9, %v4617_v37  ;;  %v1641_v18 = vadd.f32 %v1640_v25, %v4414_v26  ;;  %v3607_v1 = vpop.eup %3606  ;;  %v4761_v5 = vadd.f32 %v4602_v22, %v4400_v20  ;;  %v4763_v48 = vpop.f32.mrf.mxu0 }
 0x2e9   :  { %3632 = vrcp.f32 %v2256_v41  ;;  %v2959_v40 = vmul.f32 -1.442695, %v2133_v3  ;;  %v1642_v46 = vpop.f32.mrf.mxu1  ;;  %v4765_v44 = vpop.eup %3608  ;;  %v4769_v37 = vadd.f32 %v4613_v19, %v4409_v31  ;;  %v2257_v50 = vadd.f32 1.0, %v3607_v1 }
 0x2ea   :  { %3634 = vrcp.f32 %v2033_v4  ;;  %v2134_v56 = vadd.f32 %v1641_v18, %v4621_v60  ;;  %v3611_v9 = vpop.eup %3610  ;;  %v4774_v36 = vadd.f32 %v4625_v16, %v4400_v20  ;;  %v2928_v22 = vmul.f32 -1.442695, %v1910_v35  ;;  %v4777_v3 = vpop.f32.mrf.mxu0 }
 0x2eb   :  { %5342 = vst [vmem:[#allocation38_spill] sm:$0xff] %v4769_v37  ;;  %3636 = vpow2.f32 %v2927_v6  ;;  %v1643_v41 = vadd.f32 %v1642_v46, %v4405_v34  ;;  %5344 = vst [vmem:[#allocation42_spill] sm:$0xff] %v4777_v3  ;;  %v1644_v25 = vpop.f32.mrf.mxu1  ;;  %v4779_v4 = vpop.eup %3612  ;;  %v2034_v19 = vadd.f32 1.0, %v3611_v9  ;;  %v4783_v1 = vadd.f32 %v4637_v7, %v4409_v31  ;;  %v5348_v9 = vld [vmem:[#allocation25_spill] sm:$0xff] }
 0x2ec   :  { %5343 = vst [vmem:[#allocation40_spill] sm:$0xff] %v4774_v36  ;;  %3638 = vrcp.f32 %v2257_v50  ;;  %v4787_v60 = vadd.f32 %v4649_v13, %v4400_v20  ;;  %v3615_v16 = vpop.eup %3614  ;;  %v2960_v35 = vmul.f32 -1.442695, %v2134_v56  ;;  %v1645_v18 = vadd.f32 %v1644_v25, %v4414_v26  ;;  %v4791_v46 = vpop.f32.mrf.mxu0 }
 0x2ed   :  { %5345 = vst [vmem:[#allocation45_spill] sm:$0xff] %v4783_v1  ;;  %3640 = vpow2.f32 %v2959_v40  ;;  %v1911_v6 = vadd.f32 %v1643_v41, %v4629_v52  ;;  %5347 = vst [vmem:[#allocation49_spill] sm:$0xff] %v4791_v46  ;;  %v1648_v3 = vpop.f32.mrf.mxu1  ;;  %v4793_v50 = vpop.eup %3616  ;;  %v4797_v7 = vmul.f32 %v4686_v55, %v5348_v9  ;;  %v2258_v1 = vadd.f32 1.0, %v3615_v16 }
 0x2ee   :  { %5346 = vst [vmem:[#allocation48_spill] sm:$0xff] %v4787_v60  ;;  %3642 = vrcp.f32 %v2034_v19  ;;  %v1649_v13 = vadd.f32 %v1648_v3, %v4405_v34  ;;  %v3619_v60 = vpop.eup %3618  ;;  %v4802_v40 = vadd.f32 %v4661_v61, %v4409_v31  ;;  %v4806_v52 = vadd.f32 %v4675_v32, %v4400_v20  ;;  %v4809_v41 = vpop.f32.mrf.mxu0 }
 0x2ef   :  { %3644 = vpow2.f32 %v2928_v22  ;;  %v2135_v56 = vadd.f32 %v1645_v18, %v4633_v24  ;;  %5351 = vst [vmem:[#allocation66_spill] sm:$0xff] %v4809_v41  ;;  %v1650_v25 = vpop.f32.mrf.mxu1  ;;  %v3621_v9 = vpop.eup %3620  ;;  %v2035_v19 = vadd.f32 1.0, %v3619_v60  ;;  %v3882_v18 = vld [vmem:[#allocation13 + $0x8] sm:$0xff]  ;;  %v4858_v36 = vadd.f32 %v4723_v27, %v4409_v31 }
 0x2f0   :  { %5349 = vst [vmem:[#allocation25_spill] sm:$0xff] %v4802_v40  ;;  %5350 = vst [vmem:[#allocation65_spill] sm:$0xff] %v4806_v52  ;;  %3646 = vrcp.f32 %v2258_v1  ;;  %v1912_v3 = vadd.f32 %v1649_v13, %v4641_v12  ;;  %v2259_v61 = vadd.f32 1.0, %v3621_v9  ;;  %v2929_v40 = vmul.f32 -1.442695, %v1911_v6  ;;  %v4814_v52 = vpop.f32.mrf.mxu0 }
 0x2f1   :  { %v3623_v46 = vpop.eup %3622  ;;  %3648 = vpow2.f32 %v2960_v35  ;;  %v1651_v32 = vadd.f32 %v1650_v25, %v4414_v26  ;;  %5352 = vst [vmem:[#allocation67_spill] sm:$0xff] %v4814_v52  ;;  %v1652_v22 = vpop.f32.mrf.mxu1  ;;  %v4819_v41 = vmul.f32 %v3882_v18, %v4703_v11  ;;  %v4823_v12 = vadd.f32 %v4693_v39, %v4409_v31 }
 0x2f2   :  { %v4816_v24 = vpop.eup %3624  ;;  %3650 = vrcp.f32 %v2035_v19  ;;  %v2036_v1 = vadd.f32 1.0, %v3623_v46  ;;  %v2961_v35 = vmul.f32 -1.442695, %v2135_v56  ;;  %v1653_v13 = vadd.f32 %v1652_v22, %v4405_v34  ;;  %v4827_v25 = vpop.f32.mrf.mxu0 }
 0x2f3   :  { %5353 = vst [vmem:[#allocation68_spill] sm:$0xff] %v4823_v12  ;;  %v3627_v60 = vpop.eup %3626  ;;  %3652 = vrcp.f32 %v2259_v61  ;;  %v2136_v6 = vadd.f32 %v1651_v32, %v4647_v15  ;;  %5354 = vst [vmem:[#allocation69_spill] sm:$0xff] %v4827_v25  ;;  %v1654_v9 = vpop.f32.mrf.mxu1  ;;  %v2930_v19 = vmul.f32 -1.442695, %v1912_v3  ;;  %v4867_v37 = vadd.f32 %v4737_v58, %v4400_v20 }
 0x2f4   :  { %v4829_v16 = vpop.eup %3628  ;;  %3654 = vrcp.f32 %v2036_v1  ;;  %v2260_v18 = vadd.f32 1.0, %v3627_v60  ;;  %v1655_v46 = vadd.f32 %v1654_v9, %v4414_v26  ;;  %v1913_v56 = vadd.f32 %v1653_v13, %v4653_v62  ;;  %v3373_v15 = vpop.f32.mrf.mxu0  ;;  %v3883_v9 = vld [vmem:[#allocation13 + $0x10] sm:$0xff] }
 0x2f5   :  { %v4832_v52 = vpop.eup %3630  ;;  %3656 = vpow2.f32 %v2929_v40  ;;  %v2962_v39 = vmul.f32 -1.442695, %v2136_v6  ;;  %v1658_v61 = vpop.f32.mrf.mxu1  ;;  %v1780_v3 = vadd.f32 %v3373_v15, %v4452_v10  ;;  %v4844_v40 = vmul.f32 %v3883_v9, %v4733_v38 }
 0x2f6   :  { %v4836_v22 = vpop.eup %3632  ;;  %3658 = vrcp.f32 %v2260_v18  ;;  %v2137_v25 = vadd.f32 %v1655_v46, %v4658_v8  ;;  %v1659_v1 = vadd.f32 %v1658_v61, %v4405_v34  ;;  %v4848_v62 = vadd.f32 %v4709_v14, %v4400_v20  ;;  %v1771_v18 = vpop.f32.mrf.mxu0 }
 0x2f7   :  { %v4841_v60 = vpop.eup %3634  ;;  %3660 = vpow2.f32 %v2961_v35  ;;  %v2931_v6 = vmul.f32 -1.442695, %v1913_v56  ;;  %v1660_v13 = vpop.f32.mrf.mxu1  ;;  %v2348_v61 = vmul.f32 %v4716_v21, %v1780_v3  ;;  %v1772_v14 = vadd.f32 %v1771_v18, %v4452_v10 }
 0x2f8   :  { %5355 = vst [vmem:[#allocation70_spill] sm:$0xff] %v4848_v62  ;;  %v3637_v32 = vpop.eup %3636  ;;  %3662 = vpow2.f32 %v2930_v19  ;;  %v2963_v8 = vmul.f32 -1.442695, %v2137_v25  ;;  %v1914_v46 = vadd.f32 %v1659_v1, %v4665_v23  ;;  %v1661_v9 = vadd.f32 %v1660_v13, %v4414_v26  ;;  %v3374_v35 = vpop.f32.mrf.mxu0  ;;  %v5356_v23 = vld [vmem:[#allocation50_spill] sm:$0xff] }
 0x2f9   :  { %v4852_v15 = vpop.eup %3638  ;;  %v2037_v12 = vadd.f32 1.0, %v3637_v32  ;;  %3664 = vpow2.f32 %v2962_v39  ;;  %v1662_v62 = vpop.f32.mrf.mxu1  ;;  %v2380_v19 = vadd.f32 %v2348_v61, %v5356_v23  ;;  %v2346_v1 = vmul.f32 %v4671_v17, %v1772_v14 }
 0x2fa   :  { %v3641_v56 = vpop.eup %3640  ;;  %3666 = vpow2.f32 %v2931_v6  ;;  %v2932_v25 = vmul.f32 -1.442695, %v1914_v46  ;;  %v2138_v39 = vadd.f32 %v1661_v9, %v4669_v47  ;;  %v1774_v13 = vpop.f32.mrf.mxu0  ;;  %v1663_v27 = vadd.f32 %v1662_v62, %v4405_v34 }
 0x2fb   :  { %v4861_v21 = vpop.eup %3642  ;;  %3668 = vrcp.f32 %v2037_v12  ;;  %v2261_v32 = vadd.f32 1.0, %v3641_v56  ;;  %v1664_v3 = vpop.f32.mrf.mxu1  ;;  %v1783_v6 = vadd.f32 %v3374_v35, %v4452_v10  ;;  %v2378_v47 = vadd.f32 %v2346_v1, %v4439_v0 }
 0x2fc   :  { %v3645_v18 = vpop.eup %3644  ;;  %3670 = vpow2.f32 %v2963_v8  ;;  %v1665_v17 = vadd.f32 %v1664_v3, %v4414_v26  ;;  %v3377_v9 = vpop.f32.mrf.mxu0  ;;  %v2964_v56 = vmul.f32 -1.442695, %v2138_v39  ;;  %v1915_v58 = vadd.f32 %v1663_v27, %v4679_v53 }
 0x2fd   :  { %v4871_v46 = vpop.eup %3646  ;;  %3672 = vrcp.f32 %v2261_v32  ;;  %v2038_v12 = vadd.f32 1.0, %v3645_v18  ;;  %v1668_v61 = vpop.f32.mrf.mxu1  ;;  %v2349_v8 = vmul.f32 %v4751_v2, %v1783_v6  ;;  %v1775_v32 = vadd.f32 %v1774_v13, %v4452_v10  ;;  %v3884_v18 = vld [vmem:[#allocation13 + $0x18] sm:$0xff] }
 0x2fe   :  { %v3649_v14 = vpop.eup %3648  ;;  %3674 = vpow2.f32 %v2932_v25  ;;  %v1787_v1 = vpop.f32.mrf.mxu0  ;;  %v4885_v25 = vadd.f32 %v4749_v59, %v4409_v31  ;;  %v2933_v53 = vmul.f32 -1.442695, %v1915_v58  ;;  %v4891_v27 = vmul.f32 %v3884_v18, %v4765_v44 }
 0x2ff   :  { %v4877_v62 = vpop.eup %3650  ;;  %3676 = vrcp.f32 %v2038_v12  ;;  %v2262_v35 = vadd.f32 1.0, %v3649_v14  ;;  %v1670_v0 = vpop.f32.mrf.mxu1  ;;  %v2381_v2 = vadd.f32 %v2349_v8, %v4443_v51  ;;  %v2139_v13 = vadd.f32 %v1665_v17, %v4683_v45 }
 0x300   :  { %v4881_v3 = vpop.eup %3652  ;;  %3678 = vtanh.f32 %v2380_v19  ;;  %v2347_v6 = vmul.f32 %v4695_v57, %v1775_v32  ;;  %v3378_v14 = vpop.f32.mrf.mxu0  ;;  %v1669_v59 = vadd.f32 %v1668_v61, %v4405_v34  ;;  %v1796_v19 = vadd.f32 %v3377_v9, %v4452_v10 }
 0x301   :  { %v4888_v39 = vpop.eup %3654  ;;  %3680 = vrcp.f32 %v2262_v35  ;;  %v1672_v12 = vpop.f32.mrf.mxu1  ;;  %v1671_v51 = vadd.f32 %v1670_v0, %v4414_v26  ;;  %v1788_v45 = vadd.f32 %v1787_v1, %v4452_v10  ;;  %v4904_v32 = vadd.f32 %v4763_v48, %v4400_v20 }
 0x302   :  { %v3657_v23 = vpop.eup %3656  ;;  %3682 = vpow2.f32 %v2964_v56  ;;  %v2379_v35 = vadd.f32 %v2347_v6, %v4459_v33  ;;  %v2352_v9 = vmul.f32 %v4832_v52, %v1796_v19  ;;  %v1790_v33 = vpop.f32.mrf.mxu0  ;;  %v1916_v31 = vadd.f32 %v1669_v59, %v4690_v49  ;;  %v3885_v59 = vld [vmem:[#allocation13 + $0x20] sm:$0xff] }
 0x303   :  { %v4898_v58 = vpop.eup %3658  ;;  %v2039_v8 = vadd.f32 1.0, %v3657_v23  ;;  %3684 = vtanh.f32 %v2378_v47  ;;  %v1674_v17 = vpop.f32.mrf.mxu1  ;;  %v2965_v23 = vmul.f32 -1.442695, %v2139_v13  ;;  %v2350_v47 = vmul.f32 %v4779_v4, %v1788_v45 }
 0x304   :  { %v3661_v57 = vpop.eup %3660  ;;  %3686 = vpow2.f32 %v2933_v53  ;;  %v2384_v48 = vadd.f32 %v2352_v9, %v4463_v42  ;;  %v2140_v52 = vadd.f32 %v1671_v51, %v4699_v29  ;;  %v1673_v45 = vadd.f32 %v1672_v12, %v4405_v34  ;;  %v3381_v51 = vpop.f32.mrf.mxu0 }
 0x305   :  { %v3663_v56 = vpop.eup %3662  ;;  %3688 = vrcp.f32 %v2039_v8  ;;  %v2263_v0 = vadd.f32 1.0, %v3661_v57  ;;  %v1678_v18 = vpop.f32.mrf.mxu1  ;;  %v4913_v19 = vadd.f32 %v2350_v47, %v4471_v43  ;;  %v4920_v42 = vmul.f32 %v3885_v59, %v4793_v50  ;;  %v5357_v59 = vld [vmem:[#allocation30_spill] sm:$0xff] }
 0x306   :  { %v3665_v1 = vpop.eup %3664  ;;  %v2040_v6 = vadd.f32 1.0, %v3663_v56  ;;  %3690 = vtanh.f32 %v2381_v2  ;;  %v1799_v2 = vadd.f32 %v3378_v14, %v4452_v10  ;;  %v1791_v43 = vadd.f32 %v1790_v33, %v4452_v10 }
 0x307   :  { %v3667_v53 = vpop.eup %3666  ;;  %3692 = vrcp.f32 %v2263_v0  ;;  %v2264_v61 = vadd.f32 1.0, %v3665_v1  ;;  %v1680_v13 = vpop.f32.mrf.mxu1  ;;  %v1675_v14 = vadd.f32 %v1674_v17, %v4414_v26  ;;  %v2934_v47 = vmul.f32 -1.442695, %v1916_v31 }
 0x308   :  { %v4915_v8 = vpop.eup %3668  ;;  %3694 = vrcp.f32 %v2040_v6  ;;  %v2041_v4 = vadd.f32 1.0, %v3667_v53  ;;  %v2353_v12 = vmul.f32 %v4841_v60, %v1799_v2  ;;  %v2966_v1 = vmul.f32 -1.442695, %v2140_v52  ;;  %v5359_v60 = vld [vmem:[#allocation52_spill] sm:$0xff] }
 0x309   :  { %v3671_v49 = vpop.eup %3670  ;;  %3696 = vrcp.f32 %v2264_v61  ;;  %v1682_v57 = vpop.f32.mrf.mxu1  ;;  %v2351_v61 = vmul.f32 %v4816_v24, %v1791_v43  ;;  %v1917_v29 = vadd.f32 %v1673_v45, %v5357_v59  ;;  %v1679_v31 = vadd.f32 %v1678_v18, %v4405_v34  ;;  %v3886_v43 = vld [vmem:[#allocation13 + $0x28] sm:$0xff] }
 0x30a   :  { %v4924_v9 = vpop.eup %3672  ;;  %3698 = vrcp.f32 %v2041_v4  ;;  %v2265_v56 = vadd.f32 1.0, %v3671_v49  ;;  %v5358_v4 = vld [vmem:[#allocation51_spill] sm:$0xff]  ;;  %v1803_v24 = vpop.f32.mrf.mxu0  ;;  %v5360_v45 = vsub.f32 1.0, %v4733_v38 }
 0x30b   :  { %v3675_v0 = vpop.eup %3674  ;;  %3700 = vpow2.f32 %v2965_v23  ;;  %v4929_v6 = vpop.f32.mrf.mxu1  ;;  %v2385_v49 = vadd.f32 %v2353_v12, %v5358_v4  ;;  %v4936_v17 = vadd.f32 %v2351_v61, %v5359_v60  ;;  %v1812_v23 = vadd.f32 %v3381_v51, %v4452_v10 }
 0x30c   :  { %v4931_v53 = vpop.eup %3676  ;;  %3702 = vrcp.f32 %v2265_v56  ;;  %v2042_v33 = vadd.f32 1.0, %v3675_v0  ;;  %v4945_v56 = vmul.f32 %v3886_v43, %v4829_v16  ;;  %v2141_v12 = vadd.f32 %v1675_v14, %v4713_v28  ;;  %v5362_v14 = vld [vmem:[#allocation32_spill] sm:$0xff] }
 0x30d   :  { %v3679_v20 = vpop.eup %3678  ;;  %3704 = vtanh.f32 %v2379_v35  ;;  %v4940_v52 = vpop.f32.mrf.mxu1  ;;  %v2356_v51 = vmul.f32 %v4888_v39, %v1812_v23  ;;  %v1681_v61 = vadd.f32 %v1680_v13, %v4414_v26 }
 0x30e   :  { %v4942_v2 = vpop.eup %3680  ;;  %3706 = vrcp.f32 %v2042_v33  ;;  %v2476_v35 = vmul.f32 %v3679_v20, %v5360_v45  ;;  %v2935_v33 = vmul.f32 -1.442695, %v1917_v29  ;;  %v5361_v20 = vsub.f32 1.0, %v4686_v55  ;;  %v5363_v45 = vld [vmem:[#allocation53_spill] sm:$0xff]  ;;  %v3382_v39 = vpop.f32.mrf.mxu0 }
 0x30f   :  { %v3683_v0 = vpop.eup %3682  ;;  %3708 = vpow2.f32 %v2934_v47  ;;  %v4953_v59 = vpop.f32.mrf.mxu1  ;;  %v1918_v47 = vadd.f32 %v1679_v31, %v5362_v14  ;;  %v2388_v18 = vadd.f32 %v2356_v51, %v5363_v45  ;;  %v1683_v31 = vadd.f32 %v1682_v57, %v4405_v34  ;;  %v5365_v57 = vld [vmem:[#allocation34_spill] sm:$0xff] }
 0x310   :  { %v3685_v4 = vpop.eup %3684  ;;  %v2540_v60 = vadd.f32 %v4844_v40, %v2476_v35  ;;  %v2266_v43 = vadd.f32 1.0, %v3683_v0  ;;  %3710 = vtanh.f32 %v2384_v48  ;;  %v2967_v35 = vmul.f32 -1.442695, %v2141_v12 }
 0x311   :  { %v3687_v38 = vpop.eup %3686  ;;  %v2474_v28 = vmul.f32 %v3685_v4, %v5361_v20  ;;  %3712 = vpow2.f32 %v2966_v1  ;;  %v4960_v23 = vpop.f32.mrf.mxu1  ;;  %v1804_v48 = vadd.f32 %v1803_v24, %v4452_v10  ;;  %v2142_v1 = vadd.f32 %v1681_v61, %v4727_v30 }
 0x312   :  { %v4962_v13 = vpop.eup %3688  ;;  %2572 = vst [vmem:[#allocation17 + $0x10] sm:$0xff] %v2540_v60  ;;  %3714 = vrcp.f32 %v2266_v43  ;;  %v2043_v40 = vadd.f32 1.0, %v3687_v38  ;;  %v5364_v4 = vsub.f32 1.0, %v4765_v44  ;;  %v1815_v43 = vadd.f32 %v3382_v39, %v4452_v10  ;;  %v3887_v38 = vld [vmem:[#allocation13 + $0x30] sm:$0xff]  ;;  %v1806_v20 = vpop.f32.mrf.mxu0 }
 0x313   :  { %v3691_v29 = vpop.eup %3690  ;;  %v4966_v55 = vadd.f32 %v4797_v7, %v2474_v28  ;;  %3716 = vtanh.f32 %v4913_v19  ;;  %v4971_v0 = vpop.f32.mrf.mxu1  ;;  %v2354_v24 = vmul.f32 %v4861_v21, %v1804_v48  ;;  %v4980_v19 = vmul.f32 %v3887_v38, %v4836_v22  ;;  %v5366_v21 = vld [vmem:[#allocation54_spill] sm:$0xff] }
 0x314   :  { %v4973_v51 = vpop.eup %3692  ;;  %3718 = vrcp.f32 %v2043_v40  ;;  %v2477_v12 = vmul.f32 %v3691_v29, %v5364_v4  ;;  %v2936_v30 = vmul.f32 -1.442695, %v1918_v47  ;;  %v1919_v61 = vadd.f32 %v1683_v31, %v5365_v57 }
 0x315   :  { %v3695_v7 = vpop.eup %3694  ;;  %2570 = vst [vmem:[#allocation17] sm:$0xff] %v4966_v55  ;;  %3720 = vpow2.f32 %v2935_v33  ;;  %v2386_v14 = vadd.f32 %v2354_v24, %v5366_v21  ;;  %v2357_v45 = vmul.f32 %v4915_v8, %v1815_v43  ;;  %v4989_v39 = vpop.f32.mrf.mxu1  ;;  %v2448_v48 = vsub.f32 1.0, %v4836_v22 }
 0x316   :  { %v4984_v28 = vpop.eup %3696  ;;  %v2541_v44 = vadd.f32 %v4891_v27, %v2477_v12  ;;  %3722 = vtanh.f32 %v2385_v49  ;;  %v2968_v33 = vmul.f32 -1.442695, %v2142_v1  ;;  %v1685_v47 = vadd.f32 %v4929_v6, %v4414_v26  ;;  %v5367_v27 = vld [vmem:[#allocation55_spill] sm:$0xff]  ;;  %v3888_v12 = vld [vmem:[#allocation13 + $0x38] sm:$0xff]  ;;  %v3385_v1 = vpop.f32.mrf.mxu0 }
 0x317   :  { %v4991_v40 = vpop.eup %3698  ;;  %3724 = vpow2.f32 %v2967_v35  ;;  %v2389_v49 = vadd.f32 %v2357_v45, %v5367_v27  ;;  %v1807_v8 = vadd.f32 %v1806_v20, %v4452_v10  ;;  %v5002_v24 = vmul.f32 %v3888_v12, %v4852_v15  ;;  %v5008_v57 = vpop.f32.mrf.mxu1 }
 0x318   :  { %v3701_v29 = vpop.eup %3700  ;;  %2573 = vst [vmem:[#allocation17 + $0x18] sm:$0xff] %v2541_v44  ;;  %v3060_v31 = vpack.c.bf16 %v2541_v44, %v2540_v60  ;;  %3726 = vtanh.f32 %v4936_v17  ;;  %v2937_v35 = vmul.f32 -1.442695, %v1919_v61  ;;  %v5368_v60 = vld [vmem:[#allocation36_spill] sm:$0xff]  ;;  %v1689_v38 = vadd.f32 %v4940_v52, %v4405_v34  ;;  %v3889_v44 = vld [vmem:[#allocation13 + $0x40] sm:$0xff] }
 0x319   :  { %v4999_v4 = vpop.eup %3702  ;;  %v2267_v22 = vadd.f32 1.0, %v3701_v29  ;;  %3728 = vpow2.f32 %v2936_v30  ;;  %v2143_v43 = vadd.f32 %v1685_v47, %v5368_v60  ;;  %v2355_v17 = vmul.f32 %v4877_v62, %v1807_v8  ;;  %v3890_v47 = vld [vmem:[#allocation13 + $0x48] sm:$0xff]  ;;  %v5370_v52 = vld [vmem:[#allocation56_spill] sm:$0xff] }
 0x31a   :  { %v3705_v6 = vpop.eup %3704  ;;  %3132 = vst [vmem:[#allocation18 + $0x8] sm:$0xff] %v3060_v31   ;;  %3730 = vtanh.f32 %v2388_v18  ;;  %v5013_v21 = vmul.f32 %v3889_v44, %v4871_v46  ;;  %v5369_v30 = vsub.f32 1.0, %v4703_v11  ;;  %v1828_v18 = vadd.f32 %v3385_v1, %v4452_v10  ;;  %v1819_v11 = vpop.f32.mrf.mxu0 }
 0x31b   :  { %v5010_v20 = vpop.eup %3706  ;;  %3732 = vrcp.f32 %v2267_v22  ;;  %v5019_v62 = vmul.f32 %v3890_v47, %v4881_v3  ;;  %v2387_v29 = vadd.f32 %v2355_v17, %v5370_v52  ;;  %v1920_v31 = vadd.f32 %v1689_v38, %v4745_v63  ;;  %v5371_v17 = vld [vmem:[#allocation57_spill] sm:$0xff] }
 0x31c   :  { %v2475_v61 = vmul.f32 %v3705_v6, %v5369_v30  ;;  %v3709_v45 = vpop.eup %3708  ;;  %3734 = vpow2.f32 %v2968_v33  ;;  %v2360_v22 = vmul.f32 %v3695_v7, %v1828_v18  ;;  %v2969_v1 = vmul.f32 -1.442695, %v2143_v43  ;;  %v5026_v30 = vpop.f32.mrf.mxu1 }
 0x31d   :  { %v3711_v27 = vpop.eup %3710  ;;  %v2044_v12 = vadd.f32 1.0, %v3709_v45  ;;  %3736 = vtanh.f32 %v2386_v14  ;;  %v1691_v44 = vadd.f32 %v4953_v59, %v4414_v26  ;;  %v5372_v59 = vsub.f32 1.0, %v4793_v50  ;;  %v3386_v45 = vpop.f32.mrf.mxu0 }
 0x31e   :  { %v2539_v8 = vadd.f32 %v4819_v41, %v2475_v61  ;;  %v3713_v6 = vpop.eup %3712  ;;  %v2480_v60 = vmul.f32 %v3711_v27, %v2448_v48  ;;  %3738 = vpow2.f32 %v2937_v35  ;;  %v2392_v14 = vadd.f32 %v2360_v22, %v5371_v17  ;;  %v5043_v52 = vpop.f32.mrf.mxu1 }
 0x31f   :  { %v5028_v33 = vpop.eup %3714  ;;  %3740 = vrcp.f32 %v2044_v12  ;;  %v2268_v41 = vadd.f32 1.0, %v3713_v6  ;;  %v2938_v48 = vmul.f32 -1.442695, %v1920_v31  ;;  %v2144_v35 = vadd.f32 %v1691_v44, %v4757_v54  ;;  %v5373_v44 = vld [vmem:[#allocation58_spill] sm:$0xff] }
 0x320   :  { %2571 = vst [vmem:[#allocation17 + $0x8] sm:$0xff] %v2539_v8  ;;  %v3055_v63 = vpack.c.bf16 %v2539_v8, %v4966_v55  ;;  %v3717_v7 = vpop.eup %3716  ;;  %v2544_v38 = vadd.f32 %v4980_v19, %v2480_v60  ;;  %3742 = vtanh.f32 %v2389_v49  ;;  %v2449_v55 = vsub.f32 1.0, %v4852_v15 }
 0x321   :  { %v5034_v43 = vpop.eup %3718  ;;  %3744 = vrcp.f32 %v2268_v41  ;;  %v2478_v61 = vmul.f32 %v3717_v7, %v5372_v59  ;;  %v1820_v18 = vadd.f32 %v1819_v11, %v4452_v10  ;;  %v2970_v19 = vmul.f32 -1.442695, %v2144_v35  ;;  %v5375_v59 = vld [vmem:[#allocation59_spill] sm:$0xff] }
 0x322   :  { %3056 = vst [vmem:[#allocation18] sm:$0xff] %v3055_v63   ;;  %v3721_v47 = vpop.eup %3720  ;;  %2576 = vst [vmem:[#allocation17 + $0x30] sm:$0xff] %v2544_v38  ;;  %3746 = vpow2.f32 %v2969_v1  ;;  %v1693_v49 = vadd.f32 %v4960_v23, %v4405_v34  ;;  %v1831_v54 = vadd.f32 %v3386_v45, %v4452_v10  ;;  %v3891_v23 = vld [vmem:[#allocation13 + $0x50] sm:$0xff]  ;;  %v1822_v63 = vpop.f32.mrf.mxu0  ;;  %v5374_v41 = vsub.f32 1.0, %v4829_v16 }
 0x323   :  { %v3723_v31 = vpop.eup %3722  ;;  %v2542_v50 = vadd.f32 %v4920_v42, %v2478_v61  ;;  %v2045_v27 = vadd.f32 1.0, %v3721_v47  ;;  %3748 = vtanh.f32 %v2387_v29  ;;  %v2358_v15 = vmul.f32 %v4931_v53, %v1820_v18  ;;  %v5376_v47 = vld [vmem:[#allocation38_spill] sm:$0xff] }
 0x324   :  { %v3725_v8 = vpop.eup %3724  ;;  %v2481_v12 = vmul.f32 %v3723_v31, %v2449_v55  ;;  %3750 = vpow2.f32 %v2938_v48  ;;  %v1921_v22 = vadd.f32 %v1693_v49, %v4761_v5  ;;  %v2361_v11 = vmul.f32 %v4991_v40, %v1831_v54  ;;  %v5055_v40 = vpop.f32.mrf.mxu1 }
 0x325   :  { %v3727_v6 = vpop.eup %3726  ;;  %v2516_v60 = vmul.f32 %v3891_v23, %v4898_v58  ;;  %2574 = vst [vmem:[#allocation17 + $0x20] sm:$0xff] %v2542_v50  ;;  %3752 = vrcp.f32 %v2045_v27  ;;  %v2269_v1 = vadd.f32 1.0, %v3725_v8  ;;  %v2390_v42 = vadd.f32 %v2358_v15, %v5373_v44  ;;  %v3389_v31 = vpop.f32.mrf.mxu0  ;;  %v3892_v15 = vld [vmem:[#allocation13 + $0x58] sm:$0xff] }
 0x326   :  { %v3729_v29 = vpop.eup %3728  ;;  %v2545_v53 = vadd.f32 %v5002_v24, %v2481_v12  ;;  %v2479_v17 = vmul.f32 %v3727_v6, %v5374_v41  ;;  %v2452_v5 = vsub.f32 1.0, %v4898_v58  ;;  %3754 = vtanh.f32 %v2392_v14  ;;  %v3893_v6 = vld [vmem:[#allocation13 + $0x60] sm:$0xff] }
 0x327   :  { %v3731_v7 = vpop.eup %3730  ;;  %v2046_v48 = vadd.f32 1.0, %v3729_v29  ;;  %v2939_v35 = vmul.f32 -1.442695, %v1921_v22  ;;  %v2393_v61 = vadd.f32 %v2361_v11, %v5375_v59  ;;  %v1695_v55 = vadd.f32 %v4971_v0, %v4414_v26  ;;  %v1835_v29 = vpop.f32.mrf.mxu0 }
 0x328   :  { %v5060_v18 = vpop.eup %3732  ;;  %2577 = vst [vmem:[#allocation17 + $0x38] sm:$0xff] %v2545_v53  ;;  %v3070_v24 = vpack.c.bf16 %v2545_v53, %v2544_v38  ;;  %v2543_v16 = vadd.f32 %v4945_v56, %v2479_v17  ;;  %v2484_v45 = vmul.f32 %v3731_v7, %v2452_v5  ;;  %3756 = vpow2.f32 %v2970_v19  ;;  %v5067_v56 = vpop.f32.mrf.mxu1  ;;  %v5378_v5 = vld [vmem:[#allocation40_spill] sm:$0xff] }
 0x329   :  { %v3735_v58 = vpop.eup %3734  ;;  %3758 = vrcp.f32 %v2269_v1  ;;  %v2450_v14 = vsub.f32 1.0, %v4871_v46  ;;  %v2145_v49 = vadd.f32 %v1695_v55, %v5376_v47  ;;  %v1823_v54 = vadd.f32 %v1822_v63, %v4452_v10 }
 0x32a   :  { %v3737_v27 = vpop.eup %3736  ;;  %v2517_v0 = vmul.f32 %v3892_v15, %v4924_v9  ;;  %3134 = vst [vmem:[#allocation18 + $0x18] sm:$0xff] %v3070_v24   ;;  %2575 = vst [vmem:[#allocation17 + $0x28] sm:$0xff] %v2543_v16  ;;  %v3065_v38 = vpack.c.bf16 %v2543_v16, %v2542_v50  ;;  %v2548_v8 = vadd.f32 %v2516_v60, %v2484_v45  ;;  %3760 = vtanh.f32 %v2390_v42  ;;  %v5377_v42 = vld [vmem:[#allocation60_spill] sm:$0xff] }
 0x32b   :  { %v3739_v19 = vpop.eup %3738  ;;  %v2482_v12 = vmul.f32 %v3737_v27, %v2450_v14  ;;  %3762 = vpow2.f32 %v2939_v35  ;;  %v2971_v46 = vmul.f32 -1.442695, %v2145_v49  ;;  %v2359_v22 = vmul.f32 %v4962_v13, %v1823_v54  ;;  %v5379_v14 = vld [vmem:[#allocation61_spill] sm:$0xff]  ;;  %v3390_v27 = vpop.f32.mrf.mxu0 }
 0x32c   :  { %v3741_v11 = vpop.eup %3740  ;;  %v5071_v23 = vmul.f32 %v3893_v6, %v4942_v2  ;;  %3133 = vst [vmem:[#allocation18 + $0x10] sm:$0xff] %v3065_v38   ;;  %3764 = vrcp.f32 %v2046_v48  ;;  %2580 = vst [vmem:[#allocation17 + $0x50] sm:$0xff] %v2548_v8  ;;  %v2453_v50 = vsub.f32 1.0, %v4924_v9  ;;  %v1699_v60 = vadd.f32 %v4989_v39, %v4405_v34  ;;  %v5084_v48 = vpop.f32.mrf.mxu1  ;;  %v5380_v49 = vld [vmem:[#allocation45_spill] sm:$0xff] }
 0x32d   :  { %v3743_v1 = vpop.eup %3742  ;;  %v2546_v44 = vadd.f32 %v5013_v21, %v2482_v12  ;;  %3766 = vtanh.f32 %v2393_v61  ;;  %v2391_v63 = vadd.f32 %v2359_v22, %v5377_v42  ;;  %v1844_v13 = vadd.f32 %v3389_v31, %v4452_v10  ;;  %v3894_v21 = vld [vmem:[#allocation13 + $0x70] sm:$0xff] }
 0x32e   :  { %v5079_v53 = vpop.eup %3744  ;;  %v2270_v41 = vadd.f32 1.0, %v3735_v58  ;;  %v2485_v17 = vmul.f32 %v3743_v1, %v2453_v50  ;;  %v1922_v7 = vadd.f32 %v1699_v60, %v5378_v5  ;;  %v1701_v9 = vadd.f32 %v5008_v57, %v4414_v26 }
 0x32f   :  { %v5086_v39 = vpop.eup %3746  ;;  %v2520_v35 = vmul.f32 %v3894_v21, %v4984_v28  ;;  %2578 = vst [vmem:[#allocation17 + $0x40] sm:$0xff] %v2546_v44  ;;  %v2451_v59 = vsub.f32 1.0, %v4881_v3  ;;  %3768 = vpow2.f32 %v2971_v46  ;;  %v2364_v61 = vmul.f32 %v3741_v11, %v1844_v13  ;;  %v3895_v46 = vld [vmem:[#allocation13 + $0x78] sm:$0xff] }
 0x330   :  { %v3749_v55 = vpop.eup %3748  ;;  %v2549_v24 = vadd.f32 %v2517_v0, %v2485_v17  ;;  %v2456_v16 = vsub.f32 1.0, %v4984_v28  ;;  %3770 = vtanh.f32 %v2391_v63  ;;  %v2940_v45 = vmul.f32 -1.442695, %v1922_v7  ;;  %v5094_v0 = vpop.f32.mrf.mxu1  ;;  %v5381_v63 = vld [vmem:[#allocation62_spill] sm:$0xff]  ;;  %v5382_v17 = vld [vmem:[#allocation48_spill] sm:$0xff] }
 0x331   :  { %v3751_v58 = vpop.eup %3750  ;;  %v2483_v57 = vmul.f32 %v3749_v55, %v2451_v59  ;;  %v2396_v47 = vadd.f32 %v2364_v61, %v5379_v14  ;;  %v2146_v54 = vadd.f32 %v1701_v9, %v5380_v49  ;;  %v1836_v31 = vadd.f32 %v1835_v29, %v4452_v10  ;;  %v1838_v29 = vpop.f32.mrf.mxu0 }
 0x332   :  { %v3753_v15 = vpop.eup %3752  ;;  %3772 = vrcp.f32 %v2270_v41  ;;  %v2047_v3 = vadd.f32 1.0, %v3739_v19  ;;  %2581 = vst [vmem:[#allocation17 + $0x58] sm:$0xff] %v2549_v24  ;;  %v3080_v38 = vpack.c.bf16 %v2549_v24, %v2548_v8  ;;  %v2048_v12 = vadd.f32 1.0, %v3751_v58 }
 0x333   :  { %v3755_v28 = vpop.eup %3754  ;;  %v2521_v22 = vmul.f32 %v3895_v46, %v4999_v4  ;;  %v2547_v11 = vadd.f32 %v5019_v62, %v2483_v57  ;;  %3774 = vpow2.f32 %v2940_v45  ;;  %v2362_v6 = vmul.f32 %v5010_v20, %v1836_v31  ;;  %v5383_v45 = vld [vmem:[#allocation63_spill] sm:$0xff] }
 0x334   :  { %3136 = vst [vmem:[#allocation18 + $0x28] sm:$0xff] %v3080_v38   ;;  %3776 = vrcp.f32 %v2048_v12  ;;  %v2488_v50 = vmul.f32 %v3755_v28, %v2456_v16  ;;  %v1703_v19 = vadd.f32 %v5026_v30, %v4405_v34  ;;  %v1847_v8 = vadd.f32 %v3390_v27, %v4452_v10  ;;  %v5109_v30 = vpop.f32.mrf.mxu1  ;;  %v5385_v12 = vld [vmem:[#allocation64_spill] sm:$0xff] }
 0x335   :  { %v3757_v60 = vpop.eup %3756  ;;  %2579 = vst [vmem:[#allocation17 + $0x48] sm:$0xff] %v2547_v11  ;;  %v3075_v1 = vpack.c.bf16 %v2547_v11, %v2546_v44  ;;  %3778 = vtanh.f32 %v2396_v47  ;;  %v2972_v42 = vmul.f32 -1.442695, %v2146_v54  ;;  %v2394_v13 = vadd.f32 %v2362_v6, %v5381_v63  ;;  %v3896_v11 = vld [vmem:[#allocation13 + $0x68] sm:$0xff] }
 0x336   :  { %v5103_v62 = vpop.eup %3758  ;;  %3780 = vrcp.f32 %v2047_v3  ;;  %v5105_v20 = vadd.f32 %v2520_v35, %v2488_v50  ;;  %v2454_v41 = vsub.f32 1.0, %v4942_v2  ;;  %v1923_v5 = vadd.f32 %v1703_v19, %v5382_v17  ;;  %v1720_v54 = vpop.f32.mrf.mxu1  ;;  %v5386_v19 = vld [vmem:[#allocation65_spill] sm:$0xff] }
 0x337   :  { %v3761_v7 = vpop.eup %3760  ;;  %3135 = vst [vmem:[#allocation18 + $0x20] sm:$0xff] %v3075_v1   ;;  %v2457_v44 = vsub.f32 1.0, %v4999_v4  ;;  %3782 = vtanh.f32 %v2394_v13  ;;  %v2365_v9 = vmul.f32 %v3753_v15, %v1847_v8  ;;  %v1705_v21 = vadd.f32 %v5043_v52, %v4414_v26  ;;  %v5384_v4 = vld [vmem:[#allocation25_spill] sm:$0xff]  ;;  %v3393_v3 = vpop.f32.mrf.mxu0  ;;  %v3897_v8 = vld [vmem:[#allocation13 + $0x90] sm:$0xff] }
 0x338   :  { %v3763_v59 = vpop.eup %3762  ;;  %2584 = vst [vmem:[#allocation17 + $0x70] sm:$0xff] %v5105_v20  ;;  %v2272_v35 = vadd.f32 1.0, %v3757_v60  ;;  %v2486_v61 = vmul.f32 %v3761_v7, %v2454_v41  ;;  %v2941_v55 = vmul.f32 -1.442695, %v1923_v5  ;;  %v1839_v2 = vadd.f32 %v1838_v29, %v4452_v10  ;;  %v1722_v13 = vpop.f32.mrf.mxu1  ;;  %v5388_v7 = vld [vmem:[#allocation68_spill] sm:$0xff] }
 0x339   :  { %v5116_v24 = vpop.eup %3764  ;;  %v2049_v16 = vadd.f32 1.0, %v3763_v59  ;;  %3784 = vpow2.f32 %v2972_v42  ;;  %v2397_v58 = vadd.f32 %v2365_v9, %v5383_v45  ;;  %v2147_v57 = vadd.f32 %v1705_v21, %v5384_v4  ;;  %v5387_v42 = vld [vmem:[#allocation70_spill] sm:$0xff] }
 0x33a   :  { %v3767_v14 = vpop.eup %3766  ;;  %v2550_v47 = vadd.f32 %v5071_v23, %v2486_v61  ;;  %v2455_v52 = vsub.f32 1.0, %v4973_v51  ;;  %3786 = vpow2.f32 %v2941_v55  ;;  %v2363_v49 = vmul.f32 %v5034_v43, %v1839_v2  ;;  %v5146_v45 = vpop.f32.mrf.mxu1 }
 0x33b   :  { %3788 = vrcp.f32 %v2049_v16  ;;  %v2489_v31 = vmul.f32 %v3767_v14, %v2457_v44  ;;  %v2973_v27 = vmul.f32 -1.442695, %v2147_v57  ;;  %v1709_v15 = vadd.f32 %v5055_v40, %v4405_v34 }
 0x33c   :  { %v3769_v38 = vpop.eup %3768  ;;  %2582 = vst [vmem:[#allocation17 + $0x60] sm:$0xff] %v2550_v47  ;;  %3790 = vtanh.f32 %v2397_v58  ;;  %v2395_v28 = vadd.f32 %v2363_v49, %v5385_v12  ;;  %v1711_v23 = vadd.f32 %v5067_v56, %v4414_v26  ;;  %v1713_v46 = vadd.f32 %v5084_v48, %v4405_v34 }
 0x33d   :  { %v3771_v43 = vpop.eup %3770  ;;  %v2519_v6 = vmul.f32 %v3896_v11, %v4973_v51  ;;  %3792 = vrcp.f32 %v2272_v35  ;;  %v2553_v50 = vadd.f32 %v2521_v22, %v2489_v31  ;;  %v1924_v40 = vadd.f32 %v1709_v15, %v5386_v19  ;;  %v1851_v22 = vpop.f32.mrf.mxu0 }
 0x33e   :  { %v2524_v60 = vmul.f32 %v3897_v8, %v5079_v53  ;;  %v2487_v1 = vmul.f32 %v3771_v43, %v2455_v52  ;;  %3794 = vtanh.f32 %v2395_v28  ;;  %v1925_v63 = vadd.f32 %v1713_v46, %v5387_v42  ;;  %v5389_v28 = vld [vmem:[#allocation26_spill] sm:$0xff] }
 0x33f   :  { %v5134_v56 = vpop.eup %3772  ;;  %2585 = vst [vmem:[#allocation17 + $0x78] sm:$0xff] %v2553_v50  ;;  %v3090_v48 = vpack.c.bf16 %v2553_v50, %v5105_v20  ;;  %v2273_v29 = vadd.f32 1.0, %v3769_v38  ;;  %v2942_v41 = vmul.f32 -1.442695, %v1924_v40  ;;  %v1715_v51 = vadd.f32 %v5094_v0, %v4414_v26  ;;  %v3394_v14 = vpop.f32.mrf.mxu0 }
 0x340   :  { %v3775_v17 = vpop.eup %3774  ;;  %v2551_v5 = vadd.f32 %v2519_v6, %v2487_v1  ;;  %3796 = vpow2.f32 %v2973_v27  ;;  %v2148_v44 = vadd.f32 %v1711_v23, %v5388_v7  ;;  %v2943_v9 = vmul.f32 -1.442695, %v1925_v63  ;;  %v1728_v23 = vpop.f32.mrf.mxu1  ;;  %v5390_v7 = vld [vmem:[#allocation27_spill] sm:$0xff] }
 0x341   :  { %v3777_v21 = vpop.eup %3776  ;;  %3138 = vst [vmem:[#allocation18 + $0x38] sm:$0xff] %v3090_v48   ;;  %v2460_v59 = vsub.f32 1.0, %v5079_v53  ;;  %v2458_v35 = vsub.f32 1.0, %v5028_v33  ;;  %3798 = vpow2.f32 %v2942_v41  ;;  %v1719_v20 = vadd.f32 %v5109_v30, %v4405_v34  ;;  %v3898_v30 = vld [vmem:[#allocation13 + $0x80] sm:$0xff]  ;;  %v1854_v6 = vpop.f32.mrf.mxu0 }
 0x342   :  { %v3779_v61 = vpop.eup %3778  ;;  %2583 = vst [vmem:[#allocation17 + $0x68] sm:$0xff] %v2551_v5  ;;  %v3085_v0 = vpack.c.bf16 %v2551_v5, %v2550_v47  ;;  %v2050_v55 = vadd.f32 1.0, %v3775_v17  ;;  %v1860_v2 = vadd.f32 %v3393_v3, %v4452_v10  ;;  %v1721_v16 = vadd.f32 %v1720_v54, %v4414_v26  ;;  %v3900_v17 = vld [vmem:[#allocation13 + $0x88] sm:$0xff] }
 0x343   :  { %v3781_v58 = vpop.eup %3780  ;;  %3800 = vrcp.f32 %v2273_v29  ;;  %v2492_v4 = vmul.f32 %v3779_v61, %v2460_v59  ;;  %v2149_v53 = vadd.f32 %v1715_v51, %v4858_v36  ;;  %v1926_v57 = vadd.f32 %v1719_v20, %v4867_v37  ;;  %v3899_v36 = vld [vmem:[#allocation13 + $0x98] sm:$0xff]  ;;  %v5168_v63 = vpop.f32.mrf.mxu0  ;;  %v5391_v61 = vld [vmem:[#allocation46_spill] sm:$0xff] }
 0x344   :  { %v3783_v52 = vpop.eup %3782  ;;  %v2522_v49 = vmul.f32 %v3898_v30, %v5028_v33  ;;  %3137 = vst [vmem:[#allocation18 + $0x30] sm:$0xff] %v3085_v0   ;;  %v2974_v47 = vmul.f32 -1.442695, %v2148_v44  ;;  %3802 = vpow2.f32 %v2943_v9  ;;  %v2368_v31 = vmul.f32 %v3777_v21, %v1860_v2  ;;  %v5392_v0 = vld [vmem:[#allocation42_spill] sm:$0xff]  ;;  %v5395_v30 = vld [vmem:[#allocation49_spill] sm:$0xff] }
 0x345   :  { %v5151_v27 = vadd.f32 %v2524_v60, %v2492_v4  ;;  %v2490_v54 = vmul.f32 %v3783_v52, %v2458_v35  ;;  %v2944_v15 = vmul.f32 -1.442695, %v1926_v57  ;;  %v2150_v3 = vadd.f32 %v1721_v16, %v4885_v25  ;;  %v1867_v4 = vpop.f32.mrf.mxu0  ;;  %v5394_v52 = vld [vmem:[#allocation43_spill] sm:$0xff] }
 0x346   :  { %v5154_v38 = vpop.eup %3784  ;;  %v2525_v37 = vmul.f32 %v3899_v36, %v5103_v62  ;;  %3804 = vrcp.f32 %v2050_v55  ;;  %v2461_v12 = vsub.f32 1.0, %v5103_v62  ;;  %v2400_v33 = vadd.f32 %v2368_v31, %v5389_v28  ;;  %v5396_v31 = vld [vmem:[#allocation29_spill] sm:$0xff] }
 0x347   :  { %v3787_v46 = vpop.eup %3786  ;;  %2588 = vst [vmem:[#allocation17 + $0x90] sm:$0xff] %v5151_v27  ;;  %v5160_v43 = vadd.f32 %v2522_v49, %v2490_v54  ;;  %v2975_v11 = vmul.f32 -1.442695, %v2149_v53  ;;  %3806 = vpow2.f32 %v2944_v15  ;;  %v1852_v25 = vadd.f32 %v1851_v22, %v4452_v10 }
 0x348   :  { %v3789_v50 = vpop.eup %3788  ;;  %v2051_v19 = vadd.f32 1.0, %v3787_v46  ;;  %v2459_v40 = vsub.f32 1.0, %v5060_v18  ;;  %3808 = vtanh.f32 %v2400_v33  ;;  %v1723_v62 = vadd.f32 %v1722_v13, %v4405_v34  ;;  %v1730_v13 = vpop.f32.mrf.mxu1 }
 0x349   :  { %v3791_v8 = vpop.eup %3790  ;;  %2586 = vst [vmem:[#allocation17 + $0x80] sm:$0xff] %v5160_v43  ;;  %3810 = vpow2.f32 %v2974_v47  ;;  %v2976_v60 = vmul.f32 -1.442695, %v2150_v3  ;;  %v2366_v1 = vmul.f32 %v5116_v24, %v1852_v25  ;;  %v1863_v42 = vadd.f32 %v3394_v14, %v4452_v10  ;;  %v5194_v33 = vpop.f32.mrf.mxu0 }
 0x34a   :  { %v5170_v48 = vpop.eup %3792  ;;  %3812 = vrcp.f32 %v2051_v19  ;;  %v2493_v29 = vmul.f32 %v3791_v8, %v2461_v12  ;;  %v1927_v41 = vadd.f32 %v1723_v62, %v4904_v32  ;;  %v1855_v51 = vadd.f32 %v1854_v6, %v4452_v10  ;;  %v5393_v32 = vld [vmem:[#allocation28_spill] sm:$0xff] }
 0x34b   :  { %v3795_v22 = vpop.eup %3794  ;;  %v2523_v5 = vmul.f32 %v3900_v17, %v5060_v18  ;;  %3814 = vpow2.f32 %v2975_v11  ;;  %v2398_v24 = vadd.f32 %v2366_v1, %v5390_v7  ;;  %v2369_v44 = vmul.f32 %v3789_v50, %v1863_v42  ;;  %v5398_v17 = vld [vmem:[#allocation66_spill] sm:$0xff] }
 0x34c   :  { %v2557_v9 = vadd.f32 %v2525_v37, %v2493_v29  ;;  %v2491_v21 = vmul.f32 %v3795_v22, %v2459_v40  ;;  %v2945_v59 = vmul.f32 -1.442695, %v1927_v41  ;;  %v2367_v35 = vmul.f32 %v3781_v58, %v1855_v51  ;;  %v1732_v58 = vpop.f32.mrf.mxu1 }
 0x34d   :  { %v3797_v20 = vpop.eup %3796  ;;  %v1177_v55 = vadd.f32 %v5392_v0, %v5391_v61  ;;  %3816 = vpow2.f32 %v2976_v60  ;;  %v2401_v2 = vadd.f32 %v2369_v44, %v5393_v32  ;;  %v1725_v16 = vadd.f32 %v5146_v45, %v4414_v26  ;;  %v5397_v45 = vld [vmem:[#allocation67_spill] sm:$0xff]  ;;  %v1870_v60 = vpop.f32.mrf.mxu0  ;;  %v5400_v32 = vld [vmem:[#allocation33_spill] sm:$0xff] }
 0x34e   :  { %v3799_v18 = vpop.eup %3798  ;;  %v2271_v53 = vadd.f32 1.0, %v5086_v39  ;;  %2589 = vst [vmem:[#allocation17 + $0x98] sm:$0xff] %v2557_v9  ;;  %v3100_v57 = vpack.c.bf16 %v2557_v9, %v5151_v27  ;;  %v2555_v14 = vadd.f32 %v2523_v5, %v2491_v21  ;;  %3818 = vtanh.f32 %v2398_v24  ;;  %v1734_v41 = vpop.f32.mrf.mxu1 }
 0x34f   :  { %v1181_v49 = vadd.f32 %v5395_v30, %v5394_v52  ;;  %v2052_v47 = vadd.f32 1.0, %v3799_v18  ;;  %3820 = vpow2.f32 %v2945_v59  ;;  %v2399_v54 = vadd.f32 %v2367_v35, %v5396_v31  ;;  %v3902_v59 = vld [vmem:[#allocation13 + $0xa0] sm:$0xff] }
 0x350   :  { %v5186_v15 = vpop.eup %3800  ;;  %v1185_v3 = vadd.f32 %v5397_v45, %v5394_v52  ;;  %3140 = vst [vmem:[#allocation18 + $0x48] sm:$0xff] %v3100_v57   ;;  %2587 = vst [vmem:[#allocation17 + $0x88] sm:$0xff] %v2555_v14  ;;  %v3095_v39 = vpack.c.bf16 %v2555_v14, %v5160_v43  ;;  %3822 = vtanh.f32 %v2401_v2  ;;  %v1729_v27 = vadd.f32 %v1728_v23, %v4405_v34  ;;  %v3901_v43 = vld [vmem:[#allocation13 + $0xb0] sm:$0xff] }
 0x351   :  { %v3803_v36 = vpop.eup %3802  ;;  %v2274_v37 = vadd.f32 1.0, %v5154_v38  ;;  %3824 = vrcp.f32 %v2052_v47  ;;  %v2151_v12 = vadd.f32 %v1725_v16, %v1177_v55  ;;  %v1733_v28 = vadd.f32 %v1732_v58, %v4405_v34 }
 0x352   :  { %3826 = vrcp.f32 %v2271_v53  ;;  %3139 = vst [vmem:[#allocation18 + $0x40] sm:$0xff] %v3095_v39   ;;  %v2053_v46 = vadd.f32 1.0, %v3803_v36  ;;  %v1928_v11 = vadd.f32 %v1729_v27, %v1181_v49  ;;  %v2528_v19 = vmul.f32 %v3901_v43, %v5170_v48  ;;  %v3903_v53 = vld [vmem:[#allocation13 + $0xb8] sm:$0xff] }
 0x353   :  { %v3805_v25 = vpop.eup %3804  ;;  %v1929_v6 = vadd.f32 %v1733_v28, %v1185_v3  ;;  %v2464_v23 = vsub.f32 1.0, %v5170_v48  ;;  %v2977_v34 = vmul.f32 -1.442695, %v2151_v12  ;;  %v1731_v8 = vadd.f32 %v1730_v13, %v4414_v26  ;;  %v5399_v48 = vld [vmem:[#allocation69_spill] sm:$0xff] }
 0x354   :  { %v3807_v50 = vpop.eup %3806  ;;  %3828 = vrcp.f32 %v2053_v46  ;;  %v2946_v38 = vmul.f32 -1.442695, %v1928_v11  ;;  %v2275_v42 = vadd.f32 1.0, %v3797_v20  ;;  %v1868_v51 = vadd.f32 %v1867_v4, %v4452_v10  ;;  %v5209_v4 = vpop.f32.mrf.mxu0 }
 0x355   :  { %v3809_v40 = vpop.eup %3808  ;;  %3830 = vrcp.f32 %v2274_v37  ;;  %v2054_v62 = vadd.f32 1.0, %v3807_v50  ;;  %v1183_v5 = vadd.f32 %v5398_v17, %v5391_v61  ;;  %v1187_v7 = vadd.f32 %v5399_v48, %v5391_v61 }
 0x356   :  { %v3811_v1 = vpop.eup %3810  ;;  %v2496_v29 = vmul.f32 %v3809_v40, %v2464_v23  ;;  %3832 = vtanh.f32 %v2399_v54  ;;  %v2947_v24 = vmul.f32 -1.442695, %v1929_v6  ;;  %v2370_v13 = vmul.f32 %v3805_v25, %v1868_v51  ;;  %v1883_v37 = vpop.f32.mrf.mxu0  ;;  %v5402_v6 = vld [vmem:[#allocation31_spill] sm:$0xff] }
 0x357   :  { %v3813_v22 = vpop.eup %3812  ;;  %3834 = vrcp.f32 %v2054_v62  ;;  %v1871_v21 = vadd.f32 %v1870_v60, %v4452_v10  ;;  %v2526_v35 = vmul.f32 %v3902_v59, %v5134_v56  ;;  %v2152_v20 = vadd.f32 %v1731_v8, %v1183_v5  ;;  %v3904_v8 = vld [vmem:[#allocation13 + $0xa8] sm:$0xff] }
 0x358   :  { %v3815_v44 = vpop.eup %3814  ;;  %v2560_v9 = vadd.f32 %v2528_v19, %v2496_v29  ;;  %3836 = vpow2.f32 %v2946_v38  ;;  %v1735_v0 = vadd.f32 %v1734_v41, %v4414_v26  ;;  %v2462_v61 = vsub.f32 1.0, %v5134_v56  ;;  %v5401_v56 = vld [vmem:[#allocation37_spill] sm:$0xff]  ;;  %v5220_v40 = vpop.f32.mrf.mxu0 }
 0x359   :  { %3838 = vpow2.f32 %v2977_v34  ;;  %v2402_v2 = vadd.f32 %v2370_v13, %v5400_v32  ;;  %v2371_v16 = vmul.f32 %v3813_v22, %v1871_v21  ;;  %v2529_v57 = vmul.f32 %v3903_v53, %v5186_v15  ;;  %v3905_v32 = vld [vmem:[#allocation13 + $0xc0] sm:$0xff]  ;;  %v3906_v53 = vld [vmem:[#allocation13 + $0xc8] sm:$0xff] }
 0x35a   :  { %v3817_v55 = vpop.eup %3816  ;;  %3840 = vrcp.f32 %v2275_v42  ;;  %2592 = vst [vmem:[#allocation17 + $0xb0] sm:$0xff] %v2560_v9  ;;  %v2465_v14 = vsub.f32 1.0, %v5186_v15  ;;  %v1876_v26 = vadd.f32 %v5168_v63, %v4452_v10  ;;  %v2276_v52 = vadd.f32 1.0, %v3811_v1  ;;  %v5403_v42 = vld [vmem:[#allocation35_spill] sm:$0xff]  ;;  %v1886_v48 = vpop.f32.mrf.mxu0 }
 0x35b   :  { %v3819_v18 = vpop.eup %3818  ;;  %3842 = vpow2.f32 %v2947_v24  ;;  %v2277_v30 = vadd.f32 1.0, %v3815_v44  ;;  %v2403_v47 = vadd.f32 %v2371_v16, %v5401_v56  ;;  %v2978_v45 = vmul.f32 -1.442695, %v2152_v20  ;;  %v5404_v24 = vld [vmem:[#allocation41_spill] sm:$0xff] }
 0x35c   :  { %v3821_v58 = vpop.eup %3820  ;;  %v2494_v49 = vmul.f32 %v3819_v18, %v2462_v61  ;;  %v2153_v3 = vadd.f32 %v1735_v0, %v1187_v7  ;;  %3844 = vtanh.f32 %v2402_v2  ;;  %v1879_v15 = vadd.f32 %v5194_v33, %v4452_v10 }
 0x35d   :  { %v3823_v31 = vpop.eup %3822  ;;  %v2055_v54 = vadd.f32 1.0, %v3821_v58  ;;  %3846 = vtanh.f32 %v2403_v47  ;;  %v2278_v12 = vadd.f32 1.0, %v3817_v55  ;;  %v1884_v43 = vadd.f32 %v1883_v37, %v4452_v10  ;;  %v5405_v47 = vld [vmem:[#allocation47_spill] sm:$0xff] }
 0x35e   :  { %v3825_v39 = vpop.eup %3824  ;;  %v2558_v27 = vadd.f32 %v2526_v35, %v2494_v49  ;;  %v2497_v36 = vmul.f32 %v3823_v31, %v2465_v14  ;;  %v2979_v25 = vmul.f32 -1.442695, %v2153_v3  ;;  %v1887_v20 = vadd.f32 %v1886_v48, %v4452_v10 }
 0x35f   :  { %v3827_v63 = vpop.eup %3826  ;;  %3848 = vrcp.f32 %v2055_v54  ;;  %v2372_v28 = vmul.f32 %v3825_v39, %v1876_v26 }
 0x360   :  { %3850 = vrcp.f32 %v2276_v52  ;;  %2590 = vst [vmem:[#allocation17 + $0xa0] sm:$0xff] %v2558_v27  ;;  %v2561_v46 = vadd.f32 %v2529_v57, %v2497_v36  ;;  %v2463_v33 = vsub.f32 1.0, %v3827_v63  ;;  %v2527_v60 = vmul.f32 %v3904_v8, %v3827_v63  ;;  %v3907_v36 = vld [vmem:[#allocation13 + $0xd0] sm:$0xff] }
 0x361   :  { %v3829_v11 = vpop.eup %3828  ;;  %3852 = vrcp.f32 %v2277_v30  ;;  %v2404_v50 = vadd.f32 %v2372_v28, %v5402_v6 }
 0x362   :  { %v3831_v19 = vpop.eup %3830  ;;  %2593 = vst [vmem:[#allocation17 + $0xb8] sm:$0xff] %v2561_v46  ;;  %v3110_v23 = vpack.c.bf16 %v2561_v46, %v2560_v9  ;;  %3854 = vpow2.f32 %v2978_v45  ;;  %v2373_v38 = vmul.f32 %v3829_v11, %v1879_v15  ;;  %v3908_v46 = vld [vmem:[#allocation13 + $0xd8] sm:$0xff] }
 0x363   :  { %v3833_v62 = vpop.eup %3832  ;;  %3856 = vrcp.f32 %v2278_v12  ;;  %v2466_v21 = vsub.f32 1.0, %v3831_v19  ;;  %v2530_v2 = vmul.f32 %v3905_v32, %v3831_v19 }
 0x364   :  { %v3835_v34 = vpop.eup %3834  ;;  %3142 = vst [vmem:[#allocation18 + $0x58] sm:$0xff] %v3110_v23   ;;  %v2495_v1 = vmul.f32 %v3833_v62, %v2463_v33  ;;  %3858 = vtanh.f32 %v2404_v50  ;;  %v2405_v29 = vadd.f32 %v2373_v38, %v5403_v42  ;;  %v1892_v50 = vadd.f32 %v5209_v4, %v4452_v10 }
 0x365   :  { %v3837_v41 = vpop.eup %3836  ;;  %3860 = vpow2.f32 %v2979_v25  ;;  %v2374_v51 = vmul.f32 %v3835_v34, %v1884_v43  ;;  %v3909_v34 = vld [vmem:[#allocation13 + $0xe0] sm:$0xff] }
 0x366   :  { %v3839_v22 = vpop.eup %3838  ;;  %v2559_v17 = vadd.f32 %v2527_v60, %v2495_v1  ;;  %v2056_v5 = vadd.f32 1.0, %v3837_v41  ;;  %3862 = vtanh.f32 %v2405_v29  ;;  %v1895_v1 = vadd.f32 %v5220_v40, %v4452_v10  ;;  %v5406_v41 = vld [vmem:[#allocation39_spill] sm:$0xff] }
 0x367   :  { %v3841_v7 = vpop.eup %3840  ;;  %v2406_v44 = vadd.f32 %v2374_v51, %v5404_v24  ;;  %v2279_v59 = vadd.f32 1.0, %v3839_v22 }
 0x368   :  { %v3843_v9 = vpop.eup %3842  ;;  %2591 = vst [vmem:[#allocation17 + $0xa8] sm:$0xff] %v2559_v17  ;;  %v3105_v13 = vpack.c.bf16 %v2559_v17, %v2558_v27  ;;  %3864 = vrcp.f32 %v2056_v5  ;;  %v2467_v55 = vsub.f32 1.0, %v3841_v7  ;;  %v2531_v57 = vmul.f32 %v3906_v53, %v3841_v7  ;;  %v5407_v5 = vld [vmem:[#allocation44_spill] sm:$0xff] }
 0x369   :  { %v2057_v35 = vadd.f32 1.0, %v3843_v9  ;;  %3866 = vtanh.f32 %v2406_v44  ;;  %v3845_v0 = vpop.eup %3844  ;;  %v3910_v44 = vld [vmem:[#allocation13 + $0xe8] sm:$0xff] }
 0x36a   :  { %3141 = vst [vmem:[#allocation18 + $0x50] sm:$0xff] %v3105_v13   ;;  %v3847_v61 = vpop.eup %3846  ;;  %v2498_v16 = vmul.f32 %v3845_v0, %v2466_v21  ;;  %v3911_v0 = vld [vmem:[#allocation13 + $0xf0] sm:$0xff] }
 0x36b   :  { %3868 = vrcp.f32 %v2057_v35  ;;  %v2499_v14 = vmul.f32 %v3847_v61, %v2467_v55 }
 0x36c   :  { %v3849_v18 = vpop.eup %3848  ;;  %3870 = vrcp.f32 %v2279_v59  ;;  %v2562_v58 = vadd.f32 %v2530_v2, %v2498_v16 }
 0x36d   :  { %v3851_v26 = vpop.eup %3850  ;;  %v2375_v52 = vmul.f32 %v3849_v18, %v1887_v20  ;;  %v2563_v49 = vadd.f32 %v2531_v57, %v2499_v14  ;;  %v3912_v18 = vld [vmem:[#allocation13 + $0xf8] sm:$0xff] }
 0x36e   :  { %v3853_v30 = vpop.eup %3852  ;;  %2594 = vst [vmem:[#allocation17 + $0xc0] sm:$0xff] %v2562_v58  ;;  %v2468_v45 = vsub.f32 1.0, %v3851_v26  ;;  %v2532_v15 = vmul.f32 %v3907_v36, %v3851_v26 }
 0x36f   :  { %v3855_v56 = vpop.eup %3854  ;;  %v2407_v31 = vadd.f32 %v2375_v52, %v5405_v47  ;;  %2595 = vst [vmem:[#allocation17 + $0xc8] sm:$0xff] %v2563_v49  ;;  %v3115_v3 = vpack.c.bf16 %v2563_v49, %v2562_v58  ;;  %v2469_v12 = vsub.f32 1.0, %v3853_v30  ;;  %v2533_v11 = vmul.f32 %v3908_v46, %v3853_v30 }
 0x370   :  { %v3857_v54 = vpop.eup %3856  ;;  %v2280_v37 = vadd.f32 1.0, %v3855_v56 }
 0x371   :  { %v3859_v39 = vpop.eup %3858  ;;  %3872 = vtanh.f32 %v2407_v31  ;;  %3143 = vst [vmem:[#allocation18 + $0x60] sm:$0xff] %v3115_v3   ;;  %v2470_v23 = vsub.f32 1.0, %v3857_v54  ;;  %v2534_v8 = vmul.f32 %v3909_v34, %v3857_v54 }
 0x372   :  { %v3861_v27 = vpop.eup %3860  ;;  %v2500_v63 = vmul.f32 %v3859_v39, %v2468_v45  ;;  %3874 = vrcp.f32 %v2280_v37 }
 0x373   :  { %v3863_v28 = vpop.eup %3862  ;;  %v2281_v19 = vadd.f32 1.0, %v3861_v27 }
 0x374   :  { %v2564_v25 = vadd.f32 %v2532_v15, %v2500_v63  ;;  %v2501_v6 = vmul.f32 %v3863_v28, %v2469_v12 }
 0x375   :  { %v3865_v43 = vpop.eup %3864  ;;  %3876 = vrcp.f32 %v2281_v19 }
 0x376   :  { %v3867_v33 = vpop.eup %3866  ;;  %2596 = vst [vmem:[#allocation17 + $0xd0] sm:$0xff] %v2564_v25  ;;  %v2565_v38 = vadd.f32 %v2533_v11, %v2501_v6  ;;  %v2376_v62 = vmul.f32 %v3865_v43, %v1892_v50 }
 0x377   :  { %v2502_v60 = vmul.f32 %v3867_v33, %v2470_v23 }
 0x378   :  { %v3869_v42 = vpop.eup %3868  ;;  %2597 = vst [vmem:[#allocation17 + $0xd8] sm:$0xff] %v2565_v38  ;;  %v3120_v29 = vpack.c.bf16 %v2565_v38, %v2564_v25  ;;  %v2408_v51 = vadd.f32 %v2376_v62, %v5406_v41 }
 0x379   :  { %v2566_v4 = vadd.f32 %v2534_v8, %v2502_v60  ;;  %v2377_v22 = vmul.f32 %v3869_v42, %v1895_v1  ;;  %v3871_v17 = vpop.eup %3870 }
 0x37a   :  { %3144 = vst [vmem:[#allocation18 + $0x68] sm:$0xff] %v3120_v29   ;;  %3878 = vtanh.f32 %v2408_v51  ;;  %v2471_v7 = vsub.f32 1.0, %v3871_v17  ;;  %v2535_v9 = vmul.f32 %v3910_v44, %v3871_v17 }
 0x37b   :  { %2598 = vst [vmem:[#allocation17 + $0xe0] sm:$0xff] %v2566_v4  ;;  %v2409_v48 = vadd.f32 %v2377_v22, %v5407_v5 }
 0x37d   :  { %3880 = vtanh.f32 %v2409_v48 }
 0x37e   :  { %v3873_v24 = vpop.eup %3872 }
 0x37f   :  { %v2503_v10 = vmul.f32 %v3873_v24, %v2471_v7  ;;  %v3875_v13 = vpop.eup %3874 }
 0x380   :  { %v2472_v35 = vsub.f32 1.0, %v3875_v13  ;;  %v2536_v55 = vmul.f32 %v3911_v0, %v3875_v13 }
 0x381   :  { %v2567_v40 = vadd.f32 %v2535_v9, %v2503_v10 }
 0x382   :  { %v3877_v59 = vpop.eup %3876 }
 0x383   :  { %2599 = vst [vmem:[#allocation17 + $0xe8] sm:$0xff] %v2567_v40  ;;  %v3125_v21 = vpack.c.bf16 %v2567_v40, %v2566_v4  ;;  %v2473_v32 = vsub.f32 1.0, %v3877_v59  ;;  %v2537_v53 = vmul.f32 %v3912_v18, %v3877_v59 }
 0x385   :  { %3145 = vst [vmem:[#allocation18 + $0x70] sm:$0xff] %v3125_v21  }
 0x387   :  { %v3879_v20 = vpop.eup %3878 }
 0x388   :  { %v2504_v61 = vmul.f32 %v3879_v20, %v2472_v35 }
 0x38a   :  { %v3881_v2 = vpop.eup %3880  ;;  %v2568_v16 = vadd.f32 %v2536_v55, %v2504_v61 }
 0x38b   :  { %v2505_v57 = vmul.f32 %v3881_v2, %v2473_v32 }
 0x38c   :  { %2600 = vst [vmem:[#allocation17 + $0xf0] sm:$0xff] %v2568_v16 }
 0x38d   :  { %v2569_v14 = vadd.f32 %v2537_v53, %v2505_v57 }
 0x38f   :  { %2601 = vst [vmem:[#allocation17 + $0xf8] sm:$0xff] %v2569_v14  ;;  %v3130_v26 = vpack.c.bf16 %v2569_v14, %v2568_v16 }
 0x391   :  { %3146 = vst [vmem:[#allocation18 + $0x78] sm:$0xff] %v3130_v26  }
 0x392 PF:  { %s2764_s9 = sld [smem:[#allocation4]]  ;;  %s4084_s29 = smov [#allocation17]  }
 0x393   :  { %s2771_s3 = sshll.u32 %s4084_s29, 4  ;;  %s4085_s30 = smov [#allocation18]   ;;  %s2772_s3 = int_to_ptr.vmem [resolvable:$true] %s2771_s3 }
 0x394   :  { %s2787_s12 = sshll.u32 %s4085_s30, 4  ;;  %s4017_s22 = scalar_lea.vmem %s2772_s3, 4096  ;;  %s5232_s12 = int_to_ptr.vmem [resolvable:$true] %s2787_s12 }
 0x395   :  { %p4018_p9 = scmp.ne.s32.totalorder %s2772_s3, %s4017_s22  ;;  %p4022_p10 = scmp.lt.s32.totalorder %s2772_s3, %s2772_s3 }
 0x396   :  { %p4023_p11 = scmp.lt.s32.totalorder %s4017_s22, %s4017_s22 }
 0x398   :  { %s3050_s13 = sshll.u32 %s2764_s9, 12  ;;  %s3051_s1 = sshll.u32 %s2764_s9, 11 }
 0x399   :  { %s2770_s17 = scalar_lea.hbm %s5279_s10, %s3050_s13  ;;  %s5240_s21 = scalar_lea.hbm %s5280_s11, %s3051_s1 }
 0x39a   :  { %p4024_p12 = por %p4023_p11, %p4022_p10 }
 0x39c   :  { %p4025_p13 = pnand %p4024_p12, %p4018_p9 }
 0x39e   :  { %4028 = shalt.err (!%p4025_p13)
}
 0x39f   :  { %s4029_s23 = scalar_lea.hbm %s2770_s17, 4096  ;;  %s4031_s8 = scalar_lea.hbm %s5279_s10, 4096 }
 0x3a0   :  { %p4030_p0 = scmp.ne.s32.totalorder %s2770_s17, %s4029_s23  ;;  %p4032_p1 = scmp.lt.s32.totalorder %s2770_s17, %s5279_s10 }
 0x3a1   :  { %p4033_p2 = scmp.lt.s32.totalorder %s4031_s8, %s4029_s23 }
 0x3a3   :  { %p4034_p3 = por %p4033_p2, %p4032_p1 }
 0x3a5   :  { %p4035_p4 = pnand %p4034_p3, %p4030_p0 }
 0x3a7   :  { %4038 = shalt.err (!%p4035_p4)
}
 0x3a8   :  { %2777 = dma.vmem_to_hbm [thread:$0]  %s2772_s3, 4096, %s2770_s17, [#allocation10], %s4078_s26, %s4078_s26, %s4079_s27  }
 0x3a9   :  { %s4039_s2 = scalar_lea.vmem %s5232_s12, 2048  ;;  %p4044_p6 = scmp.lt.s32.totalorder %s5232_s12, %s5232_s12 }
 0x3aa   :  { %p4040_p5 = scmp.ne.s32.totalorder %s5232_s12, %s4039_s2  ;;  %p4045_p7 = scmp.lt.s32.totalorder %s4039_s2, %s4039_s2 }
 0x3ac   :  { %p4046_p8 = por %p4045_p7, %p4044_p6 }
 0x3ae   :  { %p4047_p9 = pnand %p4046_p8, %p4040_p5 }
 0x3b0   :  { %4050 = shalt.err (!%p4047_p9)
}
 0x3b1   :  { %s4051_s10 = scalar_lea.hbm %s5240_s21, 2048  ;;  %s4053_s0 = scalar_lea.hbm %s5280_s11, 2048 }
 0x3b2   :  { %p4052_p10 = scmp.ne.s32.totalorder %s5240_s21, %s4051_s10  ;;  %p4054_p11 = scmp.lt.s32.totalorder %s5240_s21, %s5280_s11 }
 0x3b3   :  { %p4055_p12 = scmp.lt.s32.totalorder %s4053_s0, %s4051_s10 }
 0x3b5   :  { %p4056_p13 = por %p4055_p12, %p4054_p11 }
 0x3b7   :  { %p4057_p0 = pnand %p4056_p13, %p4052_p10 }
 0x3b9   :  { %4060 = shalt.err (!%p4057_p0)
}
 0x3ba   :  { %2793 = dma.vmem_to_hbm [thread:$0]  %s5232_s12, 2048, %s5240_s21, [#allocation19], %s4072_s14, %s4072_s14, %s4073_s15  }
 0x3bb   :  { %4067 = dma.done.wait [#allocation10], 4096  }
 0x3bc   :  { %4068 = vsyncadd [#allocation10], 4294963200 }
 0x3bd   :  { %4069 = dma.done.wait [#allocation19], 2048  }
 0x3be   :  { %4070 = vsyncadd [#allocation19], 4294965248 }
 0x3bf   :  { %2800 = vsyncpa [#allocation9], 1 }
 0x3c0   :  { %2801 = vsyncpa [#allocation12], 1 }
 0x3c1   :  { %2802 = vsyncpa [#allocation15], 1 }
 0x3c2   :  { %2803 = vsyncpa [#allocation10], 1 }
 0x3c3   :  { %2804 = vsyncpa [#allocation19], 1 }

</bundles_post_ra>
